<compile_context>
chip_gen: v5e
topology: v5e:2x2
jax: 0.10.0
libtpu: 0.0.40
codegen_flags: <defaults>
</compile_context>

<pallas_src>
import functools
import math

import numpy as np
import jax
import jax.numpy as jnp
from jax import lax
from jax.experimental import pallas as pl
from jax.experimental.pallas import tpu as pltpu


# ----------------------------------------------------------------------------
# Static tap table for the 3x3 / pad=1 conv on a 4x4 grid:
# for each output position p = oh*4+ow, the (tap_index, input_position) pairs
# that are in-bounds.  Zero-padded taps are skipped entirely.
# ----------------------------------------------------------------------------
def _conv1_tap_table():
    table = []
    for oh in range(4):
        for ow in range(4):
            taps = []
            for kh in range(3):
                for kw in range(3):
                    ih, iw = oh + kh - 1, ow + kw - 1
                    if 0 <= ih < 4 and 0 <= iw < 4:
                        taps.append((kh * 3 + kw, ih * 4 + iw))
            table.append(tuple(taps))
    return tuple(table)


_TAPS = _conv1_tap_table()


# ----------------------------------------------------------------------------
# Fused Pallas kernel
# ----------------------------------------------------------------------------
def _final_block_kernel(x_ref, std_ref, w1_ref, b1_ref, w1s_ref, w2_ref,
                        b2_ref, w3_ref, b3_ref, out_ref, acc2_ref, *, batch):
    j = pl.program_id(0)
    nj = pl.num_programs(0)
    B = batch
    C = w2_ref.shape[2]                      # conv_2 output channels (full)

    @pl.when(j == 0)
    def _():
        acc2_ref[...] = jnp.zeros_like(acc2_ref)

    # conv_1 per-position bias for this output-channel tile:
    # equalized bias + folded constant-std-channel contribution.
    pos_bias = std_ref[...] * w1s_ref[...] + b1_ref[...]           # (16, T) f32

    # Load the 16 per-position activation blocks once (bf16, rows = batch).
    xblk = [x_ref[pl.ds(q * B, B), :] for q in range(16)]          # (B, Cin) bf16

    part = jnp.zeros((B, C), jnp.float32)
    for p, taps in enumerate(_TAPS):
        # conv_1 (3x3, pad=1) restricted to the in-bounds taps of position p.
        t0, q0 = taps[0]
        acc = jnp.dot(xblk[q0], w1_ref[t0], preferred_element_type=jnp.float32)
        for t, q in taps[1:]:
            acc = acc + jnp.dot(xblk[q], w1_ref[t],
                                preferred_element_type=jnp.float32)
        yp = acc + pos_bias[p:p + 1, :]                            # (B, T) f32
        yp = jnp.where(yp > 0, yp, 0.2 * yp).astype(jnp.bfloat16)  # LeakyReLU
        # conv_2 (4x4 valid -> 1x1): partial sum over this channel tile.
        part = part + jnp.dot(yp, w2_ref[p],
                              preferred_element_type=jnp.float32)  # (B, C)
    acc2_ref[...] += part

    # Last grid step: conv_2 bias + LeakyReLU + conv_3 (1x1).
    @pl.when(j == nj - 1)
    def _():
        y2 = acc2_ref[...] + b2_ref[...]
        y2 = jnp.where(y2 > 0, y2, 0.2 * y2)
        out = jnp.dot(y2, w3_ref[...], preferred_element_type=jnp.float32)
        out_ref[...] = (out + b3_ref[...]).astype(out_ref.dtype)


# ----------------------------------------------------------------------------
# Parameters (mirror the PyTorch __init__: weight ~ N(0,1), bias = 0)
# ----------------------------------------------------------------------------
def init_params(key, in_channels):
    k1, k2, k3 = jax.random.split(key, 3)
    return dict(
        w1=jax.random.normal(k1, (in_channels, in_channels + 1, 3, 3), jnp.float32),
        b1=jnp.zeros((in_channels,), jnp.float32),
        w2=jax.random.normal(k2, (in_channels, in_channels, 4, 4), jnp.float32),
        b2=jnp.zeros((in_channels,), jnp.float32),
        w3=jax.random.normal(k3, (1, in_channels, 1, 1), jnp.float32),
        b3=jnp.zeros((1,), jnp.float32),
    )


# ----------------------------------------------------------------------------
# One-time pre-bake: equalized-lr scale, matmul layout, bf16 cast
# ----------------------------------------------------------------------------
def prepare_block(params, weight_dtype=jnp.bfloat16):
    w1, b1 = params["w1"], params["b1"]
    w2, b2 = params["w2"], params["b2"]
    w3, b3 = params["w3"], params["b3"]
    c = int(w1.shape[0])
    cin1 = int(w1.shape[1])                      # = c + 1 (appended std channel)
    s1 = math.sqrt(2.0) / math.sqrt(9.0 * cin1)
    s2 = math.sqrt(2.0) / math.sqrt(16.0 * c)
    s3 = math.sqrt(2.0) / math.sqrt(1.0 * c)

    # conv_1 weights (real input channels only) in (tap, ci, co) matmul layout.
    W1 = jnp.transpose(w1[:, :c] * s1, (2, 3, 1, 0)).reshape(9, c, c)
    W1 = W1.astype(weight_dtype)

    # Constant-std-channel fold: per output position, sum of in-bounds taps.
    inb = np.zeros((16, 9), np.float32)
    for p, taps in enumerate(_TAPS):
        for t, _ in taps:
            inb[p, t] = 1.0
    wstd = (w1[:, c] * s1).reshape(c, 9)                       # (co, tap)
    W1S = (jnp.asarray(inb) @ wstd.T).astype(jnp.float32)      # (16, co)

    # conv_2 weights in (pos, ci, co) layout; conv_3 as (c, 1).
    W2 = jnp.transpose(w2 * s2, (2, 3, 1, 0)).reshape(16, c, c).astype(weight_dtype)
    W3 = (w3[:, :, 0, 0].T * s3).astype(jnp.float32)           # (c, 1)

    return dict(
        w1=W1, b1=b1.reshape(1, c).astype(jnp.float32), w1s=W1S,
        w2=W2, b2=b2.reshape(1, c).astype(jnp.float32),
        w3=W3, b3=b3.reshape(1, 1).astype(jnp.float32),
    )


# ----------------------------------------------------------------------------
# Shape-derived tiling + VMEM limit (prefers a single-step grid when it fits)
# ----------------------------------------------------------------------------
def _select_tile(batch, channels):
    R = 16 * batch

    def vmem_need(T):
        streamed = 2 * (9 * channels * T * 2      # conv_1 weight tile (bf16) x2 bufs
                        + 16 * T * channels * 2   # conv_2 weight tile (bf16) x2 bufs
                        + T * 4 + 16 * T * 4)     # bias / std-fold tiles (f32)
        resident = 2 * (R * channels * 2          # activations (bf16)
                        + 2 * channels * 4        # conv_2 bias + conv_3 weight
                        + 16 + batch * 4)         # scalars + output block
        scratch = batch * channels * 4            # conv_2 accumulator
        live = (16 * batch * channels * 2         # 16 position blocks (bf16)
                + 2 * batch * T * 4               # conv_1 partial / activated tile
                + batch * channels * 4            # conv_2 partial sum
                + 16 * T * 4)                     # per-position bias
        return streamed + resident + scratch + live

    try:                                          # generation-aware VMEM budget
        cap = int(pltpu.get_tpu_info().vmem_capacity_bytes)
    except Exception:
        cap = 64 * 1024 * 1024                    # assume the smallest (v7x) part
    budget = min(cap * 3 // 4, 100 * 1024 * 1024)

    candidates = [channels] + [t for t in (512, 256, 128)
                               if t < channels and channels % t == 0]
    T = candidates[-1]
    for cand in candidates:                       # largest tile that fits wins
        if vmem_need(cand) <= budget:
            T = cand
            break
    limit = int(min(budget, max(2 * vmem_need(T), 16 * 1024 * 1024)))
    return T, limit


# ----------------------------------------------------------------------------
# Forward pass: one fused pallas_call
# ----------------------------------------------------------------------------
@jax.jit
def msggan_dis_final_block(x, prep):
    Bsz, C, H, W = x.shape
    assert (H, W) == (4, 4), "DisFinalBlock expects a 4x4 spatial input"
    R = 16 * Bsz

    # MinibatchStdDev scalar (tiny reduction, kept off the kernel critical path).
    mu = jnp.mean(x, axis=0, keepdims=True)
    std = jnp.mean(jnp.sqrt(jnp.mean((x - mu) ** 2, axis=0) + 1e-8))
    std = std.reshape(1, 1).astype(jnp.float32)

    # Layout plumbing only: NCHW -> position-major rows (row = pos*B + b),
    # lanes = channels; cast once to bf16 (halves the activation DMA).
    x2d = jnp.transpose(x, (2, 3, 0, 1)).reshape(R, C).astype(jnp.bfloat16)

    T, vmem_limit = _select_tile(Bsz, C)
    nj = C // T

    kernel = functools.partial(_final_block_kernel, batch=Bsz)

    out = pl.pallas_call(
        kernel,
        out_shape=jax.ShapeDtypeStruct((Bsz, 1), jnp.float32),
        grid_spec=pltpu.PrefetchScalarGridSpec(
            num_scalar_prefetch=0,
            grid=(nj,),
            in_specs=[
                pl.BlockSpec((R, C), lambda j: (0, 0)),          # x (resident)
                pl.BlockSpec((1, 1), lambda j: (0, 0)),          # mbstd scalar
                pl.BlockSpec((9, C, T), lambda j: (0, 0, j)),    # conv_1 w tile (bf16)
                pl.BlockSpec((1, T), lambda j: (0, j)),          # conv_1 bias tile
                pl.BlockSpec((16, T), lambda j: (0, j)),         # std-fold tile
                pl.BlockSpec((16, T, C), lambda j: (0, j, 0)),   # conv_2 K-tile (bf16)
                pl.BlockSpec((1, C), lambda j: (0, 0)),          # conv_2 bias
                pl.BlockSpec((C, 1), lambda j: (0, 0)),          # conv_3 weight
                pl.BlockSpec((1, 1), lambda j: (0, 0)),          # conv_3 bias
            ],
            out_specs=pl.BlockSpec((Bsz, 1), lambda j: (0, 0)),
            scratch_shapes=[pltpu.VMEM((Bsz, C), jnp.float32)],  # conv_2 accumulator
        ),
        compiler_params=pltpu.CompilerParams(
            dimension_semantics=("arbitrary",),
            vmem_limit_bytes=vmem_limit,
        ),
    )(x2d, std, prep["w1"], prep["b1"], prep["w1s"], prep["w2"],
      prep["b2"], prep["w3"], prep["b3"])
    return out


# ----------------------------------------------------------------------------
# Pure-JAX reference (f32 weights, mirrors the PyTorch module)
# ----------------------------------------------------------------------------
def reference_forward(x, params):
    b, c, h, w = x.shape
    s1 = math.sqrt(2.0) / math.sqrt(9.0 * (c + 1))
    s2 = math.sqrt(2.0) / math.sqrt(16.0 * c)
    s3 = math.sqrt(2.0) / math.sqrt(1.0 * c)

    mu = x.mean(axis=0, keepdims=True)
    std = jnp.sqrt(((x - mu) ** 2).mean(axis=0) + 1e-8).mean()
    y = jnp.concatenate([x, jnp.full((b, 1, h, w), std, x.dtype)], axis=1)

    def conv(v, wgt, bias, pad):
        o = lax.conv_general_dilated(
            v, wgt, (1, 1), [(pad, pad), (pad, pad)],
            dimension_numbers=("NCHW", "OIHW", "NCHW"),
            precision=lax.Precision.HIGHEST)
        return o + bias.reshape(1, -1, 1, 1)

    lrelu = lambda t: jnp.where(t > 0, t, 0.2 * t)
    y = lrelu(conv(y, params["w1"] * s1, params["b1"], 1))
    y = lrelu(conv(y, params["w2"] * s2, params["b2"], 0))
    y = conv(y, params["w3"] * s3, params["b3"], 0)
    return y.reshape(b, -1)


if __name__ == "__main__":
    in_channels = 4
    batch, height, width = 2, 4, 4

    key = jax.random.PRNGKey(0)
    kx, kp = jax.random.split(key)
    x = jax.random.normal(kx, (batch, in_channels, height, width), jnp.float32)
    params = init_params(kp, in_channels)

    prep = prepare_block(params)                 # one-time weight pre-bake
    out = msggan_dis_final_block(x, prep)
    out = jax.block_until_ready(out)

    ref = reference_forward(x, params)
    assert out.shape == (batch, 1)
    err = float(jnp.max(jnp.abs(out - ref)))
    scale = float(jnp.max(jnp.abs(ref)))
    # bf16 weight/activation streaming => small relative error vs f32 reference
    assert err < 5e-2 * (1.0 + scale), (err, scale)
    print("KERNEL_OK")
</pallas_src>

<mosaic_0001>
module attributes {stable_mosaic.version = 11 : i64} {
  func.func @_final_block_kernel(%arg0: i32, %arg1: memref<32x4xbf16, #tpu.memory_space<vmem>>, %arg2: memref<1x1xf32, #tpu.memory_space<vmem>>, %arg3: memref<9x4x4xbf16, #tpu.memory_space<vmem>>, %arg4: memref<1x4xf32, #tpu.memory_space<vmem>>, %arg5: memref<16x4xf32, #tpu.memory_space<vmem>>, %arg6: memref<16x4x4xbf16, #tpu.memory_space<vmem>>, %arg7: memref<1x4xf32, #tpu.memory_space<vmem>>, %arg8: memref<4x1xf32, #tpu.memory_space<vmem>>, %arg9: memref<1x1xf32, #tpu.memory_space<vmem>>, %arg10: memref<2x1xf32, #tpu.memory_space<vmem>>, %arg11: memref<2x4xf32, #tpu.memory_space<vmem>>) attributes {dimension_semantics = [#tpu.dimension_semantics<arbitrary>], iteration_bounds = array<i64: 1>, scalar_prefetch = 0 : i64, scratch_operands = 1 : i64, tpu.core_type = #tpu.core_type<tc>, window_params = [{pipeline_mode = #tpu.pipeline_mode<synchronous>, transform_indices = @transform_0, window_bounds = array<i64: 32, 4>}, {pipeline_mode = #tpu.pipeline_mode<synchronous>, transform_indices = @transform_1, window_bounds = array<i64: 1, 1>}, {transform_indices = @transform_2, window_bounds = array<i64: 9, 4, 4>}, {transform_indices = @transform_3, window_bounds = array<i64: 1, 4>}, {transform_indices = @transform_4, window_bounds = array<i64: 16, 4>}, {transform_indices = @transform_5, window_bounds = array<i64: 16, 4, 4>}, {pipeline_mode = #tpu.pipeline_mode<synchronous>, transform_indices = @transform_6, window_bounds = array<i64: 1, 4>}, {pipeline_mode = #tpu.pipeline_mode<synchronous>, transform_indices = @transform_7, window_bounds = array<i64: 4, 1>}, {pipeline_mode = #tpu.pipeline_mode<synchronous>, transform_indices = @transform_8, window_bounds = array<i64: 1, 1>}, {pipeline_mode = #tpu.pipeline_mode<synchronous>, transform_indices = @transform_9, window_bounds = array<i64: 2, 1>}]} {
    %c0_i32 = arith.constant 0 : i32
    %0 = arith.cmpi eq, %arg0, %c0_i32 : i32
    %1 = arith.extui %0 : i1 to i32
    %c0_i32_0 = arith.constant 0 : i32
    %2 = arith.cmpi ne, %1, %c0_i32_0 : i32
    scf.if %2 {
      %cst_517 = arith.constant 0.000000e+00 : f32
      %625 = vector.broadcast %cst_517 : f32 to vector<2x4xf32>
      %c0_518 = arith.constant 0 : index
      %c0_519 = arith.constant 0 : index
      %626 = vector.load %arg11[%c0_518, %c0_519] : memref<2x4xf32, #tpu.memory_space<vmem>>, vector<2x4xf32>
      tpu.vector_store %arg11[%c0_518, %c0_519], %625 {strides = array<i32>} : memref<2x4xf32, #tpu.memory_space<vmem>>, vector<2x4xf32>,
    } else {
    }
    %c0 = arith.constant 0 : index
    %c0_1 = arith.constant 0 : index
    %3 = vector.load %arg2[%c0, %c0_1] : memref<1x1xf32, #tpu.memory_space<vmem>>, vector<1x1xf32>
    %c0_2 = arith.constant 0 : index
    %c0_3 = arith.constant 0 : index
    %4 = vector.load %arg5[%c0_2, %c0_3] : memref<16x4xf32, #tpu.memory_space<vmem>>, vector<16x4xf32>
    %5 = vector.broadcast %3 : vector<1x1xf32> to vector<16x4xf32>
    %6 = arith.mulf %5, %4 : vector<16x4xf32>
    %c0_4 = arith.constant 0 : index
    %c0_5 = arith.constant 0 : index
    %7 = vector.load %arg4[%c0_4, %c0_5] : memref<1x4xf32, #tpu.memory_space<vmem>>, vector<1x4xf32>
    %8 = vector.broadcast %7 : vector<1x4xf32> to vector<16x4xf32>
    %9 = arith.addf %6, %8 : vector<16x4xf32>
    %c0_6 = arith.constant 0 : index
    %c0_7 = arith.constant 0 : index
    %10 = vector.load %arg1[%c0_6, %c0_7] : memref<32x4xbf16, #tpu.memory_space<vmem>>, vector<2x4xbf16>
    %c2 = arith.constant 2 : index
    %c0_8 = arith.constant 0 : index
    %11 = vector.load %arg1[%c2, %c0_8] : memref<32x4xbf16, #tpu.memory_space<vmem>>, vector<2x4xbf16>
    %c4 = arith.constant 4 : index
    %c0_9 = arith.constant 0 : index
    %12 = vector.load %arg1[%c4, %c0_9] : memref<32x4xbf16, #tpu.memory_space<vmem>>, vector<2x4xbf16>
    %c6 = arith.constant 6 : index
    %c0_10 = arith.constant 0 : index
    %13 = vector.load %arg1[%c6, %c0_10] : memref<32x4xbf16, #tpu.memory_space<vmem>>, vector<2x4xbf16>
    %c8 = arith.constant 8 : index
    %c0_11 = arith.constant 0 : index
    %14 = vector.load %arg1[%c8, %c0_11] : memref<32x4xbf16, #tpu.memory_space<vmem>>, vector<2x4xbf16>
    %c10 = arith.constant 10 : index
    %c0_12 = arith.constant 0 : index
    %15 = vector.load %arg1[%c10, %c0_12] : memref<32x4xbf16, #tpu.memory_space<vmem>>, vector<2x4xbf16>
    %c12 = arith.constant 12 : index
    %c0_13 = arith.constant 0 : index
    %16 = vector.load %arg1[%c12, %c0_13] : memref<32x4xbf16, #tpu.memory_space<vmem>>, vector<2x4xbf16>
    %c14 = arith.constant 14 : index
    %c0_14 = arith.constant 0 : index
    %17 = vector.load %arg1[%c14, %c0_14] : memref<32x4xbf16, #tpu.memory_space<vmem>>, vector<2x4xbf16>
    %c16 = arith.constant 16 : index
    %c0_15 = arith.constant 0 : index
    %18 = vector.load %arg1[%c16, %c0_15] : memref<32x4xbf16, #tpu.memory_space<vmem>>, vector<2x4xbf16>
    %c18 = arith.constant 18 : index
    %c0_16 = arith.constant 0 : index
    %19 = vector.load %arg1[%c18, %c0_16] : memref<32x4xbf16, #tpu.memory_space<vmem>>, vector<2x4xbf16>
    %c20 = arith.constant 20 : index
    %c0_17 = arith.constant 0 : index
    %20 = vector.load %arg1[%c20, %c0_17] : memref<32x4xbf16, #tpu.memory_space<vmem>>, vector<2x4xbf16>
    %c22 = arith.constant 22 : index
    %c0_18 = arith.constant 0 : index
    %21 = vector.load %arg1[%c22, %c0_18] : memref<32x4xbf16, #tpu.memory_space<vmem>>, vector<2x4xbf16>
    %c24 = arith.constant 24 : index
    %c0_19 = arith.constant 0 : index
    %22 = vector.load %arg1[%c24, %c0_19] : memref<32x4xbf16, #tpu.memory_space<vmem>>, vector<2x4xbf16>
    %c26 = arith.constant 26 : index
    %c0_20 = arith.constant 0 : index
    %23 = vector.load %arg1[%c26, %c0_20] : memref<32x4xbf16, #tpu.memory_space<vmem>>, vector<2x4xbf16>
    %c28 = arith.constant 28 : index
    %c0_21 = arith.constant 0 : index
    %24 = vector.load %arg1[%c28, %c0_21] : memref<32x4xbf16, #tpu.memory_space<vmem>>, vector<2x4xbf16>
    %c30 = arith.constant 30 : index
    %c0_22 = arith.constant 0 : index
    %25 = vector.load %arg1[%c30, %c0_22] : memref<32x4xbf16, #tpu.memory_space<vmem>>, vector<2x4xbf16>
    %cst = arith.constant 0.000000e+00 : f32
    %26 = vector.broadcast %cst : f32 to vector<2x4xf32>
    %c4_23 = arith.constant 4 : index
    %c0_24 = arith.constant 0 : index
    %c0_25 = arith.constant 0 : index
    %27 = vector.load %arg3[%c4_23, %c0_24, %c0_25] : memref<9x4x4xbf16, #tpu.memory_space<vmem>>, vector<1x4x4xbf16>
    %28 = vector.shape_cast %27 : vector<1x4x4xbf16> to vector<4x4xbf16>
    %cst_26 = arith.constant dense<0.000000e+00> : vector<2x4xf32>
    %29 = tpu.matmul %10, %28, %cst_26 {dimension_numbers = #tpu.dot_dimension_numbers<[1], [0], [0], [1], [0, 0, 1, 1], [], []>} : vector<2x4xbf16>, vector<4x4xbf16>, vector<2x4xf32> -> vector<2x4xf32>
    %c5 = arith.constant 5 : index
    %c0_27 = arith.constant 0 : index
    %c0_28 = arith.constant 0 : index
    %30 = vector.load %arg3[%c5, %c0_27, %c0_28] : memref<9x4x4xbf16, #tpu.memory_space<vmem>>, vector<1x4x4xbf16>
    %31 = vector.shape_cast %30 : vector<1x4x4xbf16> to vector<4x4xbf16>
    %cst_29 = arith.constant dense<0.000000e+00> : vector<2x4xf32>
    %32 = tpu.matmul %11, %31, %cst_29 {dimension_numbers = #tpu.dot_dimension_numbers<[1], [0], [0], [1], [0, 0, 1, 1], [], []>} : vector<2x4xbf16>, vector<4x4xbf16>, vector<2x4xf32> -> vector<2x4xf32>
    %33 = arith.addf %29, %32 : vector<2x4xf32>
    %c7 = arith.constant 7 : index
    %c0_30 = arith.constant 0 : index
    %c0_31 = arith.constant 0 : index
    %34 = vector.load %arg3[%c7, %c0_30, %c0_31] : memref<9x4x4xbf16, #tpu.memory_space<vmem>>, vector<1x4x4xbf16>
    %35 = vector.shape_cast %34 : vector<1x4x4xbf16> to vector<4x4xbf16>
    %cst_32 = arith.constant dense<0.000000e+00> : vector<2x4xf32>
    %36 = tpu.matmul %14, %35, %cst_32 {dimension_numbers = #tpu.dot_dimension_numbers<[1], [0], [0], [1], [0, 0, 1, 1], [], []>} : vector<2x4xbf16>, vector<4x4xbf16>, vector<2x4xf32> -> vector<2x4xf32>
    %37 = arith.addf %33, %36 : vector<2x4xf32>
    %c8_33 = arith.constant 8 : index
    %c0_34 = arith.constant 0 : index
    %c0_35 = arith.constant 0 : index
    %38 = vector.load %arg3[%c8_33, %c0_34, %c0_35] : memref<9x4x4xbf16, #tpu.memory_space<vmem>>, vector<1x4x4xbf16>
    %39 = vector.shape_cast %38 : vector<1x4x4xbf16> to vector<4x4xbf16>
    %cst_36 = arith.constant dense<0.000000e+00> : vector<2x4xf32>
    %40 = tpu.matmul %15, %39, %cst_36 {dimension_numbers = #tpu.dot_dimension_numbers<[1], [0], [0], [1], [0, 0, 1, 1], [], []>} : vector<2x4xbf16>, vector<4x4xbf16>, vector<2x4xf32> -> vector<2x4xf32>
    %41 = arith.addf %37, %40 : vector<2x4xf32>
    %42 = vector.extract_strided_slice %9 {offsets = [0, 0], sizes = [1, 4], strides = [1, 1]} : vector<16x4xf32> to vector<1x4xf32>
    %43 = vector.broadcast %42 : vector<1x4xf32> to vector<2x4xf32>
    %44 = arith.addf %41, %43 : vector<2x4xf32>
    %cst_37 = arith.constant 0.000000e+00 : f32
    %45 = vector.broadcast %cst_37 : f32 to vector<2x4xf32>
    %46 = arith.cmpf ogt, %44, %45 : vector<2x4xf32>
    %cst_38 = arith.constant 2.000000e-01 : f32
    %47 = vector.broadcast %cst_38 : f32 to vector<2x4xf32>
    %48 = arith.mulf %47, %44 : vector<2x4xf32>
    %49 = arith.select %46, %44, %48 : vector<2x4xi1>, vector<2x4xf32>
    %50 = arith.truncf %49 : vector<2x4xf32> to vector<2x4xbf16>
    %c0_39 = arith.constant 0 : index
    %c0_40 = arith.constant 0 : index
    %c0_41 = arith.constant 0 : index
    %51 = vector.load %arg6[%c0_39, %c0_40, %c0_41] : memref<16x4x4xbf16, #tpu.memory_space<vmem>>, vector<1x4x4xbf16>
    %52 = vector.shape_cast %51 : vector<1x4x4xbf16> to vector<4x4xbf16>
    %cst_42 = arith.constant dense<0.000000e+00> : vector<2x4xf32>
    %53 = tpu.matmul %50, %52, %cst_42 {dimension_numbers = #tpu.dot_dimension_numbers<[1], [0], [0], [1], [0, 0, 1, 1], [], []>} : vector<2x4xbf16>, vector<4x4xbf16>, vector<2x4xf32> -> vector<2x4xf32>
    %54 = arith.addf %26, %53 : vector<2x4xf32>
    %c3 = arith.constant 3 : index
    %c0_43 = arith.constant 0 : index
    %c0_44 = arith.constant 0 : index
    %55 = vector.load %arg3[%c3, %c0_43, %c0_44] : memref<9x4x4xbf16, #tpu.memory_space<vmem>>, vector<1x4x4xbf16>
    %56 = vector.shape_cast %55 : vector<1x4x4xbf16> to vector<4x4xbf16>
    %cst_45 = arith.constant dense<0.000000e+00> : vector<2x4xf32>
    %57 = tpu.matmul %10, %56, %cst_45 {dimension_numbers = #tpu.dot_dimension_numbers<[1], [0], [0], [1], [0, 0, 1, 1], [], []>} : vector<2x4xbf16>, vector<4x4xbf16>, vector<2x4xf32> -> vector<2x4xf32>
    %c4_46 = arith.constant 4 : index
    %c0_47 = arith.constant 0 : index
    %c0_48 = arith.constant 0 : index
    %58 = vector.load %arg3[%c4_46, %c0_47, %c0_48] : memref<9x4x4xbf16, #tpu.memory_space<vmem>>, vector<1x4x4xbf16>
    %59 = vector.shape_cast %58 : vector<1x4x4xbf16> to vector<4x4xbf16>
    %cst_49 = arith.constant dense<0.000000e+00> : vector<2x4xf32>
    %60 = tpu.matmul %11, %59, %cst_49 {dimension_numbers = #tpu.dot_dimension_numbers<[1], [0], [0], [1], [0, 0, 1, 1], [], []>} : vector<2x4xbf16>, vector<4x4xbf16>, vector<2x4xf32> -> vector<2x4xf32>
    %61 = arith.addf %57, %60 : vector<2x4xf32>
    %c5_50 = arith.constant 5 : index
    %c0_51 = arith.constant 0 : index
    %c0_52 = arith.constant 0 : index
    %62 = vector.load %arg3[%c5_50, %c0_51, %c0_52] : memref<9x4x4xbf16, #tpu.memory_space<vmem>>, vector<1x4x4xbf16>
    %63 = vector.shape_cast %62 : vector<1x4x4xbf16> to vector<4x4xbf16>
    %cst_53 = arith.constant dense<0.000000e+00> : vector<2x4xf32>
    %64 = tpu.matmul %12, %63, %cst_53 {dimension_numbers = #tpu.dot_dimension_numbers<[1], [0], [0], [1], [0, 0, 1, 1], [], []>} : vector<2x4xbf16>, vector<4x4xbf16>, vector<2x4xf32> -> vector<2x4xf32>
    %65 = arith.addf %61, %64 : vector<2x4xf32>
    %c6_54 = arith.constant 6 : index
    %c0_55 = arith.constant 0 : index
    %c0_56 = arith.constant 0 : index
    %66 = vector.load %arg3[%c6_54, %c0_55, %c0_56] : memref<9x4x4xbf16, #tpu.memory_space<vmem>>, vector<1x4x4xbf16>
    %67 = vector.shape_cast %66 : vector<1x4x4xbf16> to vector<4x4xbf16>
    %cst_57 = arith.constant dense<0.000000e+00> : vector<2x4xf32>
    %68 = tpu.matmul %14, %67, %cst_57 {dimension_numbers = #tpu.dot_dimension_numbers<[1], [0], [0], [1], [0, 0, 1, 1], [], []>} : vector<2x4xbf16>, vector<4x4xbf16>, vector<2x4xf32> -> vector<2x4xf32>
    %69 = arith.addf %65, %68 : vector<2x4xf32>
    %c7_58 = arith.constant 7 : index
    %c0_59 = arith.constant 0 : index
    %c0_60 = arith.constant 0 : index
    %70 = vector.load %arg3[%c7_58, %c0_59, %c0_60] : memref<9x4x4xbf16, #tpu.memory_space<vmem>>, vector<1x4x4xbf16>
    %71 = vector.shape_cast %70 : vector<1x4x4xbf16> to vector<4x4xbf16>
    %cst_61 = arith.constant dense<0.000000e+00> : vector<2x4xf32>
    %72 = tpu.matmul %15, %71, %cst_61 {dimension_numbers = #tpu.dot_dimension_numbers<[1], [0], [0], [1], [0, 0, 1, 1], [], []>} : vector<2x4xbf16>, vector<4x4xbf16>, vector<2x4xf32> -> vector<2x4xf32>
    %73 = arith.addf %69, %72 : vector<2x4xf32>
    %c8_62 = arith.constant 8 : index
    %c0_63 = arith.constant 0 : index
    %c0_64 = arith.constant 0 : index
    %74 = vector.load %arg3[%c8_62, %c0_63, %c0_64] : memref<9x4x4xbf16, #tpu.memory_space<vmem>>, vector<1x4x4xbf16>
    %75 = vector.shape_cast %74 : vector<1x4x4xbf16> to vector<4x4xbf16>
    %cst_65 = arith.constant dense<0.000000e+00> : vector<2x4xf32>
    %76 = tpu.matmul %16, %75, %cst_65 {dimension_numbers = #tpu.dot_dimension_numbers<[1], [0], [0], [1], [0, 0, 1, 1], [], []>} : vector<2x4xbf16>, vector<4x4xbf16>, vector<2x4xf32> -> vector<2x4xf32>
    %77 = arith.addf %73, %76 : vector<2x4xf32>
    %78 = vector.extract_strided_slice %9 {offsets = [1, 0], sizes = [1, 4], strides = [1, 1]} : vector<16x4xf32> to vector<1x4xf32>
    %79 = vector.broadcast %78 : vector<1x4xf32> to vector<2x4xf32>
    %80 = arith.addf %77, %79 : vector<2x4xf32>
    %cst_66 = arith.constant 0.000000e+00 : f32
    %81 = vector.broadcast %cst_66 : f32 to vector<2x4xf32>
    %82 = arith.cmpf ogt, %80, %81 : vector<2x4xf32>
    %cst_67 = arith.constant 2.000000e-01 : f32
    %83 = vector.broadcast %cst_67 : f32 to vector<2x4xf32>
    %84 = arith.mulf %83, %80 : vector<2x4xf32>
    %85 = arith.select %82, %80, %84 : vector<2x4xi1>, vector<2x4xf32>
    %86 = arith.truncf %85 : vector<2x4xf32> to vector<2x4xbf16>
    %c1 = arith.constant 1 : index
    %c0_68 = arith.constant 0 : index
    %c0_69 = arith.constant 0 : index
    %87 = vector.load %arg6[%c1, %c0_68, %c0_69] : memref<16x4x4xbf16, #tpu.memory_space<vmem>>, vector<1x4x4xbf16>
    %88 = vector.shape_cast %87 : vector<1x4x4xbf16> to vector<4x4xbf16>
    %cst_70 = arith.constant dense<0.000000e+00> : vector<2x4xf32>
    %89 = tpu.matmul %86, %88, %cst_70 {dimension_numbers = #tpu.dot_dimension_numbers<[1], [0], [0], [1], [0, 0, 1, 1], [], []>} : vector<2x4xbf16>, vector<4x4xbf16>, vector<2x4xf32> -> vector<2x4xf32>
    %90 = arith.addf %54, %89 : vector<2x4xf32>
    %c3_71 = arith.constant 3 : index
    %c0_72 = arith.constant 0 : index
    %c0_73 = arith.constant 0 : index
    %91 = vector.load %arg3[%c3_71, %c0_72, %c0_73] : memref<9x4x4xbf16, #tpu.memory_space<vmem>>, vector<1x4x4xbf16>
    %92 = vector.shape_cast %91 : vector<1x4x4xbf16> to vector<4x4xbf16>
    %cst_74 = arith.constant dense<0.000000e+00> : vector<2x4xf32>
    %93 = tpu.matmul %11, %92, %cst_74 {dimension_numbers = #tpu.dot_dimension_numbers<[1], [0], [0], [1], [0, 0, 1, 1], [], []>} : vector<2x4xbf16>, vector<4x4xbf16>, vector<2x4xf32> -> vector<2x4xf32>
    %c4_75 = arith.constant 4 : index
    %c0_76 = arith.constant 0 : index
    %c0_77 = arith.constant 0 : index
    %94 = vector.load %arg3[%c4_75, %c0_76, %c0_77] : memref<9x4x4xbf16, #tpu.memory_space<vmem>>, vector<1x4x4xbf16>
    %95 = vector.shape_cast %94 : vector<1x4x4xbf16> to vector<4x4xbf16>
    %cst_78 = arith.constant dense<0.000000e+00> : vector<2x4xf32>
    %96 = tpu.matmul %12, %95, %cst_78 {dimension_numbers = #tpu.dot_dimension_numbers<[1], [0], [0], [1], [0, 0, 1, 1], [], []>} : vector<2x4xbf16>, vector<4x4xbf16>, vector<2x4xf32> -> vector<2x4xf32>
    %97 = arith.addf %93, %96 : vector<2x4xf32>
    %c5_79 = arith.constant 5 : index
    %c0_80 = arith.constant 0 : index
    %c0_81 = arith.constant 0 : index
    %98 = vector.load %arg3[%c5_79, %c0_80, %c0_81] : memref<9x4x4xbf16, #tpu.memory_space<vmem>>, vector<1x4x4xbf16>
    %99 = vector.shape_cast %98 : vector<1x4x4xbf16> to vector<4x4xbf16>
    %cst_82 = arith.constant dense<0.000000e+00> : vector<2x4xf32>
    %100 = tpu.matmul %13, %99, %cst_82 {dimension_numbers = #tpu.dot_dimension_numbers<[1], [0], [0], [1], [0, 0, 1, 1], [], []>} : vector<2x4xbf16>, vector<4x4xbf16>, vector<2x4xf32> -> vector<2x4xf32>
    %101 = arith.addf %97, %100 : vector<2x4xf32>
    %c6_83 = arith.constant 6 : index
    %c0_84 = arith.constant 0 : index
    %c0_85 = arith.constant 0 : index
    %102 = vector.load %arg3[%c6_83, %c0_84, %c0_85] : memref<9x4x4xbf16, #tpu.memory_space<vmem>>, vector<1x4x4xbf16>
    %103 = vector.shape_cast %102 : vector<1x4x4xbf16> to vector<4x4xbf16>
    %cst_86 = arith.constant dense<0.000000e+00> : vector<2x4xf32>
    %104 = tpu.matmul %15, %103, %cst_86 {dimension_numbers = #tpu.dot_dimension_numbers<[1], [0], [0], [1], [0, 0, 1, 1], [], []>} : vector<2x4xbf16>, vector<4x4xbf16>, vector<2x4xf32> -> vector<2x4xf32>
    %105 = arith.addf %101, %104 : vector<2x4xf32>
    %c7_87 = arith.constant 7 : index
    %c0_88 = arith.constant 0 : index
    %c0_89 = arith.constant 0 : index
    %106 = vector.load %arg3[%c7_87, %c0_88, %c0_89] : memref<9x4x4xbf16, #tpu.memory_space<vmem>>, vector<1x4x4xbf16>
    %107 = vector.shape_cast %106 : vector<1x4x4xbf16> to vector<4x4xbf16>
    %cst_90 = arith.constant dense<0.000000e+00> : vector<2x4xf32>
    %108 = tpu.matmul %16, %107, %cst_90 {dimension_numbers = #tpu.dot_dimension_numbers<[1], [0], [0], [1], [0, 0, 1, 1], [], []>} : vector<2x4xbf16>, vector<4x4xbf16>, vector<2x4xf32> -> vector<2x4xf32>
    %109 = arith.addf %105, %108 : vector<2x4xf32>
    %c8_91 = arith.constant 8 : index
    %c0_92 = arith.constant 0 : index
    %c0_93 = arith.constant 0 : index
    %110 = vector.load %arg3[%c8_91, %c0_92, %c0_93] : memref<9x4x4xbf16, #tpu.memory_space<vmem>>, vector<1x4x4xbf16>
    %111 = vector.shape_cast %110 : vector<1x4x4xbf16> to vector<4x4xbf16>
    %cst_94 = arith.constant dense<0.000000e+00> : vector<2x4xf32>
    %112 = tpu.matmul %17, %111, %cst_94 {dimension_numbers = #tpu.dot_dimension_numbers<[1], [0], [0], [1], [0, 0, 1, 1], [], []>} : vector<2x4xbf16>, vector<4x4xbf16>, vector<2x4xf32> -> vector<2x4xf32>
    %113 = arith.addf %109, %112 : vector<2x4xf32>
    %114 = vector.extract_strided_slice %9 {offsets = [2, 0], sizes = [1, 4], strides = [1, 1]} : vector<16x4xf32> to vector<1x4xf32>
    %115 = vector.broadcast %114 : vector<1x4xf32> to vector<2x4xf32>
    %116 = arith.addf %113, %115 : vector<2x4xf32>
    %cst_95 = arith.constant 0.000000e+00 : f32
    %117 = vector.broadcast %cst_95 : f32 to vector<2x4xf32>
    %118 = arith.cmpf ogt, %116, %117 : vector<2x4xf32>
    %cst_96 = arith.constant 2.000000e-01 : f32
    %119 = vector.broadcast %cst_96 : f32 to vector<2x4xf32>
    %120 = arith.mulf %119, %116 : vector<2x4xf32>
    %121 = arith.select %118, %116, %120 : vector<2x4xi1>, vector<2x4xf32>
    %122 = arith.truncf %121 : vector<2x4xf32> to vector<2x4xbf16>
    %c2_97 = arith.constant 2 : index
    %c0_98 = arith.constant 0 : index
    %c0_99 = arith.constant 0 : index
    %123 = vector.load %arg6[%c2_97, %c0_98, %c0_99] : memref<16x4x4xbf16, #tpu.memory_space<vmem>>, vector<1x4x4xbf16>
    %124 = vector.shape_cast %123 : vector<1x4x4xbf16> to vector<4x4xbf16>
    %cst_100 = arith.constant dense<0.000000e+00> : vector<2x4xf32>
    %125 = tpu.matmul %122, %124, %cst_100 {dimension_numbers = #tpu.dot_dimension_numbers<[1], [0], [0], [1], [0, 0, 1, 1], [], []>} : vector<2x4xbf16>, vector<4x4xbf16>, vector<2x4xf32> -> vector<2x4xf32>
    %126 = arith.addf %90, %125 : vector<2x4xf32>
    %c3_101 = arith.constant 3 : index
    %c0_102 = arith.constant 0 : index
    %c0_103 = arith.constant 0 : index
    %127 = vector.load %arg3[%c3_101, %c0_102, %c0_103] : memref<9x4x4xbf16, #tpu.memory_space<vmem>>, vector<1x4x4xbf16>
    %128 = vector.shape_cast %127 : vector<1x4x4xbf16> to vector<4x4xbf16>
    %cst_104 = arith.constant dense<0.000000e+00> : vector<2x4xf32>
    %129 = tpu.matmul %12, %128, %cst_104 {dimension_numbers = #tpu.dot_dimension_numbers<[1], [0], [0], [1], [0, 0, 1, 1], [], []>} : vector<2x4xbf16>, vector<4x4xbf16>, vector<2x4xf32> -> vector<2x4xf32>
    %c4_105 = arith.constant 4 : index
    %c0_106 = arith.constant 0 : index
    %c0_107 = arith.constant 0 : index
    %130 = vector.load %arg3[%c4_105, %c0_106, %c0_107] : memref<9x4x4xbf16, #tpu.memory_space<vmem>>, vector<1x4x4xbf16>
    %131 = vector.shape_cast %130 : vector<1x4x4xbf16> to vector<4x4xbf16>
    %cst_108 = arith.constant dense<0.000000e+00> : vector<2x4xf32>
    %132 = tpu.matmul %13, %131, %cst_108 {dimension_numbers = #tpu.dot_dimension_numbers<[1], [0], [0], [1], [0, 0, 1, 1], [], []>} : vector<2x4xbf16>, vector<4x4xbf16>, vector<2x4xf32> -> vector<2x4xf32>
    %133 = arith.addf %129, %132 : vector<2x4xf32>
    %c6_109 = arith.constant 6 : index
    %c0_110 = arith.constant 0 : index
    %c0_111 = arith.constant 0 : index
    %134 = vector.load %arg3[%c6_109, %c0_110, %c0_111] : memref<9x4x4xbf16, #tpu.memory_space<vmem>>, vector<1x4x4xbf16>
    %135 = vector.shape_cast %134 : vector<1x4x4xbf16> to vector<4x4xbf16>
    %cst_112 = arith.constant dense<0.000000e+00> : vector<2x4xf32>
    %136 = tpu.matmul %16, %135, %cst_112 {dimension_numbers = #tpu.dot_dimension_numbers<[1], [0], [0], [1], [0, 0, 1, 1], [], []>} : vector<2x4xbf16>, vector<4x4xbf16>, vector<2x4xf32> -> vector<2x4xf32>
    %137 = arith.addf %133, %136 : vector<2x4xf32>
    %c7_113 = arith.constant 7 : index
    %c0_114 = arith.constant 0 : index
    %c0_115 = arith.constant 0 : index
    %138 = vector.load %arg3[%c7_113, %c0_114, %c0_115] : memref<9x4x4xbf16, #tpu.memory_space<vmem>>, vector<1x4x4xbf16>
    %139 = vector.shape_cast %138 : vector<1x4x4xbf16> to vector<4x4xbf16>
    %cst_116 = arith.constant dense<0.000000e+00> : vector<2x4xf32>
    %140 = tpu.matmul %17, %139, %cst_116 {dimension_numbers = #tpu.dot_dimension_numbers<[1], [0], [0], [1], [0, 0, 1, 1], [], []>} : vector<2x4xbf16>, vector<4x4xbf16>, vector<2x4xf32> -> vector<2x4xf32>
    %141 = arith.addf %137, %140 : vector<2x4xf32>
    %142 = vector.extract_strided_slice %9 {offsets = [3, 0], sizes = [1, 4], strides = [1, 1]} : vector<16x4xf32> to vector<1x4xf32>
    %143 = vector.broadcast %142 : vector<1x4xf32> to vector<2x4xf32>
    %144 = arith.addf %141, %143 : vector<2x4xf32>
    %cst_117 = arith.constant 0.000000e+00 : f32
    %145 = vector.broadcast %cst_117 : f32 to vector<2x4xf32>
    %146 = arith.cmpf ogt, %144, %145 : vector<2x4xf32>
    %cst_118 = arith.constant 2.000000e-01 : f32
    %147 = vector.broadcast %cst_118 : f32 to vector<2x4xf32>
    %148 = arith.mulf %147, %144 : vector<2x4xf32>
    %149 = arith.select %146, %144, %148 : vector<2x4xi1>, vector<2x4xf32>
    %150 = arith.truncf %149 : vector<2x4xf32> to vector<2x4xbf16>
    %c3_119 = arith.constant 3 : index
    %c0_120 = arith.constant 0 : index
    %c0_121 = arith.constant 0 : index
    %151 = vector.load %arg6[%c3_119, %c0_120, %c0_121] : memref<16x4x4xbf16, #tpu.memory_space<vmem>>, vector<1x4x4xbf16>
    %152 = vector.shape_cast %151 : vector<1x4x4xbf16> to vector<4x4xbf16>
    %cst_122 = arith.constant dense<0.000000e+00> : vector<2x4xf32>
    %153 = tpu.matmul %150, %152, %cst_122 {dimension_numbers = #tpu.dot_dimension_numbers<[1], [0], [0], [1], [0, 0, 1, 1], [], []>} : vector<2x4xbf16>, vector<4x4xbf16>, vector<2x4xf32> -> vector<2x4xf32>
    %154 = arith.addf %126, %153 : vector<2x4xf32>
    %c1_123 = arith.constant 1 : index
    %c0_124 = arith.constant 0 : index
    %c0_125 = arith.constant 0 : index
    %155 = vector.load %arg3[%c1_123, %c0_124, %c0_125] : memref<9x4x4xbf16, #tpu.memory_space<vmem>>, vector<1x4x4xbf16>
    %156 = vector.shape_cast %155 : vector<1x4x4xbf16> to vector<4x4xbf16>
    %cst_126 = arith.constant dense<0.000000e+00> : vector<2x4xf32>
    %157 = tpu.matmul %10, %156, %cst_126 {dimension_numbers = #tpu.dot_dimension_numbers<[1], [0], [0], [1], [0, 0, 1, 1], [], []>} : vector<2x4xbf16>, vector<4x4xbf16>, vector<2x4xf32> -> vector<2x4xf32>
    %c2_127 = arith.constant 2 : index
    %c0_128 = arith.constant 0 : index
    %c0_129 = arith.constant 0 : index
    %158 = vector.load %arg3[%c2_127, %c0_128, %c0_129] : memref<9x4x4xbf16, #tpu.memory_space<vmem>>, vector<1x4x4xbf16>
    %159 = vector.shape_cast %158 : vector<1x4x4xbf16> to vector<4x4xbf16>
    %cst_130 = arith.constant dense<0.000000e+00> : vector<2x4xf32>
    %160 = tpu.matmul %11, %159, %cst_130 {dimension_numbers = #tpu.dot_dimension_numbers<[1], [0], [0], [1], [0, 0, 1, 1], [], []>} : vector<2x4xbf16>, vector<4x4xbf16>, vector<2x4xf32> -> vector<2x4xf32>
    %161 = arith.addf %157, %160 : vector<2x4xf32>
    %c4_131 = arith.constant 4 : index
    %c0_132 = arith.constant 0 : index
    %c0_133 = arith.constant 0 : index
    %162 = vector.load %arg3[%c4_131, %c0_132, %c0_133] : memref<9x4x4xbf16, #tpu.memory_space<vmem>>, vector<1x4x4xbf16>
    %163 = vector.shape_cast %162 : vector<1x4x4xbf16> to vector<4x4xbf16>
    %cst_134 = arith.constant dense<0.000000e+00> : vector<2x4xf32>
    %164 = tpu.matmul %14, %163, %cst_134 {dimension_numbers = #tpu.dot_dimension_numbers<[1], [0], [0], [1], [0, 0, 1, 1], [], []>} : vector<2x4xbf16>, vector<4x4xbf16>, vector<2x4xf32> -> vector<2x4xf32>
    %165 = arith.addf %161, %164 : vector<2x4xf32>
    %c5_135 = arith.constant 5 : index
    %c0_136 = arith.constant 0 : index
    %c0_137 = arith.constant 0 : index
    %166 = vector.load %arg3[%c5_135, %c0_136, %c0_137] : memref<9x4x4xbf16, #tpu.memory_space<vmem>>, vector<1x4x4xbf16>
    %167 = vector.shape_cast %166 : vector<1x4x4xbf16> to vector<4x4xbf16>
    %cst_138 = arith.constant dense<0.000000e+00> : vector<2x4xf32>
    %168 = tpu.matmul %15, %167, %cst_138 {dimension_numbers = #tpu.dot_dimension_numbers<[1], [0], [0], [1], [0, 0, 1, 1], [], []>} : vector<2x4xbf16>, vector<4x4xbf16>, vector<2x4xf32> -> vector<2x4xf32>
    %169 = arith.addf %165, %168 : vector<2x4xf32>
    %c7_139 = arith.constant 7 : index
    %c0_140 = arith.constant 0 : index
    %c0_141 = arith.constant 0 : index
    %170 = vector.load %arg3[%c7_139, %c0_140, %c0_141] : memref<9x4x4xbf16, #tpu.memory_space<vmem>>, vector<1x4x4xbf16>
    %171 = vector.shape_cast %170 : vector<1x4x4xbf16> to vector<4x4xbf16>
    %cst_142 = arith.constant dense<0.000000e+00> : vector<2x4xf32>
    %172 = tpu.matmul %18, %171, %cst_142 {dimension_numbers = #tpu.dot_dimension_numbers<[1], [0], [0], [1], [0, 0, 1, 1], [], []>} : vector<2x4xbf16>, vector<4x4xbf16>, vector<2x4xf32> -> vector<2x4xf32>
    %173 = arith.addf %169, %172 : vector<2x4xf32>
    %c8_143 = arith.constant 8 : index
    %c0_144 = arith.constant 0 : index
    %c0_145 = arith.constant 0 : index
    %174 = vector.load %arg3[%c8_143, %c0_144, %c0_145] : memref<9x4x4xbf16, #tpu.memory_space<vmem>>, vector<1x4x4xbf16>
    %175 = vector.shape_cast %174 : vector<1x4x4xbf16> to vector<4x4xbf16>
    %cst_146 = arith.constant dense<0.000000e+00> : vector<2x4xf32>
    %176 = tpu.matmul %19, %175, %cst_146 {dimension_numbers = #tpu.dot_dimension_numbers<[1], [0], [0], [1], [0, 0, 1, 1], [], []>} : vector<2x4xbf16>, vector<4x4xbf16>, vector<2x4xf32> -> vector<2x4xf32>
    %177 = arith.addf %173, %176 : vector<2x4xf32>
    %178 = vector.extract_strided_slice %9 {offsets = [4, 0], sizes = [1, 4], strides = [1, 1]} : vector<16x4xf32> to vector<1x4xf32>
    %179 = vector.broadcast %178 : vector<1x4xf32> to vector<2x4xf32>
    %180 = arith.addf %177, %179 : vector<2x4xf32>
    %cst_147 = arith.constant 0.000000e+00 : f32
    %181 = vector.broadcast %cst_147 : f32 to vector<2x4xf32>
    %182 = arith.cmpf ogt, %180, %181 : vector<2x4xf32>
    %cst_148 = arith.constant 2.000000e-01 : f32
    %183 = vector.broadcast %cst_148 : f32 to vector<2x4xf32>
    %184 = arith.mulf %183, %180 : vector<2x4xf32>
    %185 = arith.select %182, %180, %184 : vector<2x4xi1>, vector<2x4xf32>
    %186 = arith.truncf %185 : vector<2x4xf32> to vector<2x4xbf16>
    %c4_149 = arith.constant 4 : index
    %c0_150 = arith.constant 0 : index
    %c0_151 = arith.constant 0 : index
    %187 = vector.load %arg6[%c4_149, %c0_150, %c0_151] : memref<16x4x4xbf16, #tpu.memory_space<vmem>>, vector<1x4x4xbf16>
    %188 = vector.shape_cast %187 : vector<1x4x4xbf16> to vector<4x4xbf16>
    %cst_152 = arith.constant dense<0.000000e+00> : vector<2x4xf32>
    %189 = tpu.matmul %186, %188, %cst_152 {dimension_numbers = #tpu.dot_dimension_numbers<[1], [0], [0], [1], [0, 0, 1, 1], [], []>} : vector<2x4xbf16>, vector<4x4xbf16>, vector<2x4xf32> -> vector<2x4xf32>
    %190 = arith.addf %154, %189 : vector<2x4xf32>
    %c0_153 = arith.constant 0 : index
    %c0_154 = arith.constant 0 : index
    %c0_155 = arith.constant 0 : index
    %191 = vector.load %arg3[%c0_153, %c0_154, %c0_155] : memref<9x4x4xbf16, #tpu.memory_space<vmem>>, vector<1x4x4xbf16>
    %192 = vector.shape_cast %191 : vector<1x4x4xbf16> to vector<4x4xbf16>
    %cst_156 = arith.constant dense<0.000000e+00> : vector<2x4xf32>
    %193 = tpu.matmul %10, %192, %cst_156 {dimension_numbers = #tpu.dot_dimension_numbers<[1], [0], [0], [1], [0, 0, 1, 1], [], []>} : vector<2x4xbf16>, vector<4x4xbf16>, vector<2x4xf32> -> vector<2x4xf32>
    %c1_157 = arith.constant 1 : index
    %c0_158 = arith.constant 0 : index
    %c0_159 = arith.constant 0 : index
    %194 = vector.load %arg3[%c1_157, %c0_158, %c0_159] : memref<9x4x4xbf16, #tpu.memory_space<vmem>>, vector<1x4x4xbf16>
    %195 = vector.shape_cast %194 : vector<1x4x4xbf16> to vector<4x4xbf16>
    %cst_160 = arith.constant dense<0.000000e+00> : vector<2x4xf32>
    %196 = tpu.matmul %11, %195, %cst_160 {dimension_numbers = #tpu.dot_dimension_numbers<[1], [0], [0], [1], [0, 0, 1, 1], [], []>} : vector<2x4xbf16>, vector<4x4xbf16>, vector<2x4xf32> -> vector<2x4xf32>
    %197 = arith.addf %193, %196 : vector<2x4xf32>
    %c2_161 = arith.constant 2 : index
    %c0_162 = arith.constant 0 : index
    %c0_163 = arith.constant 0 : index
    %198 = vector.load %arg3[%c2_161, %c0_162, %c0_163] : memref<9x4x4xbf16, #tpu.memory_space<vmem>>, vector<1x4x4xbf16>
    %199 = vector.shape_cast %198 : vector<1x4x4xbf16> to vector<4x4xbf16>
    %cst_164 = arith.constant dense<0.000000e+00> : vector<2x4xf32>
    %200 = tpu.matmul %12, %199, %cst_164 {dimension_numbers = #tpu.dot_dimension_numbers<[1], [0], [0], [1], [0, 0, 1, 1], [], []>} : vector<2x4xbf16>, vector<4x4xbf16>, vector<2x4xf32> -> vector<2x4xf32>
    %201 = arith.addf %197, %200 : vector<2x4xf32>
    %c3_165 = arith.constant 3 : index
    %c0_166 = arith.constant 0 : index
    %c0_167 = arith.constant 0 : index
    %202 = vector.load %arg3[%c3_165, %c0_166, %c0_167] : memref<9x4x4xbf16, #tpu.memory_space<vmem>>, vector<1x4x4xbf16>
    %203 = vector.shape_cast %202 : vector<1x4x4xbf16> to vector<4x4xbf16>
    %cst_168 = arith.constant dense<0.000000e+00> : vector<2x4xf32>
    %204 = tpu.matmul %14, %203, %cst_168 {dimension_numbers = #tpu.dot_dimension_numbers<[1], [0], [0], [1], [0, 0, 1, 1], [], []>} : vector<2x4xbf16>, vector<4x4xbf16>, vector<2x4xf32> -> vector<2x4xf32>
    %205 = arith.addf %201, %204 : vector<2x4xf32>
    %c4_169 = arith.constant 4 : index
    %c0_170 = arith.constant 0 : index
    %c0_171 = arith.constant 0 : index
    %206 = vector.load %arg3[%c4_169, %c0_170, %c0_171] : memref<9x4x4xbf16, #tpu.memory_space<vmem>>, vector<1x4x4xbf16>
    %207 = vector.shape_cast %206 : vector<1x4x4xbf16> to vector<4x4xbf16>
    %cst_172 = arith.constant dense<0.000000e+00> : vector<2x4xf32>
    %208 = tpu.matmul %15, %207, %cst_172 {dimension_numbers = #tpu.dot_dimension_numbers<[1], [0], [0], [1], [0, 0, 1, 1], [], []>} : vector<2x4xbf16>, vector<4x4xbf16>, vector<2x4xf32> -> vector<2x4xf32>
    %209 = arith.addf %205, %208 : vector<2x4xf32>
    %c5_173 = arith.constant 5 : index
    %c0_174 = arith.constant 0 : index
    %c0_175 = arith.constant 0 : index
    %210 = vector.load %arg3[%c5_173, %c0_174, %c0_175] : memref<9x4x4xbf16, #tpu.memory_space<vmem>>, vector<1x4x4xbf16>
    %211 = vector.shape_cast %210 : vector<1x4x4xbf16> to vector<4x4xbf16>
    %cst_176 = arith.constant dense<0.000000e+00> : vector<2x4xf32>
    %212 = tpu.matmul %16, %211, %cst_176 {dimension_numbers = #tpu.dot_dimension_numbers<[1], [0], [0], [1], [0, 0, 1, 1], [], []>} : vector<2x4xbf16>, vector<4x4xbf16>, vector<2x4xf32> -> vector<2x4xf32>
    %213 = arith.addf %209, %212 : vector<2x4xf32>
    %c6_177 = arith.constant 6 : index
    %c0_178 = arith.constant 0 : index
    %c0_179 = arith.constant 0 : index
    %214 = vector.load %arg3[%c6_177, %c0_178, %c0_179] : memref<9x4x4xbf16, #tpu.memory_space<vmem>>, vector<1x4x4xbf16>
    %215 = vector.shape_cast %214 : vector<1x4x4xbf16> to vector<4x4xbf16>
    %cst_180 = arith.constant dense<0.000000e+00> : vector<2x4xf32>
    %216 = tpu.matmul %18, %215, %cst_180 {dimension_numbers = #tpu.dot_dimension_numbers<[1], [0], [0], [1], [0, 0, 1, 1], [], []>} : vector<2x4xbf16>, vector<4x4xbf16>, vector<2x4xf32> -> vector<2x4xf32>
    %217 = arith.addf %213, %216 : vector<2x4xf32>
    %c7_181 = arith.constant 7 : index
    %c0_182 = arith.constant 0 : index
    %c0_183 = arith.constant 0 : index
    %218 = vector.load %arg3[%c7_181, %c0_182, %c0_183] : memref<9x4x4xbf16, #tpu.memory_space<vmem>>, vector<1x4x4xbf16>
    %219 = vector.shape_cast %218 : vector<1x4x4xbf16> to vector<4x4xbf16>
    %cst_184 = arith.constant dense<0.000000e+00> : vector<2x4xf32>
    %220 = tpu.matmul %19, %219, %cst_184 {dimension_numbers = #tpu.dot_dimension_numbers<[1], [0], [0], [1], [0, 0, 1, 1], [], []>} : vector<2x4xbf16>, vector<4x4xbf16>, vector<2x4xf32> -> vector<2x4xf32>
    %221 = arith.addf %217, %220 : vector<2x4xf32>
    %c8_185 = arith.constant 8 : index
    %c0_186 = arith.constant 0 : index
    %c0_187 = arith.constant 0 : index
    %222 = vector.load %arg3[%c8_185, %c0_186, %c0_187] : memref<9x4x4xbf16, #tpu.memory_space<vmem>>, vector<1x4x4xbf16>
    %223 = vector.shape_cast %222 : vector<1x4x4xbf16> to vector<4x4xbf16>
    %cst_188 = arith.constant dense<0.000000e+00> : vector<2x4xf32>
    %224 = tpu.matmul %20, %223, %cst_188 {dimension_numbers = #tpu.dot_dimension_numbers<[1], [0], [0], [1], [0, 0, 1, 1], [], []>} : vector<2x4xbf16>, vector<4x4xbf16>, vector<2x4xf32> -> vector<2x4xf32>
    %225 = arith.addf %221, %224 : vector<2x4xf32>
    %226 = vector.extract_strided_slice %9 {offsets = [5, 0], sizes = [1, 4], strides = [1, 1]} : vector<16x4xf32> to vector<1x4xf32>
    %227 = vector.broadcast %226 : vector<1x4xf32> to vector<2x4xf32>
    %228 = arith.addf %225, %227 : vector<2x4xf32>
    %cst_189 = arith.constant 0.000000e+00 : f32
    %229 = vector.broadcast %cst_189 : f32 to vector<2x4xf32>
    %230 = arith.cmpf ogt, %228, %229 : vector<2x4xf32>
    %cst_190 = arith.constant 2.000000e-01 : f32
    %231 = vector.broadcast %cst_190 : f32 to vector<2x4xf32>
    %232 = arith.mulf %231, %228 : vector<2x4xf32>
    %233 = arith.select %230, %228, %232 : vector<2x4xi1>, vector<2x4xf32>
    %234 = arith.truncf %233 : vector<2x4xf32> to vector<2x4xbf16>
    %c5_191 = arith.constant 5 : index
    %c0_192 = arith.constant 0 : index
    %c0_193 = arith.constant 0 : index
    %235 = vector.load %arg6[%c5_191, %c0_192, %c0_193] : memref<16x4x4xbf16, #tpu.memory_space<vmem>>, vector<1x4x4xbf16>
    %236 = vector.shape_cast %235 : vector<1x4x4xbf16> to vector<4x4xbf16>
    %cst_194 = arith.constant dense<0.000000e+00> : vector<2x4xf32>
    %237 = tpu.matmul %234, %236, %cst_194 {dimension_numbers = #tpu.dot_dimension_numbers<[1], [0], [0], [1], [0, 0, 1, 1], [], []>} : vector<2x4xbf16>, vector<4x4xbf16>, vector<2x4xf32> -> vector<2x4xf32>
    %238 = arith.addf %190, %237 : vector<2x4xf32>
    %c0_195 = arith.constant 0 : index
    %c0_196 = arith.constant 0 : index
    %c0_197 = arith.constant 0 : index
    %239 = vector.load %arg3[%c0_195, %c0_196, %c0_197] : memref<9x4x4xbf16, #tpu.memory_space<vmem>>, vector<1x4x4xbf16>
    %240 = vector.shape_cast %239 : vector<1x4x4xbf16> to vector<4x4xbf16>
    %cst_198 = arith.constant dense<0.000000e+00> : vector<2x4xf32>
    %241 = tpu.matmul %11, %240, %cst_198 {dimension_numbers = #tpu.dot_dimension_numbers<[1], [0], [0], [1], [0, 0, 1, 1], [], []>} : vector<2x4xbf16>, vector<4x4xbf16>, vector<2x4xf32> -> vector<2x4xf32>
    %c1_199 = arith.constant 1 : index
    %c0_200 = arith.constant 0 : index
    %c0_201 = arith.constant 0 : index
    %242 = vector.load %arg3[%c1_199, %c0_200, %c0_201] : memref<9x4x4xbf16, #tpu.memory_space<vmem>>, vector<1x4x4xbf16>
    %243 = vector.shape_cast %242 : vector<1x4x4xbf16> to vector<4x4xbf16>
    %cst_202 = arith.constant dense<0.000000e+00> : vector<2x4xf32>
    %244 = tpu.matmul %12, %243, %cst_202 {dimension_numbers = #tpu.dot_dimension_numbers<[1], [0], [0], [1], [0, 0, 1, 1], [], []>} : vector<2x4xbf16>, vector<4x4xbf16>, vector<2x4xf32> -> vector<2x4xf32>
    %245 = arith.addf %241, %244 : vector<2x4xf32>
    %c2_203 = arith.constant 2 : index
    %c0_204 = arith.constant 0 : index
    %c0_205 = arith.constant 0 : index
    %246 = vector.load %arg3[%c2_203, %c0_204, %c0_205] : memref<9x4x4xbf16, #tpu.memory_space<vmem>>, vector<1x4x4xbf16>
    %247 = vector.shape_cast %246 : vector<1x4x4xbf16> to vector<4x4xbf16>
    %cst_206 = arith.constant dense<0.000000e+00> : vector<2x4xf32>
    %248 = tpu.matmul %13, %247, %cst_206 {dimension_numbers = #tpu.dot_dimension_numbers<[1], [0], [0], [1], [0, 0, 1, 1], [], []>} : vector<2x4xbf16>, vector<4x4xbf16>, vector<2x4xf32> -> vector<2x4xf32>
    %249 = arith.addf %245, %248 : vector<2x4xf32>
    %c3_207 = arith.constant 3 : index
    %c0_208 = arith.constant 0 : index
    %c0_209 = arith.constant 0 : index
    %250 = vector.load %arg3[%c3_207, %c0_208, %c0_209] : memref<9x4x4xbf16, #tpu.memory_space<vmem>>, vector<1x4x4xbf16>
    %251 = vector.shape_cast %250 : vector<1x4x4xbf16> to vector<4x4xbf16>
    %cst_210 = arith.constant dense<0.000000e+00> : vector<2x4xf32>
    %252 = tpu.matmul %15, %251, %cst_210 {dimension_numbers = #tpu.dot_dimension_numbers<[1], [0], [0], [1], [0, 0, 1, 1], [], []>} : vector<2x4xbf16>, vector<4x4xbf16>, vector<2x4xf32> -> vector<2x4xf32>
    %253 = arith.addf %249, %252 : vector<2x4xf32>
    %c4_211 = arith.constant 4 : index
    %c0_212 = arith.constant 0 : index
    %c0_213 = arith.constant 0 : index
    %254 = vector.load %arg3[%c4_211, %c0_212, %c0_213] : memref<9x4x4xbf16, #tpu.memory_space<vmem>>, vector<1x4x4xbf16>
    %255 = vector.shape_cast %254 : vector<1x4x4xbf16> to vector<4x4xbf16>
    %cst_214 = arith.constant dense<0.000000e+00> : vector<2x4xf32>
    %256 = tpu.matmul %16, %255, %cst_214 {dimension_numbers = #tpu.dot_dimension_numbers<[1], [0], [0], [1], [0, 0, 1, 1], [], []>} : vector<2x4xbf16>, vector<4x4xbf16>, vector<2x4xf32> -> vector<2x4xf32>
    %257 = arith.addf %253, %256 : vector<2x4xf32>
    %c5_215 = arith.constant 5 : index
    %c0_216 = arith.constant 0 : index
    %c0_217 = arith.constant 0 : index
    %258 = vector.load %arg3[%c5_215, %c0_216, %c0_217] : memref<9x4x4xbf16, #tpu.memory_space<vmem>>, vector<1x4x4xbf16>
    %259 = vector.shape_cast %258 : vector<1x4x4xbf16> to vector<4x4xbf16>
    %cst_218 = arith.constant dense<0.000000e+00> : vector<2x4xf32>
    %260 = tpu.matmul %17, %259, %cst_218 {dimension_numbers = #tpu.dot_dimension_numbers<[1], [0], [0], [1], [0, 0, 1, 1], [], []>} : vector<2x4xbf16>, vector<4x4xbf16>, vector<2x4xf32> -> vector<2x4xf32>
    %261 = arith.addf %257, %260 : vector<2x4xf32>
    %c6_219 = arith.constant 6 : index
    %c0_220 = arith.constant 0 : index
    %c0_221 = arith.constant 0 : index
    %262 = vector.load %arg3[%c6_219, %c0_220, %c0_221] : memref<9x4x4xbf16, #tpu.memory_space<vmem>>, vector<1x4x4xbf16>
    %263 = vector.shape_cast %262 : vector<1x4x4xbf16> to vector<4x4xbf16>
    %cst_222 = arith.constant dense<0.000000e+00> : vector<2x4xf32>
    %264 = tpu.matmul %19, %263, %cst_222 {dimension_numbers = #tpu.dot_dimension_numbers<[1], [0], [0], [1], [0, 0, 1, 1], [], []>} : vector<2x4xbf16>, vector<4x4xbf16>, vector<2x4xf32> -> vector<2x4xf32>
    %265 = arith.addf %261, %264 : vector<2x4xf32>
    %c7_223 = arith.constant 7 : index
    %c0_224 = arith.constant 0 : index
    %c0_225 = arith.constant 0 : index
    %266 = vector.load %arg3[%c7_223, %c0_224, %c0_225] : memref<9x4x4xbf16, #tpu.memory_space<vmem>>, vector<1x4x4xbf16>
    %267 = vector.shape_cast %266 : vector<1x4x4xbf16> to vector<4x4xbf16>
    %cst_226 = arith.constant dense<0.000000e+00> : vector<2x4xf32>
    %268 = tpu.matmul %20, %267, %cst_226 {dimension_numbers = #tpu.dot_dimension_numbers<[1], [0], [0], [1], [0, 0, 1, 1], [], []>} : vector<2x4xbf16>, vector<4x4xbf16>, vector<2x4xf32> -> vector<2x4xf32>
    %269 = arith.addf %265, %268 : vector<2x4xf32>
    %c8_227 = arith.constant 8 : index
    %c0_228 = arith.constant 0 : index
    %c0_229 = arith.constant 0 : index
    %270 = vector.load %arg3[%c8_227, %c0_228, %c0_229] : memref<9x4x4xbf16, #tpu.memory_space<vmem>>, vector<1x4x4xbf16>
    %271 = vector.shape_cast %270 : vector<1x4x4xbf16> to vector<4x4xbf16>
    %cst_230 = arith.constant dense<0.000000e+00> : vector<2x4xf32>
    %272 = tpu.matmul %21, %271, %cst_230 {dimension_numbers = #tpu.dot_dimension_numbers<[1], [0], [0], [1], [0, 0, 1, 1], [], []>} : vector<2x4xbf16>, vector<4x4xbf16>, vector<2x4xf32> -> vector<2x4xf32>
    %273 = arith.addf %269, %272 : vector<2x4xf32>
    %274 = vector.extract_strided_slice %9 {offsets = [6, 0], sizes = [1, 4], strides = [1, 1]} : vector<16x4xf32> to vector<1x4xf32>
    %275 = vector.broadcast %274 : vector<1x4xf32> to vector<2x4xf32>
    %276 = arith.addf %273, %275 : vector<2x4xf32>
    %cst_231 = arith.constant 0.000000e+00 : f32
    %277 = vector.broadcast %cst_231 : f32 to vector<2x4xf32>
    %278 = arith.cmpf ogt, %276, %277 : vector<2x4xf32>
    %cst_232 = arith.constant 2.000000e-01 : f32
    %279 = vector.broadcast %cst_232 : f32 to vector<2x4xf32>
    %280 = arith.mulf %279, %276 : vector<2x4xf32>
    %281 = arith.select %278, %276, %280 : vector<2x4xi1>, vector<2x4xf32>
    %282 = arith.truncf %281 : vector<2x4xf32> to vector<2x4xbf16>
    %c6_233 = arith.constant 6 : index
    %c0_234 = arith.constant 0 : index
    %c0_235 = arith.constant 0 : index
    %283 = vector.load %arg6[%c6_233, %c0_234, %c0_235] : memref<16x4x4xbf16, #tpu.memory_space<vmem>>, vector<1x4x4xbf16>
    %284 = vector.shape_cast %283 : vector<1x4x4xbf16> to vector<4x4xbf16>
    %cst_236 = arith.constant dense<0.000000e+00> : vector<2x4xf32>
    %285 = tpu.matmul %282, %284, %cst_236 {dimension_numbers = #tpu.dot_dimension_numbers<[1], [0], [0], [1], [0, 0, 1, 1], [], []>} : vector<2x4xbf16>, vector<4x4xbf16>, vector<2x4xf32> -> vector<2x4xf32>
    %286 = arith.addf %238, %285 : vector<2x4xf32>
    %c0_237 = arith.constant 0 : index
    %c0_238 = arith.constant 0 : index
    %c0_239 = arith.constant 0 : index
    %287 = vector.load %arg3[%c0_237, %c0_238, %c0_239] : memref<9x4x4xbf16, #tpu.memory_space<vmem>>, vector<1x4x4xbf16>
    %288 = vector.shape_cast %287 : vector<1x4x4xbf16> to vector<4x4xbf16>
    %cst_240 = arith.constant dense<0.000000e+00> : vector<2x4xf32>
    %289 = tpu.matmul %12, %288, %cst_240 {dimension_numbers = #tpu.dot_dimension_numbers<[1], [0], [0], [1], [0, 0, 1, 1], [], []>} : vector<2x4xbf16>, vector<4x4xbf16>, vector<2x4xf32> -> vector<2x4xf32>
    %c1_241 = arith.constant 1 : index
    %c0_242 = arith.constant 0 : index
    %c0_243 = arith.constant 0 : index
    %290 = vector.load %arg3[%c1_241, %c0_242, %c0_243] : memref<9x4x4xbf16, #tpu.memory_space<vmem>>, vector<1x4x4xbf16>
    %291 = vector.shape_cast %290 : vector<1x4x4xbf16> to vector<4x4xbf16>
    %cst_244 = arith.constant dense<0.000000e+00> : vector<2x4xf32>
    %292 = tpu.matmul %13, %291, %cst_244 {dimension_numbers = #tpu.dot_dimension_numbers<[1], [0], [0], [1], [0, 0, 1, 1], [], []>} : vector<2x4xbf16>, vector<4x4xbf16>, vector<2x4xf32> -> vector<2x4xf32>
    %293 = arith.addf %289, %292 : vector<2x4xf32>
    %c3_245 = arith.constant 3 : index
    %c0_246 = arith.constant 0 : index
    %c0_247 = arith.constant 0 : index
    %294 = vector.load %arg3[%c3_245, %c0_246, %c0_247] : memref<9x4x4xbf16, #tpu.memory_space<vmem>>, vector<1x4x4xbf16>
    %295 = vector.shape_cast %294 : vector<1x4x4xbf16> to vector<4x4xbf16>
    %cst_248 = arith.constant dense<0.000000e+00> : vector<2x4xf32>
    %296 = tpu.matmul %16, %295, %cst_248 {dimension_numbers = #tpu.dot_dimension_numbers<[1], [0], [0], [1], [0, 0, 1, 1], [], []>} : vector<2x4xbf16>, vector<4x4xbf16>, vector<2x4xf32> -> vector<2x4xf32>
    %297 = arith.addf %293, %296 : vector<2x4xf32>
    %c4_249 = arith.constant 4 : index
    %c0_250 = arith.constant 0 : index
    %c0_251 = arith.constant 0 : index
    %298 = vector.load %arg3[%c4_249, %c0_250, %c0_251] : memref<9x4x4xbf16, #tpu.memory_space<vmem>>, vector<1x4x4xbf16>
    %299 = vector.shape_cast %298 : vector<1x4x4xbf16> to vector<4x4xbf16>
    %cst_252 = arith.constant dense<0.000000e+00> : vector<2x4xf32>
    %300 = tpu.matmul %17, %299, %cst_252 {dimension_numbers = #tpu.dot_dimension_numbers<[1], [0], [0], [1], [0, 0, 1, 1], [], []>} : vector<2x4xbf16>, vector<4x4xbf16>, vector<2x4xf32> -> vector<2x4xf32>
    %301 = arith.addf %297, %300 : vector<2x4xf32>
    %c6_253 = arith.constant 6 : index
    %c0_254 = arith.constant 0 : index
    %c0_255 = arith.constant 0 : index
    %302 = vector.load %arg3[%c6_253, %c0_254, %c0_255] : memref<9x4x4xbf16, #tpu.memory_space<vmem>>, vector<1x4x4xbf16>
    %303 = vector.shape_cast %302 : vector<1x4x4xbf16> to vector<4x4xbf16>
    %cst_256 = arith.constant dense<0.000000e+00> : vector<2x4xf32>
    %304 = tpu.matmul %20, %303, %cst_256 {dimension_numbers = #tpu.dot_dimension_numbers<[1], [0], [0], [1], [0, 0, 1, 1], [], []>} : vector<2x4xbf16>, vector<4x4xbf16>, vector<2x4xf32> -> vector<2x4xf32>
    %305 = arith.addf %301, %304 : vector<2x4xf32>
    %c7_257 = arith.constant 7 : index
    %c0_258 = arith.constant 0 : index
    %c0_259 = arith.constant 0 : index
    %306 = vector.load %arg3[%c7_257, %c0_258, %c0_259] : memref<9x4x4xbf16, #tpu.memory_space<vmem>>, vector<1x4x4xbf16>
    %307 = vector.shape_cast %306 : vector<1x4x4xbf16> to vector<4x4xbf16>
    %cst_260 = arith.constant dense<0.000000e+00> : vector<2x4xf32>
    %308 = tpu.matmul %21, %307, %cst_260 {dimension_numbers = #tpu.dot_dimension_numbers<[1], [0], [0], [1], [0, 0, 1, 1], [], []>} : vector<2x4xbf16>, vector<4x4xbf16>, vector<2x4xf32> -> vector<2x4xf32>
    %309 = arith.addf %305, %308 : vector<2x4xf32>
    %310 = vector.extract_strided_slice %9 {offsets = [7, 0], sizes = [1, 4], strides = [1, 1]} : vector<16x4xf32> to vector<1x4xf32>
    %311 = vector.broadcast %310 : vector<1x4xf32> to vector<2x4xf32>
    %312 = arith.addf %309, %311 : vector<2x4xf32>
    %cst_261 = arith.constant 0.000000e+00 : f32
    %313 = vector.broadcast %cst_261 : f32 to vector<2x4xf32>
    %314 = arith.cmpf ogt, %312, %313 : vector<2x4xf32>
    %cst_262 = arith.constant 2.000000e-01 : f32
    %315 = vector.broadcast %cst_262 : f32 to vector<2x4xf32>
    %316 = arith.mulf %315, %312 : vector<2x4xf32>
    %317 = arith.select %314, %312, %316 : vector<2x4xi1>, vector<2x4xf32>
    %318 = arith.truncf %317 : vector<2x4xf32> to vector<2x4xbf16>
    %c7_263 = arith.constant 7 : index
    %c0_264 = arith.constant 0 : index
    %c0_265 = arith.constant 0 : index
    %319 = vector.load %arg6[%c7_263, %c0_264, %c0_265] : memref<16x4x4xbf16, #tpu.memory_space<vmem>>, vector<1x4x4xbf16>
    %320 = vector.shape_cast %319 : vector<1x4x4xbf16> to vector<4x4xbf16>
    %cst_266 = arith.constant dense<0.000000e+00> : vector<2x4xf32>
    %321 = tpu.matmul %318, %320, %cst_266 {dimension_numbers = #tpu.dot_dimension_numbers<[1], [0], [0], [1], [0, 0, 1, 1], [], []>} : vector<2x4xbf16>, vector<4x4xbf16>, vector<2x4xf32> -> vector<2x4xf32>
    %322 = arith.addf %286, %321 : vector<2x4xf32>
    %c1_267 = arith.constant 1 : index
    %c0_268 = arith.constant 0 : index
    %c0_269 = arith.constant 0 : index
    %323 = vector.load %arg3[%c1_267, %c0_268, %c0_269] : memref<9x4x4xbf16, #tpu.memory_space<vmem>>, vector<1x4x4xbf16>
    %324 = vector.shape_cast %323 : vector<1x4x4xbf16> to vector<4x4xbf16>
    %cst_270 = arith.constant dense<0.000000e+00> : vector<2x4xf32>
    %325 = tpu.matmul %14, %324, %cst_270 {dimension_numbers = #tpu.dot_dimension_numbers<[1], [0], [0], [1], [0, 0, 1, 1], [], []>} : vector<2x4xbf16>, vector<4x4xbf16>, vector<2x4xf32> -> vector<2x4xf32>
    %c2_271 = arith.constant 2 : index
    %c0_272 = arith.constant 0 : index
    %c0_273 = arith.constant 0 : index
    %326 = vector.load %arg3[%c2_271, %c0_272, %c0_273] : memref<9x4x4xbf16, #tpu.memory_space<vmem>>, vector<1x4x4xbf16>
    %327 = vector.shape_cast %326 : vector<1x4x4xbf16> to vector<4x4xbf16>
    %cst_274 = arith.constant dense<0.000000e+00> : vector<2x4xf32>
    %328 = tpu.matmul %15, %327, %cst_274 {dimension_numbers = #tpu.dot_dimension_numbers<[1], [0], [0], [1], [0, 0, 1, 1], [], []>} : vector<2x4xbf16>, vector<4x4xbf16>, vector<2x4xf32> -> vector<2x4xf32>
    %329 = arith.addf %325, %328 : vector<2x4xf32>
    %c4_275 = arith.constant 4 : index
    %c0_276 = arith.constant 0 : index
    %c0_277 = arith.constant 0 : index
    %330 = vector.load %arg3[%c4_275, %c0_276, %c0_277] : memref<9x4x4xbf16, #tpu.memory_space<vmem>>, vector<1x4x4xbf16>
    %331 = vector.shape_cast %330 : vector<1x4x4xbf16> to vector<4x4xbf16>
    %cst_278 = arith.constant dense<0.000000e+00> : vector<2x4xf32>
    %332 = tpu.matmul %18, %331, %cst_278 {dimension_numbers = #tpu.dot_dimension_numbers<[1], [0], [0], [1], [0, 0, 1, 1], [], []>} : vector<2x4xbf16>, vector<4x4xbf16>, vector<2x4xf32> -> vector<2x4xf32>
    %333 = arith.addf %329, %332 : vector<2x4xf32>
    %c5_279 = arith.constant 5 : index
    %c0_280 = arith.constant 0 : index
    %c0_281 = arith.constant 0 : index
    %334 = vector.load %arg3[%c5_279, %c0_280, %c0_281] : memref<9x4x4xbf16, #tpu.memory_space<vmem>>, vector<1x4x4xbf16>
    %335 = vector.shape_cast %334 : vector<1x4x4xbf16> to vector<4x4xbf16>
    %cst_282 = arith.constant dense<0.000000e+00> : vector<2x4xf32>
    %336 = tpu.matmul %19, %335, %cst_282 {dimension_numbers = #tpu.dot_dimension_numbers<[1], [0], [0], [1], [0, 0, 1, 1], [], []>} : vector<2x4xbf16>, vector<4x4xbf16>, vector<2x4xf32> -> vector<2x4xf32>
    %337 = arith.addf %333, %336 : vector<2x4xf32>
    %c7_283 = arith.constant 7 : index
    %c0_284 = arith.constant 0 : index
    %c0_285 = arith.constant 0 : index
    %338 = vector.load %arg3[%c7_283, %c0_284, %c0_285] : memref<9x4x4xbf16, #tpu.memory_space<vmem>>, vector<1x4x4xbf16>
    %339 = vector.shape_cast %338 : vector<1x4x4xbf16> to vector<4x4xbf16>
    %cst_286 = arith.constant dense<0.000000e+00> : vector<2x4xf32>
    %340 = tpu.matmul %22, %339, %cst_286 {dimension_numbers = #tpu.dot_dimension_numbers<[1], [0], [0], [1], [0, 0, 1, 1], [], []>} : vector<2x4xbf16>, vector<4x4xbf16>, vector<2x4xf32> -> vector<2x4xf32>
    %341 = arith.addf %337, %340 : vector<2x4xf32>
    %c8_287 = arith.constant 8 : index
    %c0_288 = arith.constant 0 : index
    %c0_289 = arith.constant 0 : index
    %342 = vector.load %arg3[%c8_287, %c0_288, %c0_289] : memref<9x4x4xbf16, #tpu.memory_space<vmem>>, vector<1x4x4xbf16>
    %343 = vector.shape_cast %342 : vector<1x4x4xbf16> to vector<4x4xbf16>
    %cst_290 = arith.constant dense<0.000000e+00> : vector<2x4xf32>
    %344 = tpu.matmul %23, %343, %cst_290 {dimension_numbers = #tpu.dot_dimension_numbers<[1], [0], [0], [1], [0, 0, 1, 1], [], []>} : vector<2x4xbf16>, vector<4x4xbf16>, vector<2x4xf32> -> vector<2x4xf32>
    %345 = arith.addf %341, %344 : vector<2x4xf32>
    %346 = vector.extract_strided_slice %9 {offsets = [8, 0], sizes = [1, 4], strides = [1, 1]} : vector<16x4xf32> to vector<1x4xf32>
    %347 = vector.broadcast %346 : vector<1x4xf32> to vector<2x4xf32>
    %348 = arith.addf %345, %347 : vector<2x4xf32>
    %cst_291 = arith.constant 0.000000e+00 : f32
    %349 = vector.broadcast %cst_291 : f32 to vector<2x4xf32>
    %350 = arith.cmpf ogt, %348, %349 : vector<2x4xf32>
    %cst_292 = arith.constant 2.000000e-01 : f32
    %351 = vector.broadcast %cst_292 : f32 to vector<2x4xf32>
    %352 = arith.mulf %351, %348 : vector<2x4xf32>
    %353 = arith.select %350, %348, %352 : vector<2x4xi1>, vector<2x4xf32>
    %354 = arith.truncf %353 : vector<2x4xf32> to vector<2x4xbf16>
    %c8_293 = arith.constant 8 : index
    %c0_294 = arith.constant 0 : index
    %c0_295 = arith.constant 0 : index
    %355 = vector.load %arg6[%c8_293, %c0_294, %c0_295] : memref<16x4x4xbf16, #tpu.memory_space<vmem>>, vector<1x4x4xbf16>
    %356 = vector.shape_cast %355 : vector<1x4x4xbf16> to vector<4x4xbf16>
    %cst_296 = arith.constant dense<0.000000e+00> : vector<2x4xf32>
    %357 = tpu.matmul %354, %356, %cst_296 {dimension_numbers = #tpu.dot_dimension_numbers<[1], [0], [0], [1], [0, 0, 1, 1], [], []>} : vector<2x4xbf16>, vector<4x4xbf16>, vector<2x4xf32> -> vector<2x4xf32>
    %358 = arith.addf %322, %357 : vector<2x4xf32>
    %c0_297 = arith.constant 0 : index
    %c0_298 = arith.constant 0 : index
    %c0_299 = arith.constant 0 : index
    %359 = vector.load %arg3[%c0_297, %c0_298, %c0_299] : memref<9x4x4xbf16, #tpu.memory_space<vmem>>, vector<1x4x4xbf16>
    %360 = vector.shape_cast %359 : vector<1x4x4xbf16> to vector<4x4xbf16>
    %cst_300 = arith.constant dense<0.000000e+00> : vector<2x4xf32>
    %361 = tpu.matmul %14, %360, %cst_300 {dimension_numbers = #tpu.dot_dimension_numbers<[1], [0], [0], [1], [0, 0, 1, 1], [], []>} : vector<2x4xbf16>, vector<4x4xbf16>, vector<2x4xf32> -> vector<2x4xf32>
    %c1_301 = arith.constant 1 : index
    %c0_302 = arith.constant 0 : index
    %c0_303 = arith.constant 0 : index
    %362 = vector.load %arg3[%c1_301, %c0_302, %c0_303] : memref<9x4x4xbf16, #tpu.memory_space<vmem>>, vector<1x4x4xbf16>
    %363 = vector.shape_cast %362 : vector<1x4x4xbf16> to vector<4x4xbf16>
    %cst_304 = arith.constant dense<0.000000e+00> : vector<2x4xf32>
    %364 = tpu.matmul %15, %363, %cst_304 {dimension_numbers = #tpu.dot_dimension_numbers<[1], [0], [0], [1], [0, 0, 1, 1], [], []>} : vector<2x4xbf16>, vector<4x4xbf16>, vector<2x4xf32> -> vector<2x4xf32>
    %365 = arith.addf %361, %364 : vector<2x4xf32>
    %c2_305 = arith.constant 2 : index
    %c0_306 = arith.constant 0 : index
    %c0_307 = arith.constant 0 : index
    %366 = vector.load %arg3[%c2_305, %c0_306, %c0_307] : memref<9x4x4xbf16, #tpu.memory_space<vmem>>, vector<1x4x4xbf16>
    %367 = vector.shape_cast %366 : vector<1x4x4xbf16> to vector<4x4xbf16>
    %cst_308 = arith.constant dense<0.000000e+00> : vector<2x4xf32>
    %368 = tpu.matmul %16, %367, %cst_308 {dimension_numbers = #tpu.dot_dimension_numbers<[1], [0], [0], [1], [0, 0, 1, 1], [], []>} : vector<2x4xbf16>, vector<4x4xbf16>, vector<2x4xf32> -> vector<2x4xf32>
    %369 = arith.addf %365, %368 : vector<2x4xf32>
    %c3_309 = arith.constant 3 : index
    %c0_310 = arith.constant 0 : index
    %c0_311 = arith.constant 0 : index
    %370 = vector.load %arg3[%c3_309, %c0_310, %c0_311] : memref<9x4x4xbf16, #tpu.memory_space<vmem>>, vector<1x4x4xbf16>
    %371 = vector.shape_cast %370 : vector<1x4x4xbf16> to vector<4x4xbf16>
    %cst_312 = arith.constant dense<0.000000e+00> : vector<2x4xf32>
    %372 = tpu.matmul %18, %371, %cst_312 {dimension_numbers = #tpu.dot_dimension_numbers<[1], [0], [0], [1], [0, 0, 1, 1], [], []>} : vector<2x4xbf16>, vector<4x4xbf16>, vector<2x4xf32> -> vector<2x4xf32>
    %373 = arith.addf %369, %372 : vector<2x4xf32>
    %c4_313 = arith.constant 4 : index
    %c0_314 = arith.constant 0 : index
    %c0_315 = arith.constant 0 : index
    %374 = vector.load %arg3[%c4_313, %c0_314, %c0_315] : memref<9x4x4xbf16, #tpu.memory_space<vmem>>, vector<1x4x4xbf16>
    %375 = vector.shape_cast %374 : vector<1x4x4xbf16> to vector<4x4xbf16>
    %cst_316 = arith.constant dense<0.000000e+00> : vector<2x4xf32>
    %376 = tpu.matmul %19, %375, %cst_316 {dimension_numbers = #tpu.dot_dimension_numbers<[1], [0], [0], [1], [0, 0, 1, 1], [], []>} : vector<2x4xbf16>, vector<4x4xbf16>, vector<2x4xf32> -> vector<2x4xf32>
    %377 = arith.addf %373, %376 : vector<2x4xf32>
    %c5_317 = arith.constant 5 : index
    %c0_318 = arith.constant 0 : index
    %c0_319 = arith.constant 0 : index
    %378 = vector.load %arg3[%c5_317, %c0_318, %c0_319] : memref<9x4x4xbf16, #tpu.memory_space<vmem>>, vector<1x4x4xbf16>
    %379 = vector.shape_cast %378 : vector<1x4x4xbf16> to vector<4x4xbf16>
    %cst_320 = arith.constant dense<0.000000e+00> : vector<2x4xf32>
    %380 = tpu.matmul %20, %379, %cst_320 {dimension_numbers = #tpu.dot_dimension_numbers<[1], [0], [0], [1], [0, 0, 1, 1], [], []>} : vector<2x4xbf16>, vector<4x4xbf16>, vector<2x4xf32> -> vector<2x4xf32>
    %381 = arith.addf %377, %380 : vector<2x4xf32>
    %c6_321 = arith.constant 6 : index
    %c0_322 = arith.constant 0 : index
    %c0_323 = arith.constant 0 : index
    %382 = vector.load %arg3[%c6_321, %c0_322, %c0_323] : memref<9x4x4xbf16, #tpu.memory_space<vmem>>, vector<1x4x4xbf16>
    %383 = vector.shape_cast %382 : vector<1x4x4xbf16> to vector<4x4xbf16>
    %cst_324 = arith.constant dense<0.000000e+00> : vector<2x4xf32>
    %384 = tpu.matmul %22, %383, %cst_324 {dimension_numbers = #tpu.dot_dimension_numbers<[1], [0], [0], [1], [0, 0, 1, 1], [], []>} : vector<2x4xbf16>, vector<4x4xbf16>, vector<2x4xf32> -> vector<2x4xf32>
    %385 = arith.addf %381, %384 : vector<2x4xf32>
    %c7_325 = arith.constant 7 : index
    %c0_326 = arith.constant 0 : index
    %c0_327 = arith.constant 0 : index
    %386 = vector.load %arg3[%c7_325, %c0_326, %c0_327] : memref<9x4x4xbf16, #tpu.memory_space<vmem>>, vector<1x4x4xbf16>
    %387 = vector.shape_cast %386 : vector<1x4x4xbf16> to vector<4x4xbf16>
    %cst_328 = arith.constant dense<0.000000e+00> : vector<2x4xf32>
    %388 = tpu.matmul %23, %387, %cst_328 {dimension_numbers = #tpu.dot_dimension_numbers<[1], [0], [0], [1], [0, 0, 1, 1], [], []>} : vector<2x4xbf16>, vector<4x4xbf16>, vector<2x4xf32> -> vector<2x4xf32>
    %389 = arith.addf %385, %388 : vector<2x4xf32>
    %c8_329 = arith.constant 8 : index
    %c0_330 = arith.constant 0 : index
    %c0_331 = arith.constant 0 : index
    %390 = vector.load %arg3[%c8_329, %c0_330, %c0_331] : memref<9x4x4xbf16, #tpu.memory_space<vmem>>, vector<1x4x4xbf16>
    %391 = vector.shape_cast %390 : vector<1x4x4xbf16> to vector<4x4xbf16>
    %cst_332 = arith.constant dense<0.000000e+00> : vector<2x4xf32>
    %392 = tpu.matmul %24, %391, %cst_332 {dimension_numbers = #tpu.dot_dimension_numbers<[1], [0], [0], [1], [0, 0, 1, 1], [], []>} : vector<2x4xbf16>, vector<4x4xbf16>, vector<2x4xf32> -> vector<2x4xf32>
    %393 = arith.addf %389, %392 : vector<2x4xf32>
    %394 = vector.extract_strided_slice %9 {offsets = [9, 0], sizes = [1, 4], strides = [1, 1]} : vector<16x4xf32> to vector<1x4xf32>
    %395 = vector.broadcast %394 : vector<1x4xf32> to vector<2x4xf32>
    %396 = arith.addf %393, %395 : vector<2x4xf32>
    %cst_333 = arith.constant 0.000000e+00 : f32
    %397 = vector.broadcast %cst_333 : f32 to vector<2x4xf32>
    %398 = arith.cmpf ogt, %396, %397 : vector<2x4xf32>
    %cst_334 = arith.constant 2.000000e-01 : f32
    %399 = vector.broadcast %cst_334 : f32 to vector<2x4xf32>
    %400 = arith.mulf %399, %396 : vector<2x4xf32>
    %401 = arith.select %398, %396, %400 : vector<2x4xi1>, vector<2x4xf32>
    %402 = arith.truncf %401 : vector<2x4xf32> to vector<2x4xbf16>
    %c9 = arith.constant 9 : index
    %c0_335 = arith.constant 0 : index
    %c0_336 = arith.constant 0 : index
    %403 = vector.load %arg6[%c9, %c0_335, %c0_336] : memref<16x4x4xbf16, #tpu.memory_space<vmem>>, vector<1x4x4xbf16>
    %404 = vector.shape_cast %403 : vector<1x4x4xbf16> to vector<4x4xbf16>
    %cst_337 = arith.constant dense<0.000000e+00> : vector<2x4xf32>
    %405 = tpu.matmul %402, %404, %cst_337 {dimension_numbers = #tpu.dot_dimension_numbers<[1], [0], [0], [1], [0, 0, 1, 1], [], []>} : vector<2x4xbf16>, vector<4x4xbf16>, vector<2x4xf32> -> vector<2x4xf32>
    %406 = arith.addf %358, %405 : vector<2x4xf32>
    %c0_338 = arith.constant 0 : index
    %c0_339 = arith.constant 0 : index
    %c0_340 = arith.constant 0 : index
    %407 = vector.load %arg3[%c0_338, %c0_339, %c0_340] : memref<9x4x4xbf16, #tpu.memory_space<vmem>>, vector<1x4x4xbf16>
    %408 = vector.shape_cast %407 : vector<1x4x4xbf16> to vector<4x4xbf16>
    %cst_341 = arith.constant dense<0.000000e+00> : vector<2x4xf32>
    %409 = tpu.matmul %15, %408, %cst_341 {dimension_numbers = #tpu.dot_dimension_numbers<[1], [0], [0], [1], [0, 0, 1, 1], [], []>} : vector<2x4xbf16>, vector<4x4xbf16>, vector<2x4xf32> -> vector<2x4xf32>
    %c1_342 = arith.constant 1 : index
    %c0_343 = arith.constant 0 : index
    %c0_344 = arith.constant 0 : index
    %410 = vector.load %arg3[%c1_342, %c0_343, %c0_344] : memref<9x4x4xbf16, #tpu.memory_space<vmem>>, vector<1x4x4xbf16>
    %411 = vector.shape_cast %410 : vector<1x4x4xbf16> to vector<4x4xbf16>
    %cst_345 = arith.constant dense<0.000000e+00> : vector<2x4xf32>
    %412 = tpu.matmul %16, %411, %cst_345 {dimension_numbers = #tpu.dot_dimension_numbers<[1], [0], [0], [1], [0, 0, 1, 1], [], []>} : vector<2x4xbf16>, vector<4x4xbf16>, vector<2x4xf32> -> vector<2x4xf32>
    %413 = arith.addf %409, %412 : vector<2x4xf32>
    %c2_346 = arith.constant 2 : index
    %c0_347 = arith.constant 0 : index
    %c0_348 = arith.constant 0 : index
    %414 = vector.load %arg3[%c2_346, %c0_347, %c0_348] : memref<9x4x4xbf16, #tpu.memory_space<vmem>>, vector<1x4x4xbf16>
    %415 = vector.shape_cast %414 : vector<1x4x4xbf16> to vector<4x4xbf16>
    %cst_349 = arith.constant dense<0.000000e+00> : vector<2x4xf32>
    %416 = tpu.matmul %17, %415, %cst_349 {dimension_numbers = #tpu.dot_dimension_numbers<[1], [0], [0], [1], [0, 0, 1, 1], [], []>} : vector<2x4xbf16>, vector<4x4xbf16>, vector<2x4xf32> -> vector<2x4xf32>
    %417 = arith.addf %413, %416 : vector<2x4xf32>
    %c3_350 = arith.constant 3 : index
    %c0_351 = arith.constant 0 : index
    %c0_352 = arith.constant 0 : index
    %418 = vector.load %arg3[%c3_350, %c0_351, %c0_352] : memref<9x4x4xbf16, #tpu.memory_space<vmem>>, vector<1x4x4xbf16>
    %419 = vector.shape_cast %418 : vector<1x4x4xbf16> to vector<4x4xbf16>
    %cst_353 = arith.constant dense<0.000000e+00> : vector<2x4xf32>
    %420 = tpu.matmul %19, %419, %cst_353 {dimension_numbers = #tpu.dot_dimension_numbers<[1], [0], [0], [1], [0, 0, 1, 1], [], []>} : vector<2x4xbf16>, vector<4x4xbf16>, vector<2x4xf32> -> vector<2x4xf32>
    %421 = arith.addf %417, %420 : vector<2x4xf32>
    %c4_354 = arith.constant 4 : index
    %c0_355 = arith.constant 0 : index
    %c0_356 = arith.constant 0 : index
    %422 = vector.load %arg3[%c4_354, %c0_355, %c0_356] : memref<9x4x4xbf16, #tpu.memory_space<vmem>>, vector<1x4x4xbf16>
    %423 = vector.shape_cast %422 : vector<1x4x4xbf16> to vector<4x4xbf16>
    %cst_357 = arith.constant dense<0.000000e+00> : vector<2x4xf32>
    %424 = tpu.matmul %20, %423, %cst_357 {dimension_numbers = #tpu.dot_dimension_numbers<[1], [0], [0], [1], [0, 0, 1, 1], [], []>} : vector<2x4xbf16>, vector<4x4xbf16>, vector<2x4xf32> -> vector<2x4xf32>
    %425 = arith.addf %421, %424 : vector<2x4xf32>
    %c5_358 = arith.constant 5 : index
    %c0_359 = arith.constant 0 : index
    %c0_360 = arith.constant 0 : index
    %426 = vector.load %arg3[%c5_358, %c0_359, %c0_360] : memref<9x4x4xbf16, #tpu.memory_space<vmem>>, vector<1x4x4xbf16>
    %427 = vector.shape_cast %426 : vector<1x4x4xbf16> to vector<4x4xbf16>
    %cst_361 = arith.constant dense<0.000000e+00> : vector<2x4xf32>
    %428 = tpu.matmul %21, %427, %cst_361 {dimension_numbers = #tpu.dot_dimension_numbers<[1], [0], [0], [1], [0, 0, 1, 1], [], []>} : vector<2x4xbf16>, vector<4x4xbf16>, vector<2x4xf32> -> vector<2x4xf32>
    %429 = arith.addf %425, %428 : vector<2x4xf32>
    %c6_362 = arith.constant 6 : index
    %c0_363 = arith.constant 0 : index
    %c0_364 = arith.constant 0 : index
    %430 = vector.load %arg3[%c6_362, %c0_363, %c0_364] : memref<9x4x4xbf16, #tpu.memory_space<vmem>>, vector<1x4x4xbf16>
    %431 = vector.shape_cast %430 : vector<1x4x4xbf16> to vector<4x4xbf16>
    %cst_365 = arith.constant dense<0.000000e+00> : vector<2x4xf32>
    %432 = tpu.matmul %23, %431, %cst_365 {dimension_numbers = #tpu.dot_dimension_numbers<[1], [0], [0], [1], [0, 0, 1, 1], [], []>} : vector<2x4xbf16>, vector<4x4xbf16>, vector<2x4xf32> -> vector<2x4xf32>
    %433 = arith.addf %429, %432 : vector<2x4xf32>
    %c7_366 = arith.constant 7 : index
    %c0_367 = arith.constant 0 : index
    %c0_368 = arith.constant 0 : index
    %434 = vector.load %arg3[%c7_366, %c0_367, %c0_368] : memref<9x4x4xbf16, #tpu.memory_space<vmem>>, vector<1x4x4xbf16>
    %435 = vector.shape_cast %434 : vector<1x4x4xbf16> to vector<4x4xbf16>
    %cst_369 = arith.constant dense<0.000000e+00> : vector<2x4xf32>
    %436 = tpu.matmul %24, %435, %cst_369 {dimension_numbers = #tpu.dot_dimension_numbers<[1], [0], [0], [1], [0, 0, 1, 1], [], []>} : vector<2x4xbf16>, vector<4x4xbf16>, vector<2x4xf32> -> vector<2x4xf32>
    %437 = arith.addf %433, %436 : vector<2x4xf32>
    %c8_370 = arith.constant 8 : index
    %c0_371 = arith.constant 0 : index
    %c0_372 = arith.constant 0 : index
    %438 = vector.load %arg3[%c8_370, %c0_371, %c0_372] : memref<9x4x4xbf16, #tpu.memory_space<vmem>>, vector<1x4x4xbf16>
    %439 = vector.shape_cast %438 : vector<1x4x4xbf16> to vector<4x4xbf16>
    %cst_373 = arith.constant dense<0.000000e+00> : vector<2x4xf32>
    %440 = tpu.matmul %25, %439, %cst_373 {dimension_numbers = #tpu.dot_dimension_numbers<[1], [0], [0], [1], [0, 0, 1, 1], [], []>} : vector<2x4xbf16>, vector<4x4xbf16>, vector<2x4xf32> -> vector<2x4xf32>
    %441 = arith.addf %437, %440 : vector<2x4xf32>
    %442 = vector.extract_strided_slice %9 {offsets = [10, 0], sizes = [1, 4], strides = [1, 1]} : vector<16x4xf32> to vector<1x4xf32>
    %443 = vector.broadcast %442 : vector<1x4xf32> to vector<2x4xf32>
    %444 = arith.addf %441, %443 : vector<2x4xf32>
    %cst_374 = arith.constant 0.000000e+00 : f32
    %445 = vector.broadcast %cst_374 : f32 to vector<2x4xf32>
    %446 = arith.cmpf ogt, %444, %445 : vector<2x4xf32>
    %cst_375 = arith.constant 2.000000e-01 : f32
    %447 = vector.broadcast %cst_375 : f32 to vector<2x4xf32>
    %448 = arith.mulf %447, %444 : vector<2x4xf32>
    %449 = arith.select %446, %444, %448 : vector<2x4xi1>, vector<2x4xf32>
    %450 = arith.truncf %449 : vector<2x4xf32> to vector<2x4xbf16>
    %c10_376 = arith.constant 10 : index
    %c0_377 = arith.constant 0 : index
    %c0_378 = arith.constant 0 : index
    %451 = vector.load %arg6[%c10_376, %c0_377, %c0_378] : memref<16x4x4xbf16, #tpu.memory_space<vmem>>, vector<1x4x4xbf16>
    %452 = vector.shape_cast %451 : vector<1x4x4xbf16> to vector<4x4xbf16>
    %cst_379 = arith.constant dense<0.000000e+00> : vector<2x4xf32>
    %453 = tpu.matmul %450, %452, %cst_379 {dimension_numbers = #tpu.dot_dimension_numbers<[1], [0], [0], [1], [0, 0, 1, 1], [], []>} : vector<2x4xbf16>, vector<4x4xbf16>, vector<2x4xf32> -> vector<2x4xf32>
    %454 = arith.addf %406, %453 : vector<2x4xf32>
    %c0_380 = arith.constant 0 : index
    %c0_381 = arith.constant 0 : index
    %c0_382 = arith.constant 0 : index
    %455 = vector.load %arg3[%c0_380, %c0_381, %c0_382] : memref<9x4x4xbf16, #tpu.memory_space<vmem>>, vector<1x4x4xbf16>
    %456 = vector.shape_cast %455 : vector<1x4x4xbf16> to vector<4x4xbf16>
    %cst_383 = arith.constant dense<0.000000e+00> : vector<2x4xf32>
    %457 = tpu.matmul %16, %456, %cst_383 {dimension_numbers = #tpu.dot_dimension_numbers<[1], [0], [0], [1], [0, 0, 1, 1], [], []>} : vector<2x4xbf16>, vector<4x4xbf16>, vector<2x4xf32> -> vector<2x4xf32>
    %c1_384 = arith.constant 1 : index
    %c0_385 = arith.constant 0 : index
    %c0_386 = arith.constant 0 : index
    %458 = vector.load %arg3[%c1_384, %c0_385, %c0_386] : memref<9x4x4xbf16, #tpu.memory_space<vmem>>, vector<1x4x4xbf16>
    %459 = vector.shape_cast %458 : vector<1x4x4xbf16> to vector<4x4xbf16>
    %cst_387 = arith.constant dense<0.000000e+00> : vector<2x4xf32>
    %460 = tpu.matmul %17, %459, %cst_387 {dimension_numbers = #tpu.dot_dimension_numbers<[1], [0], [0], [1], [0, 0, 1, 1], [], []>} : vector<2x4xbf16>, vector<4x4xbf16>, vector<2x4xf32> -> vector<2x4xf32>
    %461 = arith.addf %457, %460 : vector<2x4xf32>
    %c3_388 = arith.constant 3 : index
    %c0_389 = arith.constant 0 : index
    %c0_390 = arith.constant 0 : index
    %462 = vector.load %arg3[%c3_388, %c0_389, %c0_390] : memref<9x4x4xbf16, #tpu.memory_space<vmem>>, vector<1x4x4xbf16>
    %463 = vector.shape_cast %462 : vector<1x4x4xbf16> to vector<4x4xbf16>
    %cst_391 = arith.constant dense<0.000000e+00> : vector<2x4xf32>
    %464 = tpu.matmul %20, %463, %cst_391 {dimension_numbers = #tpu.dot_dimension_numbers<[1], [0], [0], [1], [0, 0, 1, 1], [], []>} : vector<2x4xbf16>, vector<4x4xbf16>, vector<2x4xf32> -> vector<2x4xf32>
    %465 = arith.addf %461, %464 : vector<2x4xf32>
    %c4_392 = arith.constant 4 : index
    %c0_393 = arith.constant 0 : index
    %c0_394 = arith.constant 0 : index
    %466 = vector.load %arg3[%c4_392, %c0_393, %c0_394] : memref<9x4x4xbf16, #tpu.memory_space<vmem>>, vector<1x4x4xbf16>
    %467 = vector.shape_cast %466 : vector<1x4x4xbf16> to vector<4x4xbf16>
    %cst_395 = arith.constant dense<0.000000e+00> : vector<2x4xf32>
    %468 = tpu.matmul %21, %467, %cst_395 {dimension_numbers = #tpu.dot_dimension_numbers<[1], [0], [0], [1], [0, 0, 1, 1], [], []>} : vector<2x4xbf16>, vector<4x4xbf16>, vector<2x4xf32> -> vector<2x4xf32>
    %469 = arith.addf %465, %468 : vector<2x4xf32>
    %c6_396 = arith.constant 6 : index
    %c0_397 = arith.constant 0 : index
    %c0_398 = arith.constant 0 : index
    %470 = vector.load %arg3[%c6_396, %c0_397, %c0_398] : memref<9x4x4xbf16, #tpu.memory_space<vmem>>, vector<1x4x4xbf16>
    %471 = vector.shape_cast %470 : vector<1x4x4xbf16> to vector<4x4xbf16>
    %cst_399 = arith.constant dense<0.000000e+00> : vector<2x4xf32>
    %472 = tpu.matmul %24, %471, %cst_399 {dimension_numbers = #tpu.dot_dimension_numbers<[1], [0], [0], [1], [0, 0, 1, 1], [], []>} : vector<2x4xbf16>, vector<4x4xbf16>, vector<2x4xf32> -> vector<2x4xf32>
    %473 = arith.addf %469, %472 : vector<2x4xf32>
    %c7_400 = arith.constant 7 : index
    %c0_401 = arith.constant 0 : index
    %c0_402 = arith.constant 0 : index
    %474 = vector.load %arg3[%c7_400, %c0_401, %c0_402] : memref<9x4x4xbf16, #tpu.memory_space<vmem>>, vector<1x4x4xbf16>
    %475 = vector.shape_cast %474 : vector<1x4x4xbf16> to vector<4x4xbf16>
    %cst_403 = arith.constant dense<0.000000e+00> : vector<2x4xf32>
    %476 = tpu.matmul %25, %475, %cst_403 {dimension_numbers = #tpu.dot_dimension_numbers<[1], [0], [0], [1], [0, 0, 1, 1], [], []>} : vector<2x4xbf16>, vector<4x4xbf16>, vector<2x4xf32> -> vector<2x4xf32>
    %477 = arith.addf %473, %476 : vector<2x4xf32>
    %478 = vector.extract_strided_slice %9 {offsets = [11, 0], sizes = [1, 4], strides = [1, 1]} : vector<16x4xf32> to vector<1x4xf32>
    %479 = vector.broadcast %478 : vector<1x4xf32> to vector<2x4xf32>
    %480 = arith.addf %477, %479 : vector<2x4xf32>
    %cst_404 = arith.constant 0.000000e+00 : f32
    %481 = vector.broadcast %cst_404 : f32 to vector<2x4xf32>
    %482 = arith.cmpf ogt, %480, %481 : vector<2x4xf32>
    %cst_405 = arith.constant 2.000000e-01 : f32
    %483 = vector.broadcast %cst_405 : f32 to vector<2x4xf32>
    %484 = arith.mulf %483, %480 : vector<2x4xf32>
    %485 = arith.select %482, %480, %484 : vector<2x4xi1>, vector<2x4xf32>
    %486 = arith.truncf %485 : vector<2x4xf32> to vector<2x4xbf16>
    %c11 = arith.constant 11 : index
    %c0_406 = arith.constant 0 : index
    %c0_407 = arith.constant 0 : index
    %487 = vector.load %arg6[%c11, %c0_406, %c0_407] : memref<16x4x4xbf16, #tpu.memory_space<vmem>>, vector<1x4x4xbf16>
    %488 = vector.shape_cast %487 : vector<1x4x4xbf16> to vector<4x4xbf16>
    %cst_408 = arith.constant dense<0.000000e+00> : vector<2x4xf32>
    %489 = tpu.matmul %486, %488, %cst_408 {dimension_numbers = #tpu.dot_dimension_numbers<[1], [0], [0], [1], [0, 0, 1, 1], [], []>} : vector<2x4xbf16>, vector<4x4xbf16>, vector<2x4xf32> -> vector<2x4xf32>
    %490 = arith.addf %454, %489 : vector<2x4xf32>
    %c1_409 = arith.constant 1 : index
    %c0_410 = arith.constant 0 : index
    %c0_411 = arith.constant 0 : index
    %491 = vector.load %arg3[%c1_409, %c0_410, %c0_411] : memref<9x4x4xbf16, #tpu.memory_space<vmem>>, vector<1x4x4xbf16>
    %492 = vector.shape_cast %491 : vector<1x4x4xbf16> to vector<4x4xbf16>
    %cst_412 = arith.constant dense<0.000000e+00> : vector<2x4xf32>
    %493 = tpu.matmul %18, %492, %cst_412 {dimension_numbers = #tpu.dot_dimension_numbers<[1], [0], [0], [1], [0, 0, 1, 1], [], []>} : vector<2x4xbf16>, vector<4x4xbf16>, vector<2x4xf32> -> vector<2x4xf32>
    %c2_413 = arith.constant 2 : index
    %c0_414 = arith.constant 0 : index
    %c0_415 = arith.constant 0 : index
    %494 = vector.load %arg3[%c2_413, %c0_414, %c0_415] : memref<9x4x4xbf16, #tpu.memory_space<vmem>>, vector<1x4x4xbf16>
    %495 = vector.shape_cast %494 : vector<1x4x4xbf16> to vector<4x4xbf16>
    %cst_416 = arith.constant dense<0.000000e+00> : vector<2x4xf32>
    %496 = tpu.matmul %19, %495, %cst_416 {dimension_numbers = #tpu.dot_dimension_numbers<[1], [0], [0], [1], [0, 0, 1, 1], [], []>} : vector<2x4xbf16>, vector<4x4xbf16>, vector<2x4xf32> -> vector<2x4xf32>
    %497 = arith.addf %493, %496 : vector<2x4xf32>
    %c4_417 = arith.constant 4 : index
    %c0_418 = arith.constant 0 : index
    %c0_419 = arith.constant 0 : index
    %498 = vector.load %arg3[%c4_417, %c0_418, %c0_419] : memref<9x4x4xbf16, #tpu.memory_space<vmem>>, vector<1x4x4xbf16>
    %499 = vector.shape_cast %498 : vector<1x4x4xbf16> to vector<4x4xbf16>
    %cst_420 = arith.constant dense<0.000000e+00> : vector<2x4xf32>
    %500 = tpu.matmul %22, %499, %cst_420 {dimension_numbers = #tpu.dot_dimension_numbers<[1], [0], [0], [1], [0, 0, 1, 1], [], []>} : vector<2x4xbf16>, vector<4x4xbf16>, vector<2x4xf32> -> vector<2x4xf32>
    %501 = arith.addf %497, %500 : vector<2x4xf32>
    %c5_421 = arith.constant 5 : index
    %c0_422 = arith.constant 0 : index
    %c0_423 = arith.constant 0 : index
    %502 = vector.load %arg3[%c5_421, %c0_422, %c0_423] : memref<9x4x4xbf16, #tpu.memory_space<vmem>>, vector<1x4x4xbf16>
    %503 = vector.shape_cast %502 : vector<1x4x4xbf16> to vector<4x4xbf16>
    %cst_424 = arith.constant dense<0.000000e+00> : vector<2x4xf32>
    %504 = tpu.matmul %23, %503, %cst_424 {dimension_numbers = #tpu.dot_dimension_numbers<[1], [0], [0], [1], [0, 0, 1, 1], [], []>} : vector<2x4xbf16>, vector<4x4xbf16>, vector<2x4xf32> -> vector<2x4xf32>
    %505 = arith.addf %501, %504 : vector<2x4xf32>
    %506 = vector.extract_strided_slice %9 {offsets = [12, 0], sizes = [1, 4], strides = [1, 1]} : vector<16x4xf32> to vector<1x4xf32>
    %507 = vector.broadcast %506 : vector<1x4xf32> to vector<2x4xf32>
    %508 = arith.addf %505, %507 : vector<2x4xf32>
    %cst_425 = arith.constant 0.000000e+00 : f32
    %509 = vector.broadcast %cst_425 : f32 to vector<2x4xf32>
    %510 = arith.cmpf ogt, %508, %509 : vector<2x4xf32>
    %cst_426 = arith.constant 2.000000e-01 : f32
    %511 = vector.broadcast %cst_426 : f32 to vector<2x4xf32>
    %512 = arith.mulf %511, %508 : vector<2x4xf32>
    %513 = arith.select %510, %508, %512 : vector<2x4xi1>, vector<2x4xf32>
    %514 = arith.truncf %513 : vector<2x4xf32> to vector<2x4xbf16>
    %c12_427 = arith.constant 12 : index
    %c0_428 = arith.constant 0 : index
    %c0_429 = arith.constant 0 : index
    %515 = vector.load %arg6[%c12_427, %c0_428, %c0_429] : memref<16x4x4xbf16, #tpu.memory_space<vmem>>, vector<1x4x4xbf16>
    %516 = vector.shape_cast %515 : vector<1x4x4xbf16> to vector<4x4xbf16>
    %cst_430 = arith.constant dense<0.000000e+00> : vector<2x4xf32>
    %517 = tpu.matmul %514, %516, %cst_430 {dimension_numbers = #tpu.dot_dimension_numbers<[1], [0], [0], [1], [0, 0, 1, 1], [], []>} : vector<2x4xbf16>, vector<4x4xbf16>, vector<2x4xf32> -> vector<2x4xf32>
    %518 = arith.addf %490, %517 : vector<2x4xf32>
    %c0_431 = arith.constant 0 : index
    %c0_432 = arith.constant 0 : index
    %c0_433 = arith.constant 0 : index
    %519 = vector.load %arg3[%c0_431, %c0_432, %c0_433] : memref<9x4x4xbf16, #tpu.memory_space<vmem>>, vector<1x4x4xbf16>
    %520 = vector.shape_cast %519 : vector<1x4x4xbf16> to vector<4x4xbf16>
    %cst_434 = arith.constant dense<0.000000e+00> : vector<2x4xf32>
    %521 = tpu.matmul %18, %520, %cst_434 {dimension_numbers = #tpu.dot_dimension_numbers<[1], [0], [0], [1], [0, 0, 1, 1], [], []>} : vector<2x4xbf16>, vector<4x4xbf16>, vector<2x4xf32> -> vector<2x4xf32>
    %c1_435 = arith.constant 1 : index
    %c0_436 = arith.constant 0 : index
    %c0_437 = arith.constant 0 : index
    %522 = vector.load %arg3[%c1_435, %c0_436, %c0_437] : memref<9x4x4xbf16, #tpu.memory_space<vmem>>, vector<1x4x4xbf16>
    %523 = vector.shape_cast %522 : vector<1x4x4xbf16> to vector<4x4xbf16>
    %cst_438 = arith.constant dense<0.000000e+00> : vector<2x4xf32>
    %524 = tpu.matmul %19, %523, %cst_438 {dimension_numbers = #tpu.dot_dimension_numbers<[1], [0], [0], [1], [0, 0, 1, 1], [], []>} : vector<2x4xbf16>, vector<4x4xbf16>, vector<2x4xf32> -> vector<2x4xf32>
    %525 = arith.addf %521, %524 : vector<2x4xf32>
    %c2_439 = arith.constant 2 : index
    %c0_440 = arith.constant 0 : index
    %c0_441 = arith.constant 0 : index
    %526 = vector.load %arg3[%c2_439, %c0_440, %c0_441] : memref<9x4x4xbf16, #tpu.memory_space<vmem>>, vector<1x4x4xbf16>
    %527 = vector.shape_cast %526 : vector<1x4x4xbf16> to vector<4x4xbf16>
    %cst_442 = arith.constant dense<0.000000e+00> : vector<2x4xf32>
    %528 = tpu.matmul %20, %527, %cst_442 {dimension_numbers = #tpu.dot_dimension_numbers<[1], [0], [0], [1], [0, 0, 1, 1], [], []>} : vector<2x4xbf16>, vector<4x4xbf16>, vector<2x4xf32> -> vector<2x4xf32>
    %529 = arith.addf %525, %528 : vector<2x4xf32>
    %c3_443 = arith.constant 3 : index
    %c0_444 = arith.constant 0 : index
    %c0_445 = arith.constant 0 : index
    %530 = vector.load %arg3[%c3_443, %c0_444, %c0_445] : memref<9x4x4xbf16, #tpu.memory_space<vmem>>, vector<1x4x4xbf16>
    %531 = vector.shape_cast %530 : vector<1x4x4xbf16> to vector<4x4xbf16>
    %cst_446 = arith.constant dense<0.000000e+00> : vector<2x4xf32>
    %532 = tpu.matmul %22, %531, %cst_446 {dimension_numbers = #tpu.dot_dimension_numbers<[1], [0], [0], [1], [0, 0, 1, 1], [], []>} : vector<2x4xbf16>, vector<4x4xbf16>, vector<2x4xf32> -> vector<2x4xf32>
    %533 = arith.addf %529, %532 : vector<2x4xf32>
    %c4_447 = arith.constant 4 : index
    %c0_448 = arith.constant 0 : index
    %c0_449 = arith.constant 0 : index
    %534 = vector.load %arg3[%c4_447, %c0_448, %c0_449] : memref<9x4x4xbf16, #tpu.memory_space<vmem>>, vector<1x4x4xbf16>
    %535 = vector.shape_cast %534 : vector<1x4x4xbf16> to vector<4x4xbf16>
    %cst_450 = arith.constant dense<0.000000e+00> : vector<2x4xf32>
    %536 = tpu.matmul %23, %535, %cst_450 {dimension_numbers = #tpu.dot_dimension_numbers<[1], [0], [0], [1], [0, 0, 1, 1], [], []>} : vector<2x4xbf16>, vector<4x4xbf16>, vector<2x4xf32> -> vector<2x4xf32>
    %537 = arith.addf %533, %536 : vector<2x4xf32>
    %c5_451 = arith.constant 5 : index
    %c0_452 = arith.constant 0 : index
    %c0_453 = arith.constant 0 : index
    %538 = vector.load %arg3[%c5_451, %c0_452, %c0_453] : memref<9x4x4xbf16, #tpu.memory_space<vmem>>, vector<1x4x4xbf16>
    %539 = vector.shape_cast %538 : vector<1x4x4xbf16> to vector<4x4xbf16>
    %cst_454 = arith.constant dense<0.000000e+00> : vector<2x4xf32>
    %540 = tpu.matmul %24, %539, %cst_454 {dimension_numbers = #tpu.dot_dimension_numbers<[1], [0], [0], [1], [0, 0, 1, 1], [], []>} : vector<2x4xbf16>, vector<4x4xbf16>, vector<2x4xf32> -> vector<2x4xf32>
    %541 = arith.addf %537, %540 : vector<2x4xf32>
    %542 = vector.extract_strided_slice %9 {offsets = [13, 0], sizes = [1, 4], strides = [1, 1]} : vector<16x4xf32> to vector<1x4xf32>
    %543 = vector.broadcast %542 : vector<1x4xf32> to vector<2x4xf32>
    %544 = arith.addf %541, %543 : vector<2x4xf32>
    %cst_455 = arith.constant 0.000000e+00 : f32
    %545 = vector.broadcast %cst_455 : f32 to vector<2x4xf32>
    %546 = arith.cmpf ogt, %544, %545 : vector<2x4xf32>
    %cst_456 = arith.constant 2.000000e-01 : f32
    %547 = vector.broadcast %cst_456 : f32 to vector<2x4xf32>
    %548 = arith.mulf %547, %544 : vector<2x4xf32>
    %549 = arith.select %546, %544, %548 : vector<2x4xi1>, vector<2x4xf32>
    %550 = arith.truncf %549 : vector<2x4xf32> to vector<2x4xbf16>
    %c13 = arith.constant 13 : index
    %c0_457 = arith.constant 0 : index
    %c0_458 = arith.constant 0 : index
    %551 = vector.load %arg6[%c13, %c0_457, %c0_458] : memref<16x4x4xbf16, #tpu.memory_space<vmem>>, vector<1x4x4xbf16>
    %552 = vector.shape_cast %551 : vector<1x4x4xbf16> to vector<4x4xbf16>
    %cst_459 = arith.constant dense<0.000000e+00> : vector<2x4xf32>
    %553 = tpu.matmul %550, %552, %cst_459 {dimension_numbers = #tpu.dot_dimension_numbers<[1], [0], [0], [1], [0, 0, 1, 1], [], []>} : vector<2x4xbf16>, vector<4x4xbf16>, vector<2x4xf32> -> vector<2x4xf32>
    %554 = arith.addf %518, %553 : vector<2x4xf32>
    %c0_460 = arith.constant 0 : index
    %c0_461 = arith.constant 0 : index
    %c0_462 = arith.constant 0 : index
    %555 = vector.load %arg3[%c0_460, %c0_461, %c0_462] : memref<9x4x4xbf16, #tpu.memory_space<vmem>>, vector<1x4x4xbf16>
    %556 = vector.shape_cast %555 : vector<1x4x4xbf16> to vector<4x4xbf16>
    %cst_463 = arith.constant dense<0.000000e+00> : vector<2x4xf32>
    %557 = tpu.matmul %19, %556, %cst_463 {dimension_numbers = #tpu.dot_dimension_numbers<[1], [0], [0], [1], [0, 0, 1, 1], [], []>} : vector<2x4xbf16>, vector<4x4xbf16>, vector<2x4xf32> -> vector<2x4xf32>
    %c1_464 = arith.constant 1 : index
    %c0_465 = arith.constant 0 : index
    %c0_466 = arith.constant 0 : index
    %558 = vector.load %arg3[%c1_464, %c0_465, %c0_466] : memref<9x4x4xbf16, #tpu.memory_space<vmem>>, vector<1x4x4xbf16>
    %559 = vector.shape_cast %558 : vector<1x4x4xbf16> to vector<4x4xbf16>
    %cst_467 = arith.constant dense<0.000000e+00> : vector<2x4xf32>
    %560 = tpu.matmul %20, %559, %cst_467 {dimension_numbers = #tpu.dot_dimension_numbers<[1], [0], [0], [1], [0, 0, 1, 1], [], []>} : vector<2x4xbf16>, vector<4x4xbf16>, vector<2x4xf32> -> vector<2x4xf32>
    %561 = arith.addf %557, %560 : vector<2x4xf32>
    %c2_468 = arith.constant 2 : index
    %c0_469 = arith.constant 0 : index
    %c0_470 = arith.constant 0 : index
    %562 = vector.load %arg3[%c2_468, %c0_469, %c0_470] : memref<9x4x4xbf16, #tpu.memory_space<vmem>>, vector<1x4x4xbf16>
    %563 = vector.shape_cast %562 : vector<1x4x4xbf16> to vector<4x4xbf16>
    %cst_471 = arith.constant dense<0.000000e+00> : vector<2x4xf32>
    %564 = tpu.matmul %21, %563, %cst_471 {dimension_numbers = #tpu.dot_dimension_numbers<[1], [0], [0], [1], [0, 0, 1, 1], [], []>} : vector<2x4xbf16>, vector<4x4xbf16>, vector<2x4xf32> -> vector<2x4xf32>
    %565 = arith.addf %561, %564 : vector<2x4xf32>
    %c3_472 = arith.constant 3 : index
    %c0_473 = arith.constant 0 : index
    %c0_474 = arith.constant 0 : index
    %566 = vector.load %arg3[%c3_472, %c0_473, %c0_474] : memref<9x4x4xbf16, #tpu.memory_space<vmem>>, vector<1x4x4xbf16>
    %567 = vector.shape_cast %566 : vector<1x4x4xbf16> to vector<4x4xbf16>
    %cst_475 = arith.constant dense<0.000000e+00> : vector<2x4xf32>
    %568 = tpu.matmul %23, %567, %cst_475 {dimension_numbers = #tpu.dot_dimension_numbers<[1], [0], [0], [1], [0, 0, 1, 1], [], []>} : vector<2x4xbf16>, vector<4x4xbf16>, vector<2x4xf32> -> vector<2x4xf32>
    %569 = arith.addf %565, %568 : vector<2x4xf32>
    %c4_476 = arith.constant 4 : index
    %c0_477 = arith.constant 0 : index
    %c0_478 = arith.constant 0 : index
    %570 = vector.load %arg3[%c4_476, %c0_477, %c0_478] : memref<9x4x4xbf16, #tpu.memory_space<vmem>>, vector<1x4x4xbf16>
    %571 = vector.shape_cast %570 : vector<1x4x4xbf16> to vector<4x4xbf16>
    %cst_479 = arith.constant dense<0.000000e+00> : vector<2x4xf32>
    %572 = tpu.matmul %24, %571, %cst_479 {dimension_numbers = #tpu.dot_dimension_numbers<[1], [0], [0], [1], [0, 0, 1, 1], [], []>} : vector<2x4xbf16>, vector<4x4xbf16>, vector<2x4xf32> -> vector<2x4xf32>
    %573 = arith.addf %569, %572 : vector<2x4xf32>
    %c5_480 = arith.constant 5 : index
    %c0_481 = arith.constant 0 : index
    %c0_482 = arith.constant 0 : index
    %574 = vector.load %arg3[%c5_480, %c0_481, %c0_482] : memref<9x4x4xbf16, #tpu.memory_space<vmem>>, vector<1x4x4xbf16>
    %575 = vector.shape_cast %574 : vector<1x4x4xbf16> to vector<4x4xbf16>
    %cst_483 = arith.constant dense<0.000000e+00> : vector<2x4xf32>
    %576 = tpu.matmul %25, %575, %cst_483 {dimension_numbers = #tpu.dot_dimension_numbers<[1], [0], [0], [1], [0, 0, 1, 1], [], []>} : vector<2x4xbf16>, vector<4x4xbf16>, vector<2x4xf32> -> vector<2x4xf32>
    %577 = arith.addf %573, %576 : vector<2x4xf32>
    %578 = vector.extract_strided_slice %9 {offsets = [14, 0], sizes = [1, 4], strides = [1, 1]} : vector<16x4xf32> to vector<1x4xf32>
    %579 = vector.broadcast %578 : vector<1x4xf32> to vector<2x4xf32>
    %580 = arith.addf %577, %579 : vector<2x4xf32>
    %cst_484 = arith.constant 0.000000e+00 : f32
    %581 = vector.broadcast %cst_484 : f32 to vector<2x4xf32>
    %582 = arith.cmpf ogt, %580, %581 : vector<2x4xf32>
    %cst_485 = arith.constant 2.000000e-01 : f32
    %583 = vector.broadcast %cst_485 : f32 to vector<2x4xf32>
    %584 = arith.mulf %583, %580 : vector<2x4xf32>
    %585 = arith.select %582, %580, %584 : vector<2x4xi1>, vector<2x4xf32>
    %586 = arith.truncf %585 : vector<2x4xf32> to vector<2x4xbf16>
    %c14_486 = arith.constant 14 : index
    %c0_487 = arith.constant 0 : index
    %c0_488 = arith.constant 0 : index
    %587 = vector.load %arg6[%c14_486, %c0_487, %c0_488] : memref<16x4x4xbf16, #tpu.memory_space<vmem>>, vector<1x4x4xbf16>
    %588 = vector.shape_cast %587 : vector<1x4x4xbf16> to vector<4x4xbf16>
    %cst_489 = arith.constant dense<0.000000e+00> : vector<2x4xf32>
    %589 = tpu.matmul %586, %588, %cst_489 {dimension_numbers = #tpu.dot_dimension_numbers<[1], [0], [0], [1], [0, 0, 1, 1], [], []>} : vector<2x4xbf16>, vector<4x4xbf16>, vector<2x4xf32> -> vector<2x4xf32>
    %590 = arith.addf %554, %589 : vector<2x4xf32>
    %c0_490 = arith.constant 0 : index
    %c0_491 = arith.constant 0 : index
    %c0_492 = arith.constant 0 : index
    %591 = vector.load %arg3[%c0_490, %c0_491, %c0_492] : memref<9x4x4xbf16, #tpu.memory_space<vmem>>, vector<1x4x4xbf16>
    %592 = vector.shape_cast %591 : vector<1x4x4xbf16> to vector<4x4xbf16>
    %cst_493 = arith.constant dense<0.000000e+00> : vector<2x4xf32>
    %593 = tpu.matmul %20, %592, %cst_493 {dimension_numbers = #tpu.dot_dimension_numbers<[1], [0], [0], [1], [0, 0, 1, 1], [], []>} : vector<2x4xbf16>, vector<4x4xbf16>, vector<2x4xf32> -> vector<2x4xf32>
    %c1_494 = arith.constant 1 : index
    %c0_495 = arith.constant 0 : index
    %c0_496 = arith.constant 0 : index
    %594 = vector.load %arg3[%c1_494, %c0_495, %c0_496] : memref<9x4x4xbf16, #tpu.memory_space<vmem>>, vector<1x4x4xbf16>
    %595 = vector.shape_cast %594 : vector<1x4x4xbf16> to vector<4x4xbf16>
    %cst_497 = arith.constant dense<0.000000e+00> : vector<2x4xf32>
    %596 = tpu.matmul %21, %595, %cst_497 {dimension_numbers = #tpu.dot_dimension_numbers<[1], [0], [0], [1], [0, 0, 1, 1], [], []>} : vector<2x4xbf16>, vector<4x4xbf16>, vector<2x4xf32> -> vector<2x4xf32>
    %597 = arith.addf %593, %596 : vector<2x4xf32>
    %c3_498 = arith.constant 3 : index
    %c0_499 = arith.constant 0 : index
    %c0_500 = arith.constant 0 : index
    %598 = vector.load %arg3[%c3_498, %c0_499, %c0_500] : memref<9x4x4xbf16, #tpu.memory_space<vmem>>, vector<1x4x4xbf16>
    %599 = vector.shape_cast %598 : vector<1x4x4xbf16> to vector<4x4xbf16>
    %cst_501 = arith.constant dense<0.000000e+00> : vector<2x4xf32>
    %600 = tpu.matmul %24, %599, %cst_501 {dimension_numbers = #tpu.dot_dimension_numbers<[1], [0], [0], [1], [0, 0, 1, 1], [], []>} : vector<2x4xbf16>, vector<4x4xbf16>, vector<2x4xf32> -> vector<2x4xf32>
    %601 = arith.addf %597, %600 : vector<2x4xf32>
    %c4_502 = arith.constant 4 : index
    %c0_503 = arith.constant 0 : index
    %c0_504 = arith.constant 0 : index
    %602 = vector.load %arg3[%c4_502, %c0_503, %c0_504] : memref<9x4x4xbf16, #tpu.memory_space<vmem>>, vector<1x4x4xbf16>
    %603 = vector.shape_cast %602 : vector<1x4x4xbf16> to vector<4x4xbf16>
    %cst_505 = arith.constant dense<0.000000e+00> : vector<2x4xf32>
    %604 = tpu.matmul %25, %603, %cst_505 {dimension_numbers = #tpu.dot_dimension_numbers<[1], [0], [0], [1], [0, 0, 1, 1], [], []>} : vector<2x4xbf16>, vector<4x4xbf16>, vector<2x4xf32> -> vector<2x4xf32>
    %605 = arith.addf %601, %604 : vector<2x4xf32>
    %606 = vector.extract_strided_slice %9 {offsets = [15, 0], sizes = [1, 4], strides = [1, 1]} : vector<16x4xf32> to vector<1x4xf32>
    %607 = vector.broadcast %606 : vector<1x4xf32> to vector<2x4xf32>
    %608 = arith.addf %605, %607 : vector<2x4xf32>
    %cst_506 = arith.constant 0.000000e+00 : f32
    %609 = vector.broadcast %cst_506 : f32 to vector<2x4xf32>
    %610 = arith.cmpf ogt, %608, %609 : vector<2x4xf32>
    %cst_507 = arith.constant 2.000000e-01 : f32
    %611 = vector.broadcast %cst_507 : f32 to vector<2x4xf32>
    %612 = arith.mulf %611, %608 : vector<2x4xf32>
    %613 = arith.select %610, %608, %612 : vector<2x4xi1>, vector<2x4xf32>
    %614 = arith.truncf %613 : vector<2x4xf32> to vector<2x4xbf16>
    %c15 = arith.constant 15 : index
    %c0_508 = arith.constant 0 : index
    %c0_509 = arith.constant 0 : index
    %615 = vector.load %arg6[%c15, %c0_508, %c0_509] : memref<16x4x4xbf16, #tpu.memory_space<vmem>>, vector<1x4x4xbf16>
    %616 = vector.shape_cast %615 : vector<1x4x4xbf16> to vector<4x4xbf16>
    %cst_510 = arith.constant dense<0.000000e+00> : vector<2x4xf32>
    %617 = tpu.matmul %614, %616, %cst_510 {dimension_numbers = #tpu.dot_dimension_numbers<[1], [0], [0], [1], [0, 0, 1, 1], [], []>} : vector<2x4xbf16>, vector<4x4xbf16>, vector<2x4xf32> -> vector<2x4xf32>
    %618 = arith.addf %590, %617 : vector<2x4xf32>
    %c0_511 = arith.constant 0 : index
    %c0_512 = arith.constant 0 : index
    %619 = vector.load %arg11[%c0_511, %c0_512] : memref<2x4xf32, #tpu.memory_space<vmem>>, vector<2x4xf32>
    %620 = arith.addf %619, %618 : vector<2x4xf32>
    %c0_513 = arith.constant 0 : index
    %c0_514 = arith.constant 0 : index
    %621 = vector.load %arg11[%c0_513, %c0_514] : memref<2x4xf32, #tpu.memory_space<vmem>>, vector<2x4xf32>
    tpu.vector_store %arg11[%c0_513, %c0_514], %620 {strides = array<i32>} : memref<2x4xf32, #tpu.memory_space<vmem>>, vector<2x4xf32>,
    %c0_i32_515 = arith.constant 0 : i32
    %622 = arith.cmpi eq, %arg0, %c0_i32_515 : i32
    %623 = arith.extui %622 : i1 to i32
    %c0_i32_516 = arith.constant 0 : i32
    %624 = arith.cmpi ne, %623, %c0_i32_516 : i32
    scf.if %624 {
      %c0_517 = arith.constant 0 : index
      %c0_518 = arith.constant 0 : index
      %625 = vector.load %arg11[%c0_517, %c0_518] : memref<2x4xf32, #tpu.memory_space<vmem>>, vector<2x4xf32>
      %c0_519 = arith.constant 0 : index
      %c0_520 = arith.constant 0 : index
      %626 = vector.load %arg7[%c0_519, %c0_520] : memref<1x4xf32, #tpu.memory_space<vmem>>, vector<1x4xf32>
      %627 = vector.broadcast %626 : vector<1x4xf32> to vector<2x4xf32>
      %628 = arith.addf %625, %627 : vector<2x4xf32>
      %cst_521 = arith.constant 0.000000e+00 : f32
      %629 = vector.broadcast %cst_521 : f32 to vector<2x4xf32>
      %630 = arith.cmpf ogt, %628, %629 : vector<2x4xf32>
      %cst_522 = arith.constant 2.000000e-01 : f32
      %631 = vector.broadcast %cst_522 : f32 to vector<2x4xf32>
      %632 = arith.mulf %631, %628 : vector<2x4xf32>
      %633 = arith.select %630, %628, %632 : vector<2x4xi1>, vector<2x4xf32>
      %c0_523 = arith.constant 0 : index
      %c0_524 = arith.constant 0 : index
      %634 = vector.load %arg8[%c0_523, %c0_524] : memref<4x1xf32, #tpu.memory_space<vmem>>, vector<4x1xf32>
      %cst_525 = arith.constant dense<0.000000e+00> : vector<2x1xf32>
      %635 = tpu.matmul %633, %634, %cst_525 {dimension_numbers = #tpu.dot_dimension_numbers<[1], [0], [0], [1], [0, 0, 1, 1], [], []>} : vector<2x4xf32>, vector<4x1xf32>, vector<2x1xf32> -> vector<2x1xf32>
      %c0_526 = arith.constant 0 : index
      %c0_527 = arith.constant 0 : index
      %636 = vector.load %arg9[%c0_526, %c0_527] : memref<1x1xf32, #tpu.memory_space<vmem>>, vector<1x1xf32>
      %637 = vector.broadcast %636 : vector<1x1xf32> to vector<2x1xf32>
      %638 = arith.addf %635, %637 : vector<2x1xf32>
      %c0_528 = arith.constant 0 : index
      %c0_529 = arith.constant 0 : index
      %639 = vector.load %arg10[%c0_528, %c0_529] : memref<2x1xf32, #tpu.memory_space<vmem>>, vector<2x1xf32>
      tpu.vector_store %arg10[%c0_528, %c0_529], %638 {strides = array<i32>} : memref<2x1xf32, #tpu.memory_space<vmem>>, vector<2x1xf32>,
    } else {
    }
    return
  }
  func.func @transform_0(%arg0: i32) -> (i32, i32) {
    %c0_i32 = arith.constant 0 : i32
    %c0_i32_0 = arith.constant 0 : i32
    %c0_i32_1 = arith.constant 0 : i32
    return %c0_i32, %c0_i32_0 : i32, i32
  }
  func.func @transform_1(%arg0: i32) -> (i32, i32) {
    %c0_i32 = arith.constant 0 : i32
    %c0_i32_0 = arith.constant 0 : i32
    %c0_i32_1 = arith.constant 0 : i32
    return %c0_i32, %c0_i32_0 : i32, i32
  }
  func.func @transform_2(%arg0: i32) -> (i32, i32, i32) {
    %c0_i32 = arith.constant 0 : i32
    %c0_i32_0 = arith.constant 0 : i32
    %c0_i32_1 = arith.constant 0 : i32
    return %c0_i32, %c0_i32_0, %arg0 : i32, i32, i32
  }
  func.func @transform_3(%arg0: i32) -> (i32, i32) {
    %c0_i32 = arith.constant 0 : i32
    %c0_i32_0 = arith.constant 0 : i32
    return %c0_i32, %arg0 : i32, i32
  }
  func.func @transform_4(%arg0: i32) -> (i32, i32) {
    %c0_i32 = arith.constant 0 : i32
    %c0_i32_0 = arith.constant 0 : i32
    return %c0_i32, %arg0 : i32, i32
  }
  func.func @transform_5(%arg0: i32) -> (i32, i32, i32) {
    %c0_i32 = arith.constant 0 : i32
    %c0_i32_0 = arith.constant 0 : i32
    %c0_i32_1 = arith.constant 0 : i32
    return %c0_i32, %arg0, %c0_i32_0 : i32, i32, i32
  }
  func.func @transform_6(%arg0: i32) -> (i32, i32) {
    %c0_i32 = arith.constant 0 : i32
    %c0_i32_0 = arith.constant 0 : i32
    %c0_i32_1 = arith.constant 0 : i32
    return %c0_i32, %c0_i32_0 : i32, i32
  }
  func.func @transform_7(%arg0: i32) -> (i32, i32) {
    %c0_i32 = arith.constant 0 : i32
    %c0_i32_0 = arith.constant 0 : i32
    %c0_i32_1 = arith.constant 0 : i32
    return %c0_i32, %c0_i32_0 : i32, i32
  }
  func.func @transform_8(%arg0: i32) -> (i32, i32) {
    %c0_i32 = arith.constant 0 : i32
    %c0_i32_0 = arith.constant 0 : i32
    %c0_i32_1 = arith.constant 0 : i32
    return %c0_i32, %c0_i32_0 : i32, i32
  }
  func.func @transform_9(%arg0: i32) -> (i32, i32) {
    %c0_i32 = arith.constant 0 : i32
    %c0_i32_0 = arith.constant 0 : i32
    %c0_i32_1 = arith.constant 0 : i32
    return %c0_i32, %c0_i32_0 : i32, i32
  }
}

</mosaic_0001>

<bundles_post_ra>
// kernel: msggan_dis_final_block.1
= control target key start
LH: loop header
LB: loop body
LE: loop exit
PB: predicated region body
PF: predicated region fallthrough
CT: control target
= control target key end

     0   :  { %vm88_vm0 = vcmask 1041408   ;;  %v2233_v3 = vmov 0   ;;  %vm84_vm1 = vcmask 31744   ;;  %s2852_s2 = inlined_call_operand.vmem [shape: bf16[9,4,4], index: 2, kind: input, shape index: {}]   ;;  %s2853_s1 = inlined_call_operand.<no memory space> [shape: f32[1,1], index: 1, kind: input, shape index: {}]   ;;  %s2854_s0 = inlined_call_operand.vmem [shape: bf16[32,4], index: 0, kind: input, shape index: {}]   ;;  %s2855_s3 = inlined_call_operand.vmem [shape: f32[1,4], index: 3, kind: input, shape index: {}]   ;;  %s2856_s5 = inlined_call_operand.vmem [shape: bf16[16,4,4], index: 5, kind: input, shape index: {}]   ;;  %s2857_s4 = inlined_call_operand.vmem [shape: f32[16,4], index: 4, kind: input, shape index: {}]   ;;  %s2858_s6 = inlined_call_operand.vmem [shape: f32[1,4], index: 6, kind: input, shape index: {}]   ;;  %s2859_s7 = inlined_call_operand.vmem [shape: f32[4,1], index: 7, kind: input, shape index: {}]   ;;  %s2860_s8 = inlined_call_operand.<no memory space> [shape: f32[1,1], index: 8, kind: input, shape index: {}]   ;;  %s2861_s9 = inlined_call_operand.vmem [shape: f32[2,1], index: 9, kind: output, shape index: {}]  }
   0x1   :  { %v2085_v0 = vld [vmem:[%s2852_s2 + $0x8] sm:$0x3]  ;;  %v2089_v1 = vld [vmem:[%s2852_s2 + $0xe] sm:$0x3]  ;;  %v2086_v2 = vld [vmem:[%s2852_s2 + $0xa] sm:$0x3]  ;;  %2228 = vset.pattern.permute.xlu0 %v2233_v3  ;;  %v14_v8 = vstv %s2853_s1 }
   0x2   :  { %v2295_v4 = vsel %vm88_vm0, %v2085_v0, 0  ;;  %v2298_v5 = vsel %vm88_vm0, %v2089_v1, 0  ;;  %v2301_v6 = vsel %vm88_vm0, %v2086_v2, 0  ;;  %v2091_v7 = vld [vmem:[%s2852_s2 + $0x10] sm:$0x3]  ;;  %v45_v35 = vld [vmem:[%s2857_s4 + $0x8] sm:$0xff] }
   0x3   :  { %118 = vmatpush.bf16.msra.mxu1 %v2295_v4  ;;  %139 = vmatpush.bf16.msra.mxu2 %v2298_v5  ;;  %v2312_v9 = vsel %vm88_vm0, %v2091_v7, 0  ;;  %v2317_v10 = vld [vmem:[%s2854_s0] sm:$0x1]  ;;  %v2322_v11 = vld [vmem:[%s2854_s0 + $0x4] sm:$0x1] }
   0x4   :  { %99 = vmatpush.bf16.msra.mxu0 %v2301_v6  ;;  %165 = vmatpush.bf16.msra.mxu3 %v2312_v9  ;;  %v61_v12 = vld [vmem:[%s2854_s0] sm:$0x2]  ;;  %v65_v13 = vld [vmem:[%s2854_s0 + $0x4] sm:$0x2]  ;;  %v2093_v14 = vld [vmem:[%s2852_s2 + $0x6] sm:$0x3] }
   0x5   :  { %v81_v15 = vunpack.c.l.b16 %v61_v12  ;;  %v149_v16 = vunpack.c.l.b16 %v65_v13  ;;  %v2337_v17 = vsel %vm88_vm0, %v2093_v14, 0  ;;  %v2097_v18 = vld [vmem:[%s2852_s2 + $0xc] sm:$0x3]  ;;  %15 = vst [vmem:[#allocation3] sm:$0x1] %v14_v8  ;;  %v44_v40 = vld [vmem:[%s2857_s4] sm:$0xff] }
   0x6   :  { %2088 = vmatmul.msk.bf16.vlgmr.msra.gmra.mxu1 %vm84_vm1, %v2317_v10  ;;  %2090 = vmatmul.msk.bf16.vlgmr.msra.gmra.mxu2 %vm84_vm1, %v2322_v11  ;;  %v2348_v19 = vsel %vm88_vm0, %v2097_v18, 0  ;;  %v62_v22 = vld [vmem:[%s2854_s0] sm:$0x4]  ;;  %v66_v29 = vld [vmem:[%s2854_s0 + $0x4] sm:$0x4] }
   0x7   :  { %224 = vmatpush.bf16.msrb.mxu2 %v2301_v6  ;;  %v82_v20 = vpack.c.b16 %v81_v15, %v81_v15  ;;  %v150_v21 = vpack.c.b16 %v149_v16, %v149_v16  ;;  %204 = vmatpush.bf16.msrb.mxu1 %v2337_v17  ;;  %v211_v25 = vunpack.c.l.b16 %v62_v22  ;;  %v265_v30 = vunpack.c.l.b16 %v66_v29  ;;  %v178_v33 = vld [vmem:[%s2856_s5] sm:$0x3]  ;;  %v2101_v39 = vld [vmem:[%s2856_s5 + $0x2] sm:$0x3]  ;;  %v67_v8 = vld [vmem:[%s2854_s0 + $0x4] sm:$0x8] }
   0x8   :  { %188 = vmatpush.bf16.msrb.mxu0 %v2295_v4  ;;  %243 = vmatpush.bf16.msrb.mxu3 %v2348_v19  ;;  %v316_v34 = vsel %vm88_vm0, %v178_v33, 0  ;;  %v2230_v37 = vld [vmem:[%s2855_s3] ss:$0 sm:$0xff]  ;;  %v297_v41 = vsel %vm88_vm0, %v2101_v39, 0  ;;  %v407_v12 = vunpack.c.l.b16 %v67_v8  ;;  %v63_v29 = vld [vmem:[%s2854_s0] sm:$0x8] }
   0x9   :  { %v2356_v23 = vrot.slane %v82_v20, 1  ;;  %v2358_v24 = vrot.slane %v150_v21, 1  ;;  %v212_v27 = vpack.c.b16 %v211_v25, %v211_v25  ;;  %v266_v31 = vpack.c.b16 %v265_v30, %v265_v30 }
   0xa   :  { %v408_v15 = vpack.c.b16 %v407_v12, %v407_v12 }
   0xb   :  { %278 = vmatpush.bf16.msra.mxu1 %v2312_v9  ;;  %2087 = vmatmul.msk.bf16.vlgmr.msra.gmra.mxu0 %vm84_vm1, %v2356_v23  ;;  %v2365_v28 = vrot.slane %v212_v27, 2  ;;  %v2380_v32 = vrot.slane %v266_v31, 2  ;;  %v358_v31 = vunpack.c.l.b16 %v63_v29 }
   0xc   :  { %2092 = vmatmul.msk.bf16.vlgmr.msra.gmra.mxu3 %vm84_vm1, %v2358_v24  ;;  %v2229_v26 = vld [vmem:[#allocation3] ss:$0 sm:$0xff]  ;;  %257 = vmatpush.bf16.msra.mxu0 %v2298_v5  ;;  %v2427_v18 = vrot.slane %v408_v15, 3  ;;  %v2116_v15 = vld [vmem:[%s2856_s5 + $0x6] sm:$0x3] }
   0xd   :  { %49 = vperm.xlu0 %2228, %v2229_v26   ;;  %325 = vmatpush.bf16.msra.mxu3 %v316_v34 }
   0xe   :  { %306 = vmatpush.bf16.msra.mxu2 %v297_v41 }
  0x16   :  { %2095 = vmatmul.msk.bf16.vlgmr.msrb.gmra.mxu1 %vm84_vm1, %v2317_v10  ;;  %2096 = vmatmul.msk.bf16.vlgmr.msrb.gmra.mxu2 %vm84_vm1, %v2365_v28 }
  0x17   :  { %351 = vmatpush.bf16.msrb.mxu1 %v2337_v17  ;;  %371 = vmatpush.bf16.msrb.mxu2 %v2301_v6 }
  0x1b   :  { %2094 = vmatmul.msk.bf16.vlgmr.msrb.gmra.mxu0 %vm84_vm1, %v2356_v23 }
  0x1c   :  { %2098 = vmatmul.msk.bf16.vlgmr.msrb.gmra.mxu3 %vm84_vm1, %v2322_v11  ;;  %338 = vmatpush.bf16.msrb.mxu0 %v2295_v4 }
  0x1d   :  { %385 = vmatpush.bf16.msrb.mxu3 %v2348_v19 }
  0x26   :  { %2100 = vmatmul.msk.bf16.vlgmr.msra.gmra.mxu1 %vm84_vm1, %v2380_v32 }
  0x27   :  { %420 = vmatpush.bf16.msra.mxu1 %v2312_v9 }
  0x2b   :  { %2099 = vmatmul.msk.bf16.vlgmr.msra.gmra.mxu0 %vm84_vm1, %v2358_v24 }
  0x2c   :  { %399 = vmatpush.bf16.msra.mxu0 %v2298_v5 }
  0x36   :  { %2105 = vmatmul.msk.bf16.vlgmr.msrb.gmra.mxu1 %vm84_vm1, %v2356_v23 }
  0x37   :  { %488 = vmatpush.bf16.msrb.mxu1 %v2348_v19 }
  0x3b   :  { %2104 = vmatmul.msk.bf16.vlgmr.msrb.gmra.mxu0 %vm84_vm1, %v2365_v28 }
  0x3c   :  { %475 = vmatpush.bf16.msrb.mxu0 %v2337_v17 }
  0x46   :  { %2109 = vmatmul.msk.bf16.vlgmr.msra.gmra.mxu1 %vm84_vm1, %v2427_v18 }
  0x4b   :  { %2108 = vmatmul.msk.bf16.vlgmr.msra.gmra.mxu0 %vm84_vm1, %v2380_v32 }
  0x56   :  { %2114 = vmatmul.msk.bf16.vlgmr.msrb.gmra.mxu1 %vm84_vm1, %v2380_v32 }
  0x5b   :  { %2113 = vmatmul.msk.bf16.vlgmr.msrb.gmra.mxu0 %vm84_vm1, %v2365_v28 }
  0x7f   :  { %v50_v36 = vpop.permute.xlu0 %49 }
  0x80   :  { %v53_v38 = vmul.f32 %v50_v36, %v45_v35  ;;  %v52_v44 = vmul.f32 %v50_v36, %v44_v40 }
  0x82   :  { %v2416_v43 = vadd.f32 %v2230_v37, %v53_v38  ;;  %v2419_v47 = vadd.f32 %v2230_v37, %v52_v44  ;;  %v359_v37 = vpack.c.b16 %v358_v31, %v358_v31 }
  0x83   :  { %v120_v42 = vpop.f32.mrf.mxu1 }
  0x84   :  { %v172_v51 = vperm.slane %v2419_v47, 0  ;;  %v285_v25 = vperm.slane %v2419_v47, 1  ;;  %v2438_v38 = vrot.slane %v359_v37, 3 }
  0x88   :  { %v101_v45 = vpop.f32.mrf.mxu0 }
  0x89   :  { %v121_v46 = vadd.f32 %v120_v42, %v101_v45  ;;  %v141_v48 = vpop.f32.mrf.mxu2 }
  0x8b   :  { %v145_v49 = vadd.f32 %v141_v48, %v121_v46  ;;  %v122_v50 = vpop.f32.mrf.mxu1 }
  0x8f   :  { %v167_v52 = vpop.f32.mrf.mxu3 }
  0x90   :  { %v171_v53 = vadd.f32 %v167_v52, %v145_v49  ;;  %v103_v54 = vpop.f32.mrf.mxu0 }
  0x91   :  { %v143_v56 = vpop.f32.mrf.mxu2 }
  0x92   :  { %v173_v55 = vadd.f32 %v172_v51, %v171_v53  ;;  %v2110_v53 = vld [vmem:[%s2856_s5 + $0x4] sm:$0x3] }
  0x93   :  { %v206_v58 = vpop.f32.mrf.mxu1  ;;  %v439_v54 = vsel %vm88_vm0, %v2110_v53, 0 }
  0x94   :  { %vm174_vm2 = vcmp.gt.f32.partialorder %v173_v55, 0.0  ;;  %v175_v57 = vmul.f32 0.2, %v173_v55 }
  0x96   :  { %v176_v59 = vsel %vm174_vm2, %v173_v55, %v175_v57 }
  0x97   :  { %v177_v60 = vpack.c.bf16 %v176_v59, %v176_v59  ;;  %v169_v61 = vpop.f32.mrf.mxu3 }
  0x98   :  { %v190_v62 = vpop.f32.mrf.mxu0 }
  0x99   :  { %2103 = vmatmul.msk.bf16.vlgmr.msra.gmra.mxu3 %vm84_vm1, %v177_v60  ;;  %v226_v63 = vpop.f32.mrf.mxu2  ;;  %v207_v3 = vadd.f32 %v206_v58, %v190_v62 }
  0x9a   :  { %462 = vmatpush.bf16.msra.mxu3 %v2295_v4 }
  0x9b   :  { %v208_v0 = vpop.f32.mrf.mxu1  ;;  %v230_v13 = vadd.f32 %v226_v63, %v207_v3 }
  0x9c   :  { %v427_v0 = vperm.slane %v2419_v47, 2 }
  0x9f   :  { %v245_v1 = vpop.f32.mrf.mxu3 }
  0xa0   :  { %v192_v2 = vpop.f32.mrf.mxu0  ;;  %v249_v20 = vadd.f32 %v245_v1, %v230_v13 }
  0xa1   :  { %v228_v7 = vpop.f32.mrf.mxu2 }
  0xa3   :  { %v280_v14 = vpop.f32.mrf.mxu1 }
  0xa7   :  { %v247_v16 = vpop.f32.mrf.mxu3 }
  0xa8   :  { %v259_v21 = vpop.f32.mrf.mxu0  ;;  %v521_v16 = vsel %vm88_vm0, %v2116_v15, 0 }
  0xa9   :  { %2107 = vmatmul.msk.bf16.vlgmr.msrb.gmra.mxu3 %vm84_vm1, %v2358_v24  ;;  %v263_v22 = vadd.f32 %v259_v21, %v249_v20 }
  0xaa   :  { %530 = vmatpush.bf16.msrb.mxu3 %v521_v16 }
  0xab   :  { %v284_v26 = vadd.f32 %v280_v14, %v263_v22  ;;  %v282_v27 = vpop.f32.mrf.mxu1 }
  0xac   :  { %v2118_v27 = vld [vmem:[%s2852_s2 + $0x2] sm:$0x3] }
  0xad   :  { %v286_v30 = vadd.f32 %v285_v25, %v284_v26  ;;  %v2119_v25 = vld [vmem:[%s2852_s2 + $0x4] sm:$0x3]  ;;  %v2474_v29 = vsel %vm88_vm0, %v2118_v27, 0 }
  0xae   :  { %v2467_v26 = vsel %vm88_vm0, %v2119_v25, 0  ;;  %567 = vmatpush.bf16.msra.mxu1 %v2474_v29 }
  0xaf   :  { %vm287_vm3 = vcmp.gt.f32.partialorder %v286_v30, 0.0  ;;  %v288_v33 = vmul.f32 0.2, %v286_v30  ;;  %551 = vmatpush.bf16.msra.mxu0 %v2467_v26 }
  0xb0   :  { %v261_v34 = vpop.f32.mrf.mxu0 }
  0xb1   :  { %v289_v35 = vsel %vm287_vm3, %v286_v30, %v288_v33  ;;  %2121 = vmatmul.msk.bf16.vlgmr.msra.gmra.mxu1 %vm84_vm1, %v2317_v10  ;;  %v69_v33 = vld [vmem:[%s2854_s0 + $0x8] sm:$0x2]  ;;  %vm41_vm3 = vcmask 25600  }
  0xb2   :  { %v290_v36 = vpack.c.bf16 %v289_v35, %v289_v35  ;;  %2120 = vmatmul.msk.bf16.vlgmr.msra.gmra.mxu0 %vm84_vm1, %v2356_v23  ;;  %632 = vmatpush.bf16.msrb.mxu1 %v2312_v9  ;;  %v619_v34 = vunpack.c.l.b16 %v69_v33 }
  0xb3   :  { %v353_v40 = vpop.f32.mrf.mxu1  ;;  %611 = vmatpush.bf16.msrb.mxu0 %v2298_v5 }
  0xb4   :  { %2102 = vmatmul.msk.bf16.vlgmr.msra.gmra.mxu2 %vm84_vm1, %v290_v36  ;;  %v620_v36 = vpack.c.b16 %v619_v34, %v619_v34 }
  0xb5   :  { %448 = vmatpush.bf16.msra.mxu2 %v439_v54 }
  0xb6   :  { %704 = vmatpush.bf16.msra.mxu1 %v2467_v26 }
  0xb8   :  { %v340_v39 = vpop.f32.mrf.mxu0 }
  0xb9   :  { %2112 = vmatmul.msk.bf16.vlgmr.msra.gmra.mxu3 %vm84_vm1, %v2438_v38  ;;  %v354_v41 = vadd.f32 %v353_v40, %v340_v39  ;;  %v2490_v39 = vld [vmem:[%s2854_s0 + $0x8] sm:$0x1]  ;;  %v2494_v40 = vrot.slane %v620_v36, 1 }
  0xba   :  { %594 = vmatpush.bf16.msra.mxu3 %v2301_v6 }
  0xbb   :  { %v355_v44 = vpop.f32.mrf.mxu1 }
  0xc0   :  { %v342_v42 = vpop.f32.mrf.mxu0 }
  0xc1   :  { %2125 = vmatmul.msk.bf16.vlgmr.msrb.gmra.mxu1 %vm84_vm1, %v2494_v40 }
  0xc2   :  { %2124 = vmatmul.msk.bf16.vlgmr.msrb.gmra.mxu0 %vm84_vm1, %v2490_v39  ;;  %760 = vmatpush.bf16.msrb.mxu1 %v2348_v19 }
  0xc3   :  { %v422_v49 = vpop.f32.mrf.mxu1 }
  0xc4   :  { %2106 = vmatmul.msk.bf16.vlgmr.msrb.gmra.mxu2 %vm84_vm1, %v2438_v38 }
  0xc5   :  { %502 = vmatpush.bf16.msrb.mxu2 %v2298_v5 }
  0xc8   :  { %v401_v46 = vpop.f32.mrf.mxu0 }
  0xcb   :  { %v424_v52 = vpop.f32.mrf.mxu1 }
  0xd0   :  { %v403_v50 = vpop.f32.mrf.mxu0 }
  0xd1   :  { %2130 = vmatmul.msk.bf16.vlgmr.msra.gmra.mxu1 %vm84_vm1, %v2365_v28 }
  0xd2   :  { %837 = vmatpush.bf16.msra.mxu1 %v2474_v29 }
  0xd3   :  { %v490_v14 = vpop.f32.mrf.mxu1 }
  0xd8   :  { %v477_v13 = vpop.f32.mrf.mxu0 }
  0xdb   :  { %v492_v22 = vpop.f32.mrf.mxu1 }
  0xe0   :  { %v479_v21 = vpop.f32.mrf.mxu0 }
  0xe1   :  { %2134 = vmatmul.msk.bf16.vlgmr.msrb.gmra.mxu1 %vm84_vm1, %v2490_v39 }
  0xe2   :  { %891 = vmatpush.bf16.msrb.mxu1 %v2295_v4 }
  0xf1   :  { %2139 = vmatmul.msk.bf16.vlgmr.msra.gmra.mxu1 %vm84_vm1, %v2365_v28 }
  0xf2   :  { %954 = vmatpush.bf16.msra.mxu1 %v2312_v9 }
 0x101   :  { %2143 = vmatmul.msk.bf16.vlgmr.msrb.gmra.mxu1 %vm84_vm1, %v2380_v32 }
 0x102   :  { %1022 = vmatpush.bf16.msrb.mxu1 %v2337_v17 }
 0x11c   :  { %v327_v45 = vpop.f32.mrf.mxu3 }
 0x124   :  { %v329_v48 = vpop.f32.mrf.mxu3 }
 0x12c   :  { %v387_v51 = vpop.f32.mrf.mxu3 }
 0x12e   :  { %v569_v53 = vpop.f32.mrf.mxu1 }
 0x12f   :  { %v553_v52 = vpop.f32.mrf.mxu0 }
 0x134   :  { %v389_v55 = vpop.f32.mrf.mxu3 }
 0x137   :  { %v308_v56 = vpop.f32.mrf.mxu2  ;;  %v555_v55 = vpop.f32.mrf.mxu0 }
 0x138   :  { %v328_v57 = vadd.f32 %v327_v45, %v308_v56  ;;  %v509_v45 = vperm.slane %v2419_v47, 3  ;;  %v571_v56 = vpop.f32.mrf.mxu1 }
 0x13c   :  { %v464_v12 = vpop.f32.mrf.mxu3 }
 0x13d   :  { %v478_v37 = vadd.f32 %v477_v13, %v464_v12  ;;  %v70_v12 = vld [vmem:[%s2854_s0 + $0x8] sm:$0x4] }
 0x13f   :  { %v310_v58 = vpop.f32.mrf.mxu2 }
 0x144   :  { %v466_v20 = vpop.f32.mrf.mxu3 }
 0x147   :  { %v373_v59 = vpop.f32.mrf.mxu2 }
 0x148   :  { %v377_v60 = vadd.f32 %v373_v59, %v354_v41  ;;  %v494_v41 = vadd.f32 %v490_v14, %v478_v37  ;;  %v782_v14 = vunpack.c.l.b16 %v70_v12 }
 0x14a   :  { %v391_v61 = vadd.f32 %v387_v51, %v377_v60  ;;  %v613_v60 = vpop.f32.mrf.mxu0  ;;  %v783_v20 = vpack.c.b16 %v782_v14, %v782_v14 }
 0x14c   :  { %v405_v62 = vadd.f32 %v401_v46, %v391_v61  ;;  %v634_v61 = vpop.f32.mrf.mxu1  ;;  %v2543_v22 = vrot.slane %v783_v20, 2 }
 0x14e   :  { %v426_v63 = vadd.f32 %v422_v49, %v405_v62 }
 0x14f   :  { %v375_v1 = vpop.f32.mrf.mxu2 }
 0x150   :  { %v428_v2 = vadd.f32 %v427_v0, %v426_v63  ;;  %v667_v0 = vld [vmem:[%s2852_s2] sm:$0x3] }
 0x151   :  { %v2532_v1 = vsel %vm88_vm0, %v667_v0, 0  ;;  %v71_v0 = vld [vmem:[%s2854_s0 + $0x8] sm:$0x8] }
 0x152   :  { %vm429_vm4 = vcmp.gt.f32.partialorder %v428_v2, 0.0  ;;  %v430_v3 = vmul.f32 0.2, %v428_v2  ;;  %v615_v62 = vpop.f32.mrf.mxu0  ;;  %691 = vmatpush.bf16.msra.mxu0 %v2532_v1 }
 0x154   :  { %v431_v7 = vsel %vm429_vm4, %v428_v2, %v430_v3  ;;  %v636_v63 = vpop.f32.mrf.mxu1 }
 0x155   :  { %v432_v8 = vpack.c.bf16 %v431_v7, %v431_v7  ;;  %2129 = vmatmul.msk.bf16.vlgmr.msra.gmra.mxu0 %vm84_vm1, %v2317_v10  ;;  %v639_v10 = vperm.slane %v2419_v47, 4 }
 0x156   :  { %746 = vmatpush.bf16.msrb.mxu0 %v2301_v6 }
 0x157   :  { %2111 = vmatmul.msk.bf16.vlgmr.msra.gmra.mxu2 %vm84_vm1, %v432_v8  ;;  %v570_v8 = vadd.f32 %v569_v53, %v553_v52 }
 0x158   :  { %580 = vmatpush.bf16.msra.mxu2 %v2295_v4 }
 0x165   :  { %2133 = vmatmul.msk.bf16.vlgmr.msrb.gmra.mxu0 %vm84_vm1, %v2380_v32 }
 0x167   :  { %2115 = vmatmul.msk.bf16.vlgmr.msrb.gmra.mxu2 %vm84_vm1, %v2427_v18 }
 0x177   :  { %2122 = vmatmul.msk.bf16.vlgmr.msra.gmra.mxu2 %vm84_vm1, %v2322_v11 }
 0x1d2   :  { %v693_v37 = vpop.f32.mrf.mxu0 }
 0x1da   :  { %v450_v30 = vpop.f32.mrf.mxu2 }
 0x1db   :  { %v454_v31 = vadd.f32 %v450_v30, %v328_v57  ;;  %v2126_v57 = vld [vmem:[%s2856_s5 + $0x8] sm:$0x3] }
 0x1dc   :  { %v651_v59 = vsel %vm88_vm0, %v2126_v57, 0 }
 0x1dd   :  { %660 = vmatpush.bf16.msrb.mxu2 %v651_v59 }
 0x1e1   :  { %718 = vmatpush.bf16.msra.mxu2 %v2337_v17 }
 0x1e2   :  { %v452_v35 = vpop.f32.mrf.mxu2 }
 0x1ea   :  { %v504_v42 = vpop.f32.mrf.mxu2 }
 0x1eb   :  { %v508_v44 = vadd.f32 %v504_v42, %v494_v41  ;;  %v695_v42 = vpop.f32.mrf.mxu0 }
 0x1ed   :  { %v510_v46 = vadd.f32 %v509_v45, %v508_v44 }
 0x1ef   :  { %vm511_vm5 = vcmp.gt.f32.partialorder %v510_v46, 0.0  ;;  %v512_v48 = vmul.f32 0.2, %v510_v46 }
 0x1f1   :  { %v513_v49 = vsel %vm511_vm5, %v510_v46, %v512_v48 }
 0x1f2   :  { %v514_v50 = vpack.c.bf16 %v513_v49, %v513_v49  ;;  %v506_v51 = vpop.f32.mrf.mxu2  ;;  %v2137_v49 = vld [vmem:[%s2856_s5 + $0xa] sm:$0x3] }
 0x1f4   :  { %2117 = vmatmul.msk.bf16.vlgmr.msrb.gmra.mxu3 %vm84_vm1, %v514_v50  ;;  %v814_v50 = vsel %vm88_vm0, %v2137_v49, 0 }
 0x1f5   :  { %675 = vmatpush.bf16.msrb.mxu3 %v2474_v29  ;;  %823 = vmatpush.bf16.msra.mxu0 %v814_v50 }
 0x1f9   :  { %877 = vmatpush.bf16.msrb.mxu0 %v2337_v17 }
 0x1fa   :  { %v582_v54 = vpop.f32.mrf.mxu2 }
 0x1fb   :  { %v586_v13 = vadd.f32 %v582_v54, %v570_v8 }
 0x202   :  { %v584_v58 = vpop.f32.mrf.mxu2 }
 0x204   :  { %2123 = vmatmul.msk.bf16.vlgmr.msra.gmra.mxu3 %vm84_vm1, %v2358_v24 }
 0x205   :  { %732 = vmatpush.bf16.msra.mxu3 %v2295_v4 }
 0x214   :  { %2128 = vmatmul.msk.bf16.vlgmr.msrb.gmra.mxu3 %vm84_vm1, %v2356_v23 }
 0x215   :  { %795 = vmatpush.bf16.msrb.mxu3 %v2312_v9 }
 0x224   :  { %2132 = vmatmul.msk.bf16.vlgmr.msra.gmra.mxu3 %vm84_vm1, %v2358_v24 }
 0x225   :  { %863 = vmatpush.bf16.msra.mxu3 %v2467_v26 }
 0x234   :  { %2136 = vmatmul.msk.bf16.vlgmr.msrb.gmra.mxu3 %vm84_vm1, %v2543_v22 }
 0x235   :  { %919 = vmatpush.bf16.msrb.mxu3 %v2348_v19 }
 0x244   :  { %2141 = vmatmul.msk.bf16.vlgmr.msra.gmra.mxu3 %vm84_vm1, %v2438_v38 }
 0x245   :  { %996 = vmatpush.bf16.msra.mxu3 %v2474_v29 }
 0x254   :  { %2145 = vmatmul.msk.bf16.vlgmr.msrb.gmra.mxu3 %vm84_vm1, %v2494_v40 }
 0x255   :  { %1050 = vmatpush.bf16.msrb.mxu3 %v2348_v19 }
 0x264   :  { %2150 = vmatmul.msk.bf16.vlgmr.msra.gmra.mxu3 %vm84_vm1, %v2438_v38  ;;  %v706_v38 = vpop.f32.mrf.mxu1 }
 0x265   :  { %1119 = vmatpush.bf16.msra.mxu3 %v2474_v29 }
 0x26c   :  { %v708_v44 = vpop.f32.mrf.mxu1 }
 0x274   :  { %2154 = vmatmul.msk.bf16.vlgmr.msrb.gmra.mxu3 %vm84_vm1, %v2543_v22  ;;  %v762_v46 = vpop.f32.mrf.mxu1 }
 0x275   :  { %1184 = vmatpush.bf16.msrb.mxu3 %v2312_v9 }
 0x277   :  { %v532_v2 = vpop.f32.mrf.mxu3 }
 0x278   :  { %v536_v3 = vadd.f32 %v532_v2, %v454_v31  ;;  %v941_v2 = vunpack.c.l.b16 %v71_v0  ;;  %v961_v0 = vperm.slane %v2419_v47, 6 }
 0x27a   :  { %v942_v8 = vpack.c.b16 %v941_v2, %v941_v2 }
 0x27c   :  { %v764_v52 = vpop.f32.mrf.mxu1  ;;  %v2584_v14 = vrot.slane %v942_v8, 3 }
 0x27e   :  { %2147 = vmatmul.msk.bf16.vlgmr.msra.gmra.mxu1 %vm84_vm1, %v2584_v14 }
 0x27f   :  { %v534_v7 = vpop.f32.mrf.mxu3 }
 0x284   :  { %2159 = vmatmul.msk.bf16.vlgmr.msra.gmra.mxu3 %vm84_vm1, %v2322_v11 }
 0x285   :  { %1252 = vmatpush.bf16.msra.mxu3 %v2467_v26 }
 0x287   :  { %v596_v15 = vpop.f32.mrf.mxu3 }
 0x288   :  { %v600_v16 = vadd.f32 %v596_v15, %v586_v13  ;;  %v802_v15 = vperm.slane %v2419_v47, 5 }
 0x28a   :  { %v617_v21 = vadd.f32 %v613_v60, %v600_v16 }
 0x28c   :  { %v638_v25 = vadd.f32 %v634_v61, %v617_v21 }
 0x28e   :  { %v640_v27 = vadd.f32 %v639_v10, %v638_v25  ;;  %2152 = vmatmul.msk.bf16.vlgmr.msrb.gmra.mxu1 %vm84_vm1, %v2380_v32 }
 0x28f   :  { %v598_v30 = vpop.f32.mrf.mxu3 }
 0x290   :  { %vm641_vm6 = vcmp.gt.f32.partialorder %v640_v27, 0.0  ;;  %v642_v31 = vmul.f32 0.2, %v640_v27 }
 0x292   :  { %v643_v33 = vsel %vm641_vm6, %v640_v27, %v642_v31  ;;  %v839_v27 = vpop.f32.mrf.mxu1  ;;  %vm2079_vm6 = vcmask 1024  }
 0x293   :  { %v644_v34 = vpack.c.bf16 %v643_v33, %v643_v33 }
 0x295   :  { %2127 = vmatmul.msk.bf16.vlgmr.msrb.gmra.mxu2 %vm84_vm1, %v644_v34 }
 0x296   :  { %774 = vmatpush.bf16.msrb.mxu2 %v2298_v5 }
 0x297   :  { %v677_v35 = vpop.f32.mrf.mxu3 }
 0x298   :  { %v694_v57 = vadd.f32 %v693_v37, %v677_v35 }
 0x29a   :  { %v710_v59 = vadd.f32 %v706_v38, %v694_v57  ;;  %v841_v30 = vpop.f32.mrf.mxu1 }
 0x29f   :  { %v679_v36 = vpop.f32.mrf.mxu3 }
 0x2a2   :  { %v893_v34 = vpop.f32.mrf.mxu1 }
 0x2a5   :  { %2131 = vmatmul.msk.bf16.vlgmr.msra.gmra.mxu2 %vm84_vm1, %v2322_v11 }
 0x2a6   :  { %850 = vmatpush.bf16.msra.mxu2 %v2532_v1 }
 0x2a7   :  { %v734_v41 = vpop.f32.mrf.mxu3 }
 0x2aa   :  { %v895_v37 = vpop.f32.mrf.mxu1 }
 0x2af   :  { %v736_v45 = vpop.f32.mrf.mxu3 }
 0x2b5   :  { %2135 = vmatmul.msk.bf16.vlgmr.msrb.gmra.mxu2 %vm84_vm1, %v2494_v40 }
 0x2b6   :  { %905 = vmatpush.bf16.msrb.mxu2 %v2301_v6 }
 0x2b7   :  { %v797_v48 = vpop.f32.mrf.mxu3 }
 0x2bf   :  { %v799_v54 = vpop.f32.mrf.mxu3 }
 0x2c5   :  { %2140 = vmatmul.msk.bf16.vlgmr.msra.gmra.mxu2 %vm84_vm1, %v2356_v23  ;;  %v748_v23 = vpop.f32.mrf.mxu0 }
 0x2c7   :  { %v865_v33 = vpop.f32.mrf.mxu3 }
 0x2cd   :  { %v750_v51 = vpop.f32.mrf.mxu0 }
 0x2cf   :  { %v867_v36 = vpop.f32.mrf.mxu3 }
 0x2d5   :  { %2144 = vmatmul.msk.bf16.vlgmr.msrb.gmra.mxu2 %vm84_vm1, %v2427_v18 }
 0x2fb   :  { %v956_v42 = vpop.f32.mrf.mxu1 }
 0x318   :  { %v662_v53 = vpop.f32.mrf.mxu2 }
 0x319   :  { %v666_v55 = vadd.f32 %v662_v53, %v536_v3 }
 0x320   :  { %v664_v56 = vpop.f32.mrf.mxu2 }
 0x328   :  { %v720_v58 = vpop.f32.mrf.mxu2 }
 0x329   :  { %v724_v60 = vadd.f32 %v720_v58, %v710_v59 }
 0x32b   :  { %v738_v61 = vadd.f32 %v734_v41, %v724_v60  ;;  %v921_v41 = vpop.f32.mrf.mxu3 }
 0x32d   :  { %v752_v63 = vadd.f32 %v748_v23, %v738_v61 }
 0x32f   :  { %v766_v7 = vadd.f32 %v762_v46, %v752_v63 }
 0x330   :  { %v722_v62 = vpop.f32.mrf.mxu2 }
 0x333   :  { %v923_v23 = vpop.f32.mrf.mxu3 }
 0x338   :  { %v776_v12 = vpop.f32.mrf.mxu2 }
 0x339   :  { %v780_v13 = vadd.f32 %v776_v12, %v766_v7 }
 0x33b   :  { %v801_v3 = vadd.f32 %v797_v48, %v780_v13  ;;  %v958_v48 = vpop.f32.mrf.mxu1  ;;  %v998_v59 = vpop.f32.mrf.mxu3 }
 0x33d   :  { %v803_v16 = vadd.f32 %v802_v15, %v801_v3 }
 0x33f   :  { %vm804_vm7 = vcmp.gt.f32.partialorder %v803_v16, 0.0  ;;  %v805_v20 = vmul.f32 0.2, %v803_v16 }
 0x340   :  { %v778_v21 = vpop.f32.mrf.mxu2 }
 0x341   :  { %v806_v25 = vsel %vm804_vm7, %v803_v16, %v805_v20 }
 0x342   :  { %v807_v10 = vpack.c.bf16 %v806_v25, %v806_v25 }
 0x343   :  { %v1000_v2 = vpop.f32.mrf.mxu3  ;;  %v1024_v20 = vpop.f32.mrf.mxu1 }
 0x344   :  { %2138 = vmatmul.msk.bf16.vlgmr.msra.gmra.mxu0 %vm84_vm1, %v807_v10  ;;  %v2156_v10 = vld [vmem:[%s2856_s5 + $0xe] sm:$0x3] }
 0x345   :  { %933 = vmatpush.bf16.msra.mxu0 %v2298_v5  ;;  %v1083_v30 = vsel %vm88_vm0, %v2156_v10, 0 }
 0x346   :  { %1092 = vmatpush.bf16.msra.mxu1 %v1083_v30 }
 0x348   :  { %v852_v31 = vpop.f32.mrf.mxu2 }
 0x349   :  { %v853_v51 = vadd.f32 %v852_v31, %v839_v27 }
 0x34a   :  { %1146 = vmatpush.bf16.msrb.mxu1 %v2301_v6 }
 0x34b   :  { %v869_v53 = vadd.f32 %v865_v33, %v853_v51  ;;  %v1052_v21 = vpop.f32.mrf.mxu3  ;;  %v1026_v27 = vpop.f32.mrf.mxu1 }
 0x34c   :  { %v1191_v27 = vperm.slane %v2416_v43, 0 }
 0x350   :  { %v854_v35 = vpop.f32.mrf.mxu2 }
 0x351   :  { %v2631_v35 = vld [vmem:[%s2854_s0 + $0xc] sm:$0x1] }
 0x353   :  { %v1054_v31 = vpop.f32.mrf.mxu3 }
 0x354   :  { %2142 = vmatmul.msk.bf16.vlgmr.msrb.gmra.mxu0 %vm84_vm1, %v2358_v24 }
 0x355   :  { %1009 = vmatpush.bf16.msrb.mxu0 %v2532_v1 }
 0x358   :  { %v907_v38 = vpop.f32.mrf.mxu2 }
 0x360   :  { %v909_v45 = vpop.f32.mrf.mxu2 }
 0x364   :  { %2146 = vmatmul.msk.bf16.vlgmr.msra.gmra.mxu0 %vm84_vm1, %v2543_v22 }
 0x365   :  { %1064 = vmatpush.bf16.msra.mxu0 %v2298_v5 }
 0x374   :  { %2151 = vmatmul.msk.bf16.vlgmr.msrb.gmra.mxu0 %vm84_vm1, %v2365_v28  ;;  %v2148_v28 = vld [vmem:[%s2856_s5 + $0xc] sm:$0x3] }
 0x375   :  { %1132 = vmatpush.bf16.msrb.mxu0 %v2295_v4  ;;  %v973_v44 = vsel %vm88_vm0, %v2148_v28, 0 }
 0x376   :  { %982 = vmatpush.bf16.msra.mxu2 %v973_v44  ;;  %v1121_v44 = vpop.f32.mrf.mxu3 }
 0x37a   :  { %1036 = vmatpush.bf16.msrb.mxu2 %v2295_v4 }
 0x37e   :  { %v1123_v51 = vpop.f32.mrf.mxu3 }
 0x384   :  { %2155 = vmatmul.msk.bf16.vlgmr.msra.gmra.mxu0 %vm84_vm1, %v2584_v14 }
 0x394   :  { %2160 = vmatmul.msk.bf16.vlgmr.msrb.gmra.mxu0 %vm84_vm1, %v2490_v39 }
 0x3c1   :  { %v825_v46 = vpop.f32.mrf.mxu0 }
 0x3c2   :  { %v829_v49 = vadd.f32 %v825_v46, %v666_v55 }
 0x3c9   :  { %v827_v50 = vpop.f32.mrf.mxu0 }
 0x3ca   :  { %v1071_v50 = vperm.slane %v2419_v47, 7 }
 0x3d1   :  { %v879_v52 = vpop.f32.mrf.mxu0 }
 0x3d2   :  { %v883_v54 = vadd.f32 %v879_v52, %v869_v53 }
 0x3d4   :  { %v897_v56 = vadd.f32 %v893_v34, %v883_v54  ;;  %v73_v34 = vld [vmem:[%s2854_s0 + $0xc] sm:$0x2] }
 0x3d5   :  { %v1171_v36 = vunpack.c.l.b16 %v73_v34 }
 0x3d6   :  { %v911_v58 = vadd.f32 %v907_v38, %v897_v56 }
 0x3d7   :  { %v1172_v38 = vpack.c.b16 %v1171_v36, %v1171_v36 }
 0x3d8   :  { %v925_v60 = vadd.f32 %v921_v41, %v911_v58 }
 0x3d9   :  { %v881_v57 = vpop.f32.mrf.mxu0 }
 0x3e1   :  { %v935_v61 = vpop.f32.mrf.mxu0 }
 0x3e2   :  { %v939_v62 = vadd.f32 %v935_v61, %v925_v60  ;;  %v2164_v61 = vld [vmem:[%s2856_s5 + $0x10] sm:$0x3] }
 0x3e4   :  { %v960_v63 = vadd.f32 %v956_v42, %v939_v62  ;;  %v2636_v42 = vrot.slane %v1172_v38, 1 }
 0x3e6   :  { %v962_v7 = vadd.f32 %v961_v0, %v960_v63  ;;  %2163 = vmatmul.msk.bf16.vlgmr.msrb.gmra.mxu3 %vm84_vm1, %v2636_v42  ;;  %v1203_v63 = vsel %vm88_vm0, %v2164_v61, 0 }
 0x3e7   :  { %1308 = vmatpush.bf16.msrb.mxu3 %v2348_v19  ;;  %1212 = vmatpush.bf16.msra.mxu0 %v1203_v63 }
 0x3e8   :  { %vm963_vm8 = vcmp.gt.f32.partialorder %v962_v7, 0.0  ;;  %v964_v8 = vmul.f32 0.2, %v962_v7 }
 0x3e9   :  { %v937_v55 = vpop.f32.mrf.mxu0 }
 0x3ea   :  { %v965_v12 = vsel %vm963_vm8, %v962_v7, %v964_v8 }
 0x3eb   :  { %v966_v13 = vpack.c.bf16 %v965_v12, %v965_v12  ;;  %1266 = vmatpush.bf16.msrb.mxu0 %v2337_v17  ;;  %v74_v12 = vld [vmem:[%s2854_s0 + $0xc] sm:$0x4] }
 0x3ed   :  { %2149 = vmatmul.msk.bf16.vlgmr.msra.gmra.mxu2 %vm84_vm1, %v966_v13 }
 0x3ee   :  { %1106 = vmatpush.bf16.msra.mxu2 %v2467_v26 }
 0x3f1   :  { %v1011_v3 = vpop.f32.mrf.mxu0 }
 0x3f2   :  { %v1012_v15 = vadd.f32 %v1011_v3, %v998_v59  ;;  %v1330_v3 = vunpack.c.l.b16 %v74_v12  ;;  %v1350_v12 = vperm.slane %v2416_v43, 1 }
 0x3f4   :  { %v1028_v45 = vadd.f32 %v1024_v20, %v1012_v15  ;;  %v1331_v20 = vpack.c.b16 %v1330_v3, %v1330_v3 }
 0x3f6   :  { %2168 = vmatmul.msk.bf16.vlgmr.msra.gmra.mxu3 %vm84_vm1, %v2380_v32 }
 0x3f7   :  { %1385 = vmatpush.bf16.msra.mxu3 %v2474_v29 }
 0x3f9   :  { %v1013_v16 = vpop.f32.mrf.mxu0 }
 0x3fd   :  { %2153 = vmatmul.msk.bf16.vlgmr.msrb.gmra.mxu2 %vm84_vm1, %v2427_v18 }
 0x3fe   :  { %1163 = vmatpush.bf16.msrb.mxu2 %v2298_v5 }
 0x401   :  { %v1066_v25 = vpop.f32.mrf.mxu0 }
 0x406   :  { %2172 = vmatmul.msk.bf16.vlgmr.msrb.gmra.mxu3 %vm84_vm1, %v2631_v35 }
 0x407   :  { %1439 = vmatpush.bf16.msrb.mxu3 %v2295_v4 }
 0x409   :  { %v1068_v33 = vpop.f32.mrf.mxu0 }
 0x40d   :  { %2158 = vmatmul.msk.bf16.vlgmr.msra.gmra.mxu2 %vm84_vm1, %v2358_v24 }
 0x40e   :  { %1239 = vmatpush.bf16.msra.mxu2 %v2532_v1 }
 0x411   :  { %v1134_v59 = vpop.f32.mrf.mxu0 }
 0x416   :  { %2177 = vmatmul.msk.bf16.vlgmr.msra.gmra.mxu3 %vm84_vm1, %v2380_v32 }
 0x417   :  { %1502 = vmatpush.bf16.msra.mxu3 %v2312_v9 }
 0x419   :  { %v1136_v62 = vpop.f32.mrf.mxu0 }
 0x41a   :  { %v75_v62 = vld [vmem:[%s2854_s0 + $0xc] sm:$0x8] }
 0x41b   :  { %v1489_v63 = vunpack.c.l.b16 %v75_v62 }
 0x41d   :  { %2162 = vmatmul.msk.bf16.vlgmr.msrb.gmra.mxu2 %vm84_vm1, %v2631_v35 }
 0x41e   :  { %1294 = vmatpush.bf16.msrb.mxu2 %v2301_v6 }
 0x426   :  { %2181 = vmatmul.msk.bf16.vlgmr.msrb.gmra.mxu3 %vm84_vm1, %v2543_v22 }
 0x427   :  { %1570 = vmatpush.bf16.msrb.mxu3 %v2337_v17 }
 0x42d   :  { %2167 = vmatmul.msk.bf16.vlgmr.msra.gmra.mxu2 %vm84_vm1, %v2322_v11 }
 0x43d   :  { %2171 = vmatmul.msk.bf16.vlgmr.msrb.gmra.mxu2 %vm84_vm1, %v2543_v22 }
 0x470   :  { %v984_v37 = vpop.f32.mrf.mxu2 }
 0x471   :  { %v988_v41 = vadd.f32 %v984_v37, %v829_v49 }
 0x478   :  { %v986_v28 = vpop.f32.mrf.mxu2 }
 0x480   :  { %v1038_v23 = vpop.f32.mrf.mxu2 }
 0x481   :  { %v1042_v46 = vadd.f32 %v1038_v23, %v1028_v45 }
 0x483   :  { %v1056_v48 = vadd.f32 %v1052_v21, %v1042_v46 }
 0x485   :  { %v1070_v49 = vadd.f32 %v1066_v25, %v1056_v48  ;;  %v2679_v25 = vrot.slane %v1331_v20, 2  ;;  %v2175_v48 = vld [vmem:[%s2856_s5 + $0x12] sm:$0x3] }
 0x487   :  { %v1072_v52 = vadd.f32 %v1071_v50, %v1070_v49  ;;  %v1362_v49 = vsel %vm88_vm0, %v2175_v48, 0 }
 0x488   :  { %v1040_v53 = vpop.f32.mrf.mxu2  ;;  %1371 = vmatpush.bf16.msra.mxu2 %v1362_v49 }
 0x489   :  { %vm1073_vm9 = vcmp.gt.f32.partialorder %v1072_v52, 0.0  ;;  %v1074_v54 = vmul.f32 0.2, %v1072_v52 }
 0x48b   :  { %v1075_v56 = vsel %vm1073_vm9, %v1072_v52, %v1074_v54 }
 0x48c   :  { %v1076_v57 = vpack.c.bf16 %v1075_v56, %v1075_v56  ;;  %1425 = vmatpush.bf16.msrb.mxu2 %v2337_v17 }
 0x48e   :  { %2157 = vmatmul.msk.bf16.vlgmr.msra.gmra.mxu1 %vm84_vm1, %v1076_v57 }
 0x48f   :  { %1226 = vmatpush.bf16.msra.mxu1 %v2474_v29 }
 0x490   :  { %v1108_v11 = vpop.f32.mrf.mxu2 }
 0x491   :  { %v1122_v58 = vadd.f32 %v1121_v44, %v1108_v11 }
 0x493   :  { %v1138_v13 = vadd.f32 %v1134_v59, %v1122_v58 }
 0x498   :  { %v1110_v47 = vpop.f32.mrf.mxu2 }
 0x49e   :  { %2161 = vmatmul.msk.bf16.vlgmr.msrb.gmra.mxu1 %vm84_vm1, %v2494_v40 }
 0x49f   :  { %1280 = vmatpush.bf16.msrb.mxu1 %v2295_v4 }
 0x4a0   :  { %v1165_v60 = vpop.f32.mrf.mxu2 }
 0x4a8   :  { %v1167_v0 = vpop.f32.mrf.mxu2 }
 0x4a9   :  { %v1490_v0 = vpack.c.b16 %v1489_v63, %v1489_v63 }
 0x4ae   :  { %2166 = vmatmul.msk.bf16.vlgmr.msra.gmra.mxu1 %vm84_vm1, %v2358_v24 }
 0x4af   :  { %1343 = vmatpush.bf16.msra.mxu1 %v2312_v9  ;;  %v1186_v9 = vpop.f32.mrf.mxu3 }
 0x4b7   :  { %v1188_v2 = vpop.f32.mrf.mxu3 }
 0x4be   :  { %2170 = vmatmul.msk.bf16.vlgmr.msrb.gmra.mxu1 %vm84_vm1, %v2494_v40 }
 0x4bf   :  { %1411 = vmatpush.bf16.msrb.mxu1 %v2467_v26 }
 0x4ce   :  { %2174 = vmatmul.msk.bf16.vlgmr.msra.gmra.mxu1 %vm84_vm1, %v2679_v25 }
 0x4cf   :  { %1467 = vmatpush.bf16.msra.mxu1 %v2348_v19 }
 0x4de   :  { %2179 = vmatmul.msk.bf16.vlgmr.msrb.gmra.mxu1 %vm84_vm1, %v2427_v18 }
 0x4df   :  { %1544 = vmatpush.bf16.msrb.mxu1 %v2474_v29 }
 0x4ee   :  { %2183 = vmatmul.msk.bf16.vlgmr.msra.gmra.mxu1 %vm84_vm1, %v2636_v42 }
 0x4ef   :  { %1598 = vmatpush.bf16.msra.mxu1 %v2348_v19  ;;  %v1241_v19 = vpop.f32.mrf.mxu2 }
 0x4fe   :  { %2188 = vmatmul.msk.bf16.vlgmr.msrb.gmra.mxu1 %vm84_vm1, %v2427_v18 }
 0x4ff   :  { %1667 = vmatpush.bf16.msrb.mxu1 %v2474_v29 }
 0x50b   :  { %v1094_v7 = vpop.f32.mrf.mxu1 }
 0x50c   :  { %v2674_v8 = vadd.f32 %v1094_v7, %v988_v41  ;;  %v1243_v41 = vpop.f32.mrf.mxu2 }
 0x50e   :  { %2192 = vmatmul.msk.bf16.vlgmr.msra.gmra.mxu1 %vm84_vm1, %v2679_v25 }
 0x50f   :  { %1736 = vmatpush.bf16.msra.mxu1 %v2474_v29 }
 0x513   :  { %v1096_v55 = vpop.f32.mrf.mxu1 }
 0x514   :  { %v1296_v45 = vpop.f32.mrf.mxu2  ;;  %v2732_v55 = vrot.slane %v1490_v0, 3 }
 0x516   :  { %2185 = vmatmul.msk.bf16.vlgmr.msra.gmra.mxu3 %vm84_vm1, %v2732_v55 }
 0x51b   :  { %v1148_v15 = vpop.f32.mrf.mxu1 }
 0x51c   :  { %v1152_v16 = vadd.f32 %v1148_v15, %v1138_v13  ;;  %v1298_v50 = vpop.f32.mrf.mxu2 }
 0x51e   :  { %v1169_v21 = vadd.f32 %v1165_v60, %v1152_v16  ;;  %2197 = vmatmul.msk.bf16.vlgmr.msrb.gmra.mxu1 %vm84_vm1, %v2490_v39 }
 0x51f   :  { %1790 = vmatpush.bf16.msrb.mxu1 %v2295_v4 }
 0x520   :  { %v1190_v10 = vadd.f32 %v1186_v9, %v1169_v21 }
 0x522   :  { %v1192_v30 = vadd.f32 %v1191_v27, %v1190_v10 }
 0x523   :  { %v1150_v31 = vpop.f32.mrf.mxu1 }
 0x524   :  { %vm1193_vm10 = vcmp.gt.f32.partialorder %v1192_v30, 0.0  ;;  %v1194_v33 = vmul.f32 0.2, %v1192_v30 }
 0x526   :  { %v1195_v34 = vsel %vm1193_vm10, %v1192_v30, %v1194_v33  ;;  %2190 = vmatmul.msk.bf16.vlgmr.msrb.gmra.mxu3 %vm84_vm1, %v2543_v22 }
 0x527   :  { %v1196_v36 = vpack.c.bf16 %v1195_v34, %v1195_v34 }
 0x529   :  { %2165 = vmatmul.msk.bf16.vlgmr.msra.gmra.mxu0 %vm84_vm1, %v1196_v36 }
 0x52a   :  { %1322 = vmatpush.bf16.msra.mxu0 %v2298_v5 }
 0x52b   :  { %v1228_v37 = vpop.f32.mrf.mxu1 }
 0x52c   :  { %v1242_v57 = vadd.f32 %v1241_v19, %v1228_v37 }
 0x52e   :  { %2202 = vmatmul.msk.bf16.vlgmr.msra.gmra.mxu1 %vm84_vm1, %v2494_v40 }
 0x52f   :  { %1859 = vmatpush.bf16.msra.mxu1 %v2532_v1 }
 0x533   :  { %v1230_v38 = vpop.f32.mrf.mxu1 }
 0x534   :  { %v2186_v38 = vld [vmem:[%s2856_s5 + $0x14] sm:$0x3] }
 0x539   :  { %2169 = vmatmul.msk.bf16.vlgmr.msrb.gmra.mxu0 %vm84_vm1, %v2490_v39 }
 0x53a   :  { %1398 = vmatpush.bf16.msrb.mxu0 %v2532_v1 }
 0x53b   :  { %v1282_v18 = vpop.f32.mrf.mxu1 }
 0x53e   :  { %2206 = vmatmul.msk.bf16.vlgmr.msrb.gmra.mxu1 %vm84_vm1, %v2636_v42 }
 0x53f   :  { %1914 = vmatpush.bf16.msrb.mxu1 %v2301_v6 }
 0x543   :  { %v1284_v44 = vpop.f32.mrf.mxu1 }
 0x549   :  { %2173 = vmatmul.msk.bf16.vlgmr.msra.gmra.mxu0 %vm84_vm1, %v2636_v42 }
 0x54a   :  { %1453 = vmatpush.bf16.msra.mxu0 %v2301_v6 }
 0x54b   :  { %v1345_v46 = vpop.f32.mrf.mxu1 }
 0x54e   :  { %2211 = vmatmul.msk.bf16.vlgmr.msra.gmra.mxu1 %vm84_vm1, %v2494_v40 }
 0x54f   :  { %1982 = vmatpush.bf16.msra.mxu1 %v2337_v17 }
 0x553   :  { %v1347_v53 = vpop.f32.mrf.mxu1 }
 0x559   :  { %2178 = vmatmul.msk.bf16.vlgmr.msrb.gmra.mxu0 %vm84_vm1, %v2358_v24  ;;  %v1254_v24 = vpop.f32.mrf.mxu3 }
 0x55a   :  { %v1258_v58 = vadd.f32 %v1254_v24, %v1242_v57 }
 0x55b   :  { %v1413_v27 = vpop.f32.mrf.mxu1 }
 0x55e   :  { %2215 = vmatmul.msk.bf16.vlgmr.msrb.gmra.mxu1 %vm84_vm1, %v2732_v55 }
 0x561   :  { %v1256_v28 = vpop.f32.mrf.mxu3 }
 0x563   :  { %v1415_v31 = vpop.f32.mrf.mxu1 }
 0x564   :  { %v1619_v31 = vperm.slane %v2416_v43, 3 }
 0x569   :  { %2182 = vmatmul.msk.bf16.vlgmr.msra.gmra.mxu0 %vm84_vm1, %v2584_v14  ;;  %v1310_v23 = vpop.f32.mrf.mxu3 }
 0x56b   :  { %v1469_v36 = vpop.f32.mrf.mxu1 }
 0x56e   :  { %2220 = vmatmul.msk.bf16.vlgmr.msra.gmra.mxu1 %vm84_vm1, %v2679_v25 }
 0x571   :  { %v1312_v51 = vpop.f32.mrf.mxu3 }
 0x573   :  { %v1471_v24 = vpop.f32.mrf.mxu1 }
 0x574   :  { %v2200_v24 = vld [vmem:[%s2856_s5 + $0x18] sm:$0x3] }
 0x579   :  { %v1387_v21 = vpop.f32.mrf.mxu3 }
 0x581   :  { %v1389_v10 = vpop.f32.mrf.mxu3 }
 0x5a6   :  { %v1214_v52 = vpop.f32.mrf.mxu0 }
 0x5a7   :  { %v2727_v54 = vadd.f32 %v1214_v52, %v2674_v8  ;;  %v1546_v52 = vpop.f32.mrf.mxu1 }
 0x5ae   :  { %v1216_v56 = vpop.f32.mrf.mxu0 }
 0x5b6   :  { %v1268_v11 = vpop.f32.mrf.mxu0 }
 0x5b7   :  { %v1272_v47 = vadd.f32 %v1268_v11, %v1258_v58  ;;  %v1509_v58 = vperm.slane %v2416_v43, 2 }
 0x5b9   :  { %v1286_v59 = vadd.f32 %v1282_v18, %v1272_v47  ;;  %v1548_v47 = vpop.f32.mrf.mxu1 }
 0x5bb   :  { %v1300_v61 = vadd.f32 %v1296_v45, %v1286_v59 }
 0x5bd   :  { %v1314_v9 = vadd.f32 %v1310_v23, %v1300_v61 }
 0x5be   :  { %v1270_v60 = vpop.f32.mrf.mxu0 }
 0x5c6   :  { %v1324_v2 = vpop.f32.mrf.mxu0 }
 0x5c7   :  { %v1328_v7 = vadd.f32 %v1324_v2, %v1314_v9 }
 0x5c9   :  { %v1349_v8 = vadd.f32 %v1345_v46, %v1328_v7  ;;  %v1600_v7 = vpop.f32.mrf.mxu1 }
 0x5cb   :  { %v1351_v13 = vadd.f32 %v1350_v12, %v1349_v8  ;;  %v2194_v12 = vld [vmem:[%s2856_s5 + $0x16] sm:$0x3] }
 0x5cd   :  { %vm1352_vm11 = vcmp.gt.f32.partialorder %v1351_v13, 0.0  ;;  %v1353_v3 = vmul.f32 0.2, %v1351_v13 }
 0x5ce   :  { %v1326_v15 = vpop.f32.mrf.mxu0 }
 0x5cf   :  { %v1354_v16 = vsel %vm1352_vm11, %v1351_v13, %v1353_v3  ;;  %v1631_v3 = vsel %vm88_vm0, %v2194_v12, 0 }
 0x5d0   :  { %v1355_v20 = vpack.c.bf16 %v1354_v16, %v1354_v16  ;;  %1640 = vmatpush.bf16.msra.mxu3 %v1631_v3 }
 0x5d1   :  { %v1602_v15 = vpop.f32.mrf.mxu1 }
 0x5d2   :  { %2176 = vmatmul.msk.bf16.vlgmr.msra.gmra.mxu2 %vm84_vm1, %v1355_v20 }
 0x5d3   :  { %1481 = vmatpush.bf16.msra.mxu2 %v2298_v5 }
 0x5d4   :  { %1694 = vmatpush.bf16.msrb.mxu3 %v2301_v6 }
 0x5e2   :  { %2180 = vmatmul.msk.bf16.vlgmr.msrb.gmra.mxu2 %vm84_vm1, %v2494_v40 }
 0x5e3   :  { %1557 = vmatpush.bf16.msrb.mxu2 %v2532_v1 }
 0x5f2   :  { %2184 = vmatmul.msk.bf16.vlgmr.msra.gmra.mxu2 %vm84_vm1, %v2679_v25 }
 0x5f3   :  { %1612 = vmatpush.bf16.msra.mxu2 %v2298_v5  ;;  %v1400_v5 = vpop.f32.mrf.mxu0 }
 0x5f4   :  { %v1401_v45 = vadd.f32 %v1400_v5, %v1387_v21 }
 0x5f6   :  { %v1417_v46 = vadd.f32 %v1413_v27, %v1401_v45 }
 0x5fb   :  { %v1402_v30 = vpop.f32.mrf.mxu0 }
 0x602   :  { %2189 = vmatmul.msk.bf16.vlgmr.msrb.gmra.mxu2 %vm84_vm1, %v2380_v32  ;;  %v1441_v32 = vpop.f32.mrf.mxu3 }
 0x603   :  { %1680 = vmatpush.bf16.msrb.mxu2 %v2295_v4  ;;  %v1455_v34 = vpop.f32.mrf.mxu0 }
 0x60a   :  { %v1443_v33 = vpop.f32.mrf.mxu3 }
 0x60b   :  { %v1457_v19 = vpop.f32.mrf.mxu0 }
 0x612   :  { %2193 = vmatmul.msk.bf16.vlgmr.msra.gmra.mxu2 %vm84_vm1, %v2732_v55  ;;  %v1504_v37 = vpop.f32.mrf.mxu3 }
 0x613   :  { %1749 = vmatpush.bf16.msra.mxu2 %v2532_v1 }
 0x61a   :  { %v1506_v41 = vpop.f32.mrf.mxu3 }
 0x622   :  { %2198 = vmatmul.msk.bf16.vlgmr.msrb.gmra.mxu2 %vm84_vm1, %v2631_v35  ;;  %v1572_v2 = vpop.f32.mrf.mxu3 }
 0x623   :  { %1804 = vmatpush.bf16.msrb.mxu2 %v2301_v6 }
 0x62a   :  { %v1574_v13 = vpop.f32.mrf.mxu3 }
 0x632   :  { %2203 = vmatmul.msk.bf16.vlgmr.msra.gmra.mxu2 %vm84_vm1, %v2490_v39  ;;  %v1521_v39 = vsel %vm88_vm0, %v2186_v38, 0 }
 0x633   :  { %1872 = vmatpush.bf16.msra.mxu2 %v2467_v26  ;;  %1530 = vmatpush.bf16.msrb.mxu0 %v1521_v39  ;;  %v1669_v39 = vpop.f32.mrf.mxu1 }
 0x637   :  { %1584 = vmatpush.bf16.msra.mxu0 %v2295_v4 }
 0x642   :  { %2207 = vmatmul.msk.bf16.vlgmr.msrb.gmra.mxu2 %vm84_vm1, %v2679_v25 }
 0x652   :  { %2212 = vmatmul.msk.bf16.vlgmr.msra.gmra.mxu2 %vm84_vm1, %v2584_v14 }
 0x655   :  { %v1373_v18 = vpop.f32.mrf.mxu2 }
 0x656   :  { %v1377_v28 = vadd.f32 %v1373_v18, %v2727_v54  ;;  %v1713_v18 = vsel %vm88_vm0, %v2200_v24, 0 }
 0x65d   :  { %v1375_v44 = vpop.f32.mrf.mxu2 }
 0x665   :  { %v1427_v23 = vpop.f32.mrf.mxu2 }
 0x666   :  { %v1431_v48 = vadd.f32 %v1427_v23, %v1417_v46 }
 0x668   :  { %v1445_v49 = vadd.f32 %v1441_v32, %v1431_v48 }
 0x66a   :  { %v1459_v51 = vadd.f32 %v1455_v34, %v1445_v49 }
 0x66c   :  { %v1473_v53 = vadd.f32 %v1469_v36, %v1459_v51 }
 0x66d   :  { %v1429_v50 = vpop.f32.mrf.mxu2 }
 0x675   :  { %v1483_v56 = vpop.f32.mrf.mxu2 }
 0x676   :  { %v1487_v57 = vadd.f32 %v1483_v56, %v1473_v53  ;;  %v1701_v56 = vperm.slane %v2416_v43, 4 }
 0x678   :  { %v1508_v11 = vadd.f32 %v1504_v37, %v1487_v57 }
 0x67a   :  { %v1510_v59 = vadd.f32 %v1509_v58, %v1508_v11 }
 0x67c   :  { %vm1511_vm12 = vcmp.gt.f32.partialorder %v1510_v59, 0.0  ;;  %v1512_v60 = vmul.f32 0.2, %v1510_v59 }
 0x67d   :  { %v1485_v54 = vpop.f32.mrf.mxu2 }
 0x67e   :  { %v1513_v61 = vsel %vm1511_vm12, %v1510_v59, %v1512_v60 }
 0x67f   :  { %v1514_v62 = vpack.c.bf16 %v1513_v61, %v1513_v61 }
 0x681   :  { %2187 = vmatmul.msk.bf16.vlgmr.msrb.gmra.mxu0 %vm84_vm1, %v1514_v62 }
 0x682   :  { %1654 = vmatpush.bf16.msrb.mxu0 %v2467_v26 }
 0x685   :  { %v1559_v63 = vpop.f32.mrf.mxu2 }
 0x686   :  { %v1560_v9 = vadd.f32 %v1559_v63, %v1546_v52 }
 0x688   :  { %v1576_v5 = vadd.f32 %v1572_v2, %v1560_v9 }
 0x68d   :  { %v1561_v0 = vpop.f32.mrf.mxu2 }
 0x691   :  { %2191 = vmatmul.msk.bf16.vlgmr.msra.gmra.mxu0 %vm84_vm1, %v2584_v14 }
 0x692   :  { %1722 = vmatpush.bf16.msra.mxu0 %v1713_v18 }
 0x695   :  { %v1614_v8 = vpop.f32.mrf.mxu2 }
 0x69d   :  { %v1616_v16 = vpop.f32.mrf.mxu2 }
 0x6a1   :  { %2196 = vmatmul.msk.bf16.vlgmr.msrb.gmra.mxu0 %vm84_vm1, %v2494_v40 }
 0x6a2   :  { %1776 = vmatpush.bf16.msrb.mxu0 %v2337_v17 }
 0x6a5   :  { %v1682_v19 = vpop.f32.mrf.mxu2 }
 0x6ad   :  { %v1684_v44 = vpop.f32.mrf.mxu2 }
 0x6b5   :  { %v1751_v49 = vpop.f32.mrf.mxu2 }
 0x6bd   :  { %v1753_v11 = vpop.f32.mrf.mxu2 }
 0x6c5   :  { %v1806_v63 = vpop.f32.mrf.mxu2 }
 0x6cd   :  { %v1808_v2 = vpop.f32.mrf.mxu2 }
 0x6fe   :  { %v1532_v20 = vpop.f32.mrf.mxu0 }
 0x6ff   :  { %v1536_v21 = vadd.f32 %v1532_v20, %v1377_v28  ;;  %v1671_v28 = vpop.f32.mrf.mxu1  ;;  %v1811_v20 = vperm.slane %v2416_v43, 5 }
 0x706   :  { %v1534_v10 = vpop.f32.mrf.mxu0 }
 0x707   :  { %v1738_v48 = vpop.f32.mrf.mxu1 }
 0x708   :  { %v1752_v50 = vadd.f32 %v1751_v49, %v1738_v48 }
 0x70e   :  { %v1586_v40 = vpop.f32.mrf.mxu0 }
 0x70f   :  { %v1590_v27 = vadd.f32 %v1586_v40, %v1576_v5  ;;  %v1740_v57 = vpop.f32.mrf.mxu1 }
 0x711   :  { %v1604_v32 = vadd.f32 %v1600_v7, %v1590_v27 }
 0x713   :  { %v1618_v30 = vadd.f32 %v1614_v8, %v1604_v32 }
 0x715   :  { %v1620_v33 = vadd.f32 %v1619_v31, %v1618_v30 }
 0x716   :  { %v1588_v34 = vpop.f32.mrf.mxu0 }
 0x717   :  { %vm1621_vm13 = vcmp.gt.f32.partialorder %v1620_v33, 0.0  ;;  %v1622_v36 = vmul.f32 0.2, %v1620_v33  ;;  %v1792_v62 = vpop.f32.mrf.mxu1 }
 0x719   :  { %v1623_v37 = vsel %vm1621_vm13, %v1620_v33, %v1622_v36  ;;  %v1874_v33 = vpop.f32.mrf.mxu2 }
 0x71a   :  { %v1624_v38 = vpack.c.bf16 %v1623_v37, %v1623_v37  ;;  %v2216_v37 = vld [vmem:[%s2856_s5 + $0x1c] sm:$0x3] }
 0x71c   :  { %2195 = vmatmul.msk.bf16.vlgmr.msra.gmra.mxu3 %vm84_vm1, %v1624_v38 }
 0x71d   :  { %1762 = vmatpush.bf16.msra.mxu3 %v2467_v26 }
 0x71e   :  { %v1656_v6 = vpop.f32.mrf.mxu0 }
 0x71f   :  { %v1670_v46 = vadd.f32 %v1669_v39, %v1656_v6  ;;  %v1933_v6 = vsel %vm88_vm0, %v2216_v37, 0 }
 0x720   :  { %1942 = vmatpush.bf16.msrb.mxu2 %v1933_v6 }
 0x721   :  { %v1686_v51 = vadd.f32 %v1682_v19, %v1670_v46  ;;  %v1876_v38 = vpop.f32.mrf.mxu2 }
 0x724   :  { %1996 = vmatpush.bf16.msra.mxu2 %v2295_v4 }
 0x726   :  { %v1658_v41 = vpop.f32.mrf.mxu0 }
 0x72c   :  { %2199 = vmatmul.msk.bf16.vlgmr.msrb.gmra.mxu3 %vm84_vm1, %v2636_v42 }
 0x73c   :  { %2204 = vmatmul.msk.bf16.vlgmr.msra.gmra.mxu3 %vm84_vm1, %v2543_v22 }
 0x79f   :  { %v1642_v26 = vpop.f32.mrf.mxu3 }
 0x7a0   :  { %v1646_v45 = vadd.f32 %v1642_v26, %v1536_v21  ;;  %v1921_v26 = vperm.slane %v2416_v43, 6 }
 0x7a7   :  { %v1644_v23 = vpop.f32.mrf.mxu3 }
 0x7af   :  { %v1696_v52 = vpop.f32.mrf.mxu3 }
 0x7b0   :  { %v1700_v53 = vadd.f32 %v1696_v52, %v1686_v51  ;;  %v2222_v52 = vld [vmem:[%s2856_s5 + $0x1e] sm:$0x3] }
 0x7b2   :  { %v1702_v58 = vadd.f32 %v1701_v56, %v1700_v53  ;;  %v2015_v53 = vsel %vm88_vm0, %v2222_v52, 0 }
 0x7b4   :  { %vm1703_vm14 = vcmp.gt.f32.partialorder %v1702_v58, 0.0  ;;  %v1704_v47 = vmul.f32 0.2, %v1702_v58 }
 0x7b6   :  { %v1705_v59 = vsel %vm1703_vm14, %v1702_v58, %v1704_v47  ;;  %v2234_v58 = vmov 0.0  }
 0x7b7   :  { %v1706_v60 = vpack.c.bf16 %v1705_v59, %v1705_v59  ;;  %v1698_v54 = vpop.f32.mrf.mxu3  ;;  %42 = vst.msk [vmem:[#allocation2] sm:$0x3] %vm41_vm3, %v2234_v58 }
 0x7b9   :  { %2201 = vmatmul.msk.bf16.vlgmr.msra.gmra.mxu0 %vm84_vm1, %v1706_v60 }
 0x7ba   :  { %1846 = vmatpush.bf16.msra.mxu0 %v2474_v29 }
 0x7bf   :  { %v1764_v61 = vpop.f32.mrf.mxu3 }
 0x7c7   :  { %v1766_v9 = vpop.f32.mrf.mxu3 }
 0x7c9   :  { %2205 = vmatmul.msk.bf16.vlgmr.msrb.gmra.mxu0 %vm84_vm1, %v2631_v35  ;;  %v2208_v35 = vld [vmem:[%s2856_s5 + $0x1a] sm:$0x3] }
 0x7ca   :  { %1900 = vmatpush.bf16.msrb.mxu0 %v2295_v4  ;;  %v1823_v0 = vsel %vm88_vm0, %v2208_v35, 0  ;;  %vm2055_vm0 = vcmask 1043456  }
 0x7cb   :  { %1832 = vmatpush.bf16.msrb.mxu3 %v1823_v0 }
 0x7cf   :  { %1886 = vmatpush.bf16.msra.mxu3 %v2337_v17 }
 0x7d9   :  { %2210 = vmatmul.msk.bf16.vlgmr.msra.gmra.mxu0 %vm84_vm1, %v2543_v22 }
 0x7da   :  { %1969 = vmatpush.bf16.msra.mxu0 %v2532_v1  ;;  %v1794_v1 = vpop.f32.mrf.mxu1 }
 0x7e2   :  { %v1861_v12 = vpop.f32.mrf.mxu1 }
 0x7e9   :  { %2214 = vmatmul.msk.bf16.vlgmr.msrb.gmra.mxu0 %vm84_vm1, %v2679_v25 }
 0x7ea   :  { %v1863_v21 = vpop.f32.mrf.mxu1 }
 0x7f2   :  { %v1916_v36 = vpop.f32.mrf.mxu1 }
 0x7f9   :  { %2219 = vmatmul.msk.bf16.vlgmr.msra.gmra.mxu0 %vm84_vm1, %v2543_v22  ;;  %v1768_v22 = vadd.f32 %v1764_v61, %v1752_v50 }
 0x7fa   :  { %v1918_v39 = vpop.f32.mrf.mxu1 }
 0x802   :  { %v1984_v51 = vpop.f32.mrf.mxu1 }
 0x80a   :  { %v1986_v11 = vpop.f32.mrf.mxu1 }
 0x836   :  { %v1724_v7 = vpop.f32.mrf.mxu0 }
 0x837   :  { %v1728_v25 = vadd.f32 %v1724_v7, %v1646_v45  ;;  %v2047_v7 = vld [vmem:[%s2859_s7] sm:$0xf] }
 0x838   :  { %2224 = vmatpush.msk.msrb.mxu0 %vm2055_vm0, %v2047_v7 }
 0x83e   :  { %v1726_v8 = vpop.f32.mrf.mxu0 }
 0x83f   :  { %v2031_v8 = vld [vmem:[#allocation2] sm:$0x3] }
 0x846   :  { %v1778_v13 = vpop.f32.mrf.mxu0 }
 0x847   :  { %v1782_v3 = vadd.f32 %v1778_v13, %v1768_v22 }
 0x849   :  { %v1796_v15 = vadd.f32 %v1792_v62, %v1782_v3  ;;  %v2231_v3 = vld [vmem:[%s2858_s6] ss:$0 sm:$0xff] }
 0x84b   :  { %v1810_v16 = vadd.f32 %v1806_v63, %v1796_v15  ;;  %v2003_v63 = vperm.slane %v2416_v43, 7 }
 0x84d   :  { %v1812_v10 = vadd.f32 %v1811_v20, %v1810_v16 }
 0x84e   :  { %v1780_v5 = vpop.f32.mrf.mxu0 }
 0x84f   :  { %vm1813_vm15 = vcmp.gt.f32.partialorder %v1812_v10, 0.0  ;;  %v1814_v40 = vmul.f32 0.2, %v1812_v10 }
 0x851   :  { %v1815_v27 = vsel %vm1813_vm15, %v1812_v10, %v1814_v40 }
 0x852   :  { %v1816_v17 = vpack.c.bf16 %v1815_v27, %v1815_v27 }
 0x854   :  { %2209 = vmatmul.msk.bf16.vlgmr.msrb.gmra.mxu3 %vm84_vm1, %v1816_v17 }
 0x855   :  { %1956 = vmatpush.bf16.msrb.mxu3 %v2474_v29 }
 0x856   :  { %v1848_v32 = vpop.f32.mrf.mxu0 }
 0x857   :  { %v1862_v30 = vadd.f32 %v1861_v12, %v1848_v32 }
 0x859   :  { %v1878_v18 = vadd.f32 %v1874_v33, %v1862_v30 }
 0x85e   :  { %v1850_v31 = vpop.f32.mrf.mxu0 }
 0x864   :  { %2213 = vmatmul.msk.bf16.vlgmr.msra.gmra.mxu3 %vm84_vm1, %v2636_v42 }
 0x865   :  { %2024 = vmatpush.bf16.msra.mxu3 %v2015_v53 }
 0x866   :  { %v1902_v34 = vpop.f32.mrf.mxu0 }
 0x86e   :  { %v1904_v29 = vpop.f32.mrf.mxu0 }
 0x874   :  { %2218 = vmatmul.msk.bf16.vlgmr.msrb.gmra.mxu3 %vm84_vm1, %v2584_v14 }
 0x876   :  { %v1971_v50 = vpop.f32.mrf.mxu0 }
 0x87e   :  { %v1973_v57 = vpop.f32.mrf.mxu0 }
 0x8d7   :  { %v1834_v19 = vpop.f32.mrf.mxu3 }
 0x8d8   :  { %v1838_v42 = vadd.f32 %v1834_v19, %v1728_v25  ;;  %v16_v25 = vstv %s2860_s8 }
 0x8d9   :  { %17 = vst [vmem:[#allocation4] sm:$0x1] %v16_v25 }
 0x8df   :  { %v1836_v24 = vpop.f32.mrf.mxu3 }
 0x8e0   :  { %v2232_v10 = vld [vmem:[#allocation4] ss:$0 sm:$0xff] }
 0x8e7   :  { %v1888_v14 = vpop.f32.mrf.mxu3 }
 0x8e8   :  { %v1892_v41 = vadd.f32 %v1888_v14, %v1878_v18 }
 0x8ea   :  { %v1906_v28 = vadd.f32 %v1902_v34, %v1892_v41 }
 0x8ec   :  { %v1920_v44 = vadd.f32 %v1916_v36, %v1906_v28 }
 0x8ee   :  { %v1922_v45 = vadd.f32 %v1921_v26, %v1920_v44 }
 0x8ef   :  { %v1890_v23 = vpop.f32.mrf.mxu3 }
 0x8f0   :  { %vm1923_vm2 = vcmp.gt.f32.partialorder %v1922_v45, 0.0  ;;  %v1924_v46 = vmul.f32 0.2, %v1922_v45 }
 0x8f2   :  { %v1925_v48 = vsel %vm1923_vm2, %v1922_v45, %v1924_v46 }
 0x8f3   :  { %v1926_v49 = vpack.c.bf16 %v1925_v48, %v1925_v48 }
 0x8f5   :  { %2217 = vmatmul.msk.bf16.vlgmr.msrb.gmra.mxu2 %vm84_vm1, %v1926_v49 }
 0x8f7   :  { %v1958_v4 = vpop.f32.mrf.mxu3 }
 0x8f8   :  { %v1972_v60 = vadd.f32 %v1971_v50, %v1958_v4 }
 0x8fa   :  { %v1988_v54 = vadd.f32 %v1984_v51, %v1972_v60 }
 0x8ff   :  { %v1960_v56 = vpop.f32.mrf.mxu3 }
 0x905   :  { %2221 = vmatmul.msk.bf16.vlgmr.msra.gmra.mxu2 %vm84_vm1, %v2732_v55 }
 0x978   :  { %v1944_v47 = vpop.f32.mrf.mxu2 }
 0x979   :  { %v1948_v59 = vadd.f32 %v1944_v47, %v1838_v42 }
 0x980   :  { %v1946_v55 = vpop.f32.mrf.mxu2 }
 0x988   :  { %v1998_v61 = vpop.f32.mrf.mxu2 }
 0x989   :  { %v2002_v62 = vadd.f32 %v1998_v61, %v1988_v54 }
 0x98b   :  { %v2004_v35 = vadd.f32 %v2003_v63, %v2002_v62 }
 0x98d   :  { %vm2005_vm4 = vcmp.gt.f32.partialorder %v2004_v35, 0.0  ;;  %v2006_v9 = vmul.f32 0.2, %v2004_v35 }
 0x98f   :  { %v2007_v0 = vsel %vm2005_vm4, %v2004_v35, %v2006_v9 }
 0x990   :  { %v2008_v1 = vpack.c.bf16 %v2007_v0, %v2007_v0  ;;  %v2000_v2 = vpop.f32.mrf.mxu2 }
 0x992   :  { %2223 = vmatmul.msk.bf16.vlgmr.msra.gmra.mxu3 %vm84_vm1, %v2008_v1 }
 0xa15   :  { %v2026_v43 = vpop.f32.mrf.mxu3 }
 0xa16   :  { %v2030_v12 = vadd.f32 %v2026_v43, %v1948_v59 }
 0xa18   :  { %v2032_v22 = vadd.f32 %v2031_v8, %v2030_v12 }
 0xa1a   :  { %2034 = vst.msk [vmem:[#allocation2] sm:$0x3] %vm41_vm3, %v2032_v22 }
 0xa1d   :  { %v2028_v13 = vpop.f32.mrf.mxu3 }
 0xa21   :  { %v2038_v15 = vld [vmem:[#allocation2] sm:$0x3] }
 0xa22   :  { %v2043_v16 = vadd.f32 %v2231_v3, %v2038_v15 }
 0xa24   :  { %vm2044_vm5 = vcmp.gt.f32.partialorder %v2043_v16, 0.0  ;;  %v2045_v20 = vmul.f32 0.2, %v2043_v16 }
 0xa26   :  { %v2046_v21 = vsel %vm2044_vm5, %v2043_v16, %v2045_v20 }
 0xa27   :  { %2225 = vmatmul.msk.f32.vlgmr.msrb.gmra.mxu0 %vm84_vm1, %v2046_v21 }
 0xaa4   :  { %v2076_v5 = vpop.f32.mrf.mxu0 }
 0xaa5   :  { %v2077_v40 = vadd.f32 %v2232_v10, %v2076_v5 }
 0xaa7   :  { %2080 = vst.msk [vmem:[%s2861_s9] sm:$0x3] %vm2079_vm6, %v2077_v40 }

</bundles_post_ra>
